<compile_context>
chip_gen: v7x
topology: tpu7x:2x2x1
jax: 0.10.0
libtpu: 0.0.40
codegen_flags: <defaults>
</compile_context>

<pallas_src>
import jax
import jax.numpy as jnp
from jax.experimental import pallas as pl
from jax.experimental.pallas import tpu as pltpu


def _round_up(x, m):
    return (x + m - 1) // m * m


def _pick_tile(dim, max_tile, align):
    """Return (padded_dim, tile) with tile dividing padded_dim."""
    if dim > max_tile:
        return _round_up(dim, max_tile), max_tile
    p = _round_up(dim, align)
    return p, p


# ----------------------------------------------------------------------------
# Kernel 1: embedding row gather (scalar-prefetched token ids drive index_map)
# ----------------------------------------------------------------------------
def _gather_row_kernel(ids_ref, table_ref, out_ref):
    del ids_ref  # only used inside the index_maps
    out_ref[...] = table_ref[...]


def embedding_lookup(table, ids):
    """table: (V, Ep) f32, ids: (n,) int32 -> (n, Ep) f32."""
    V, Ep = table.shape
    n = ids.shape[0]
    table3 = table.reshape(V, 1, Ep)
    out = pl.pallas_call(
        _gather_row_kernel,
        out_shape=jax.ShapeDtypeStruct((n, 1, Ep), table.dtype),
        grid_spec=pltpu.PrefetchScalarGridSpec(
            num_scalar_prefetch=1,
            grid=(n,),
            in_specs=[pl.BlockSpec((1, 1, Ep), lambda i, ids_ref: (ids_ref[i], 0, 0))],
            out_specs=pl.BlockSpec((1, 1, Ep), lambda i, ids_ref: (i, 0, 0)),
        ),
        compiler_params=pltpu.CompilerParams(dimension_semantics=("arbitrary",)),
    )(ids.astype(jnp.int32), table3)
    return out.reshape(n, Ep)


# ----------------------------------------------------------------------------
# Kernel 2: tiled matmul + bias. bf16 operands, f32 accumulation directly in
# the output block; bias added only on the last K step.
# ----------------------------------------------------------------------------
def _matmul_bias_kernel(a_ref, w_ref, b_ref, o_ref):
    k = pl.program_id(2)

    @pl.when(k == 0)
    def _():
        o_ref[...] = jnp.zeros_like(o_ref)

    o_ref[...] += jnp.dot(a_ref[...], w_ref[...], preferred_element_type=jnp.float32)

    @pl.when(k == pl.num_programs(2) - 1)
    def _():
        o_ref[...] += b_ref[...]


def matmul_bias(a, w, b, *, tm_max=128, tn_max=256, tk_max=512):
    """a: (M, K), w: (K, N) bf16, b: (N,) f32 -> (M, N) f32."""
    M, K = a.shape
    _, N = w.shape
    Mp, tm = _pick_tile(M, tm_max, 8)      # sublane dim
    Kp, tk = _pick_tile(K, tk_max, 128)    # lane dim of a / sublane dim of w
    Np, tn = _pick_tile(N, tn_max, 128)    # lane dim
    a_p = a.astype(jnp.bfloat16)
    if Mp != M or Kp != K:
        a_p = jnp.pad(a_p, ((0, Mp - M), (0, Kp - K)))
    w_p = w.astype(jnp.bfloat16)
    if Kp != K or Np != N:
        w_p = jnp.pad(w_p, ((0, Kp - K), (0, Np - N)))
    b_p = (b if Np == N else jnp.pad(b, (0, Np - N))).astype(jnp.float32).reshape(1, Np)

    out = pl.pallas_call(
        _matmul_bias_kernel,
        out_shape=jax.ShapeDtypeStruct((Mp, Np), jnp.float32),
        grid_spec=pltpu.PrefetchScalarGridSpec(
            num_scalar_prefetch=0,
            grid=(Mp // tm, Np // tn, Kp // tk),
            in_specs=[
                pl.BlockSpec((tm, tk), lambda i, j, k: (i, k)),
                pl.BlockSpec((tk, tn), lambda i, j, k: (k, j)),
                pl.BlockSpec((1, tn), lambda i, j, k: (0, j)),
            ],
            out_specs=pl.BlockSpec((tm, tn), lambda i, j, k: (i, j)),
        ),
        compiler_params=pltpu.CompilerParams(
            dimension_semantics=("parallel", "parallel", "arbitrary")),
    )(a_p, w_p, b_p)
    if Mp != M or Np != N:
        out = out[:M, :N]
    return out


# ----------------------------------------------------------------------------
# Kernel 3: LSTM recurrence.  Single grid step; the whole (T, Bp, 4*Hp) input
# projection is resident in VMEM, time loop statically unrolled, h/c live in
# VMEM scratch, one fused (Bp,Hp)x(Hp,4*Hp) matmul per step, output written
# directly in (Bp, T, Hp) layout.
# ----------------------------------------------------------------------------
def _sigmoid(x):
    # 0.5*(tanh(x/2)+1): tanh runs on the EUP, no VPU divide.
    return 0.5 * (jnp.tanh(0.5 * x) + 1.0)


def _lstm_seq_kernel(xp_ref, whh_ref, h_out_ref, h_st, c_st):
    T = xp_ref.shape[0]
    Hp = h_st.shape[1]

    h_st[...] = jnp.zeros_like(h_st)
    c_st[...] = jnp.zeros_like(c_st)

    for t in range(T):  # static unroll (T is small); chunk via grid for long T
        gates = xp_ref[t] + jnp.dot(
            h_st[...].astype(jnp.bfloat16), whh_ref[...],
            preferred_element_type=jnp.float32)              # (Bp, 4*Hp) f32
        i_g = _sigmoid(gates[:, 0 * Hp:1 * Hp])
        f_g = _sigmoid(gates[:, 1 * Hp:2 * Hp])
        g_g = jnp.tanh(gates[:, 2 * Hp:3 * Hp])
        o_g = _sigmoid(gates[:, 3 * Hp:4 * Hp])

        c_new = f_g * c_st[...] + i_g * g_g
        h_new = o_g * jnp.tanh(c_new)

        c_st[...] = c_new
        h_st[...] = h_new
        h_out_ref[:, t, :] = h_new


def lstm_recurrence(xp, whh):
    """xp: (T, Bp, 4*Hp) f32, whh: (Hp, 4*Hp) bf16 -> h_all: (Bp, T, Hp) f32."""
    T, Bp, G4 = xp.shape
    Hp = G4 // 4
    return pl.pallas_call(
        _lstm_seq_kernel,
        out_shape=jax.ShapeDtypeStruct((Bp, T, Hp), jnp.float32),
        grid_spec=pltpu.PrefetchScalarGridSpec(
            num_scalar_prefetch=0,
            grid=(1,),
            in_specs=[
                pl.BlockSpec((T, Bp, G4), lambda i: (0, 0, 0)),
                pl.BlockSpec((Hp, G4), lambda i: (0, 0)),
            ],
            out_specs=pl.BlockSpec((Bp, T, Hp), lambda i: (0, 0, 0)),
            scratch_shapes=[pltpu.VMEM((Bp, Hp), jnp.float32),
                            pltpu.VMEM((Bp, Hp), jnp.float32)],
        ),
        compiler_params=pltpu.CompilerParams(dimension_semantics=("arbitrary",)),
    )(xp.astype(jnp.float32), whh.astype(jnp.bfloat16))


# ----------------------------------------------------------------------------
# Kernel 4: classifier matmul (bf16 operands, f32 acc) with bias + log_softmax
# fused in the last-K-step epilogue.  Padded vocab columns carry a -1e30 bias
# so they never affect the max / logsumexp.
# ----------------------------------------------------------------------------
def _linear_logsoftmax_kernel(a_ref, w_ref, b_ref, o_ref):
    k = pl.program_id(1)

    @pl.when(k == 0)
    def _():
        o_ref[...] = jnp.zeros_like(o_ref)

    o_ref[...] += jnp.dot(a_ref[...], w_ref[...], preferred_element_type=jnp.float32)

    @pl.when(k == pl.num_programs(1) - 1)
    def _():
        logits = o_ref[...] + b_ref[...]
        m = jnp.max(logits, axis=-1, keepdims=True)
        z = logits - m
        lse = jnp.log(jnp.sum(jnp.exp(z), axis=-1, keepdims=True))
        o_ref[...] = z - lse


def linear_log_softmax(a, w, b, *, tm_max=128, tk_max=512):
    """a: (M, Hp), w: (Hp, Vp) bf16, b: (Vp,) f32 (padded cols = -1e30)."""
    M, K = a.shape
    _, Vp = w.shape
    Mp, tm = _pick_tile(M, tm_max, 8)
    Kp, tk = _pick_tile(K, tk_max, 128)
    a_p = a.astype(jnp.bfloat16)
    if Mp != M or Kp != K:
        a_p = jnp.pad(a_p, ((0, Mp - M), (0, Kp - K)))
    w_p = w.astype(jnp.bfloat16)
    if Kp != K:
        w_p = jnp.pad(w_p, ((0, Kp - K), (0, 0)))
    b2 = b.astype(jnp.float32).reshape(1, Vp)

    out = pl.pallas_call(
        _linear_logsoftmax_kernel,
        out_shape=jax.ShapeDtypeStruct((Mp, Vp), jnp.float32),
        grid_spec=pltpu.PrefetchScalarGridSpec(
            num_scalar_prefetch=0,
            grid=(Mp // tm, Kp // tk),
            in_specs=[
                pl.BlockSpec((tm, tk), lambda i, k: (i, k)),
                pl.BlockSpec((tk, Vp), lambda i, k: (k, 0)),
                pl.BlockSpec((1, Vp), lambda i, k: (0, 0)),
            ],
            out_specs=pl.BlockSpec((tm, Vp), lambda i, k: (i, 0)),
        ),
        compiler_params=pltpu.CompilerParams(
            dimension_semantics=("parallel", "arbitrary")),
    )(a_p, w_p, b2)
    return out if Mp == M else out[:M]


# ----------------------------------------------------------------------------
# DecoderRNN forward (kernel path; operates on pre-padded kernel params)
# ----------------------------------------------------------------------------
def decoder_rnn_forward(kparams, features, captions):
    """features: (B, E) f32; captions: (B, T) int32 -> (B, T, V) log-probs."""
    B, T = captions.shape
    E = features.shape[1]
    V, Ep = kparams["embedding"].shape
    Hp = kparams["w_hh"].shape[0]
    Bp = _round_up(B, 8)

    # 1) embeddings of captions[:, :-1] gathered in TIME-MAJOR order so no
    #    activation transpose is needed afterwards (only the tiny int-id
    #    (B, T-1) transpose).
    ids_tm = jnp.transpose(captions[:, :-1]).reshape(-1).astype(jnp.int32)  # ((T-1)*B,)
    emb_tm = embedding_lookup(kparams["embedding"], ids_tm).reshape(T - 1, B, Ep)

    # 2) LSTM input sequence, time-major with batch padded to a full sublane:
    #    x[0] = features, x[t] = emb[t-1]
    feat_p = jnp.pad(features.astype(jnp.float32), ((0, 0), (0, Ep - E)))
    x_seq = jnp.concatenate([feat_p[None], emb_tm], axis=0)        # (T, B, Ep)
    x_seq = jnp.pad(x_seq, ((0, 0), (0, Bp - B), (0, 0)))          # (T, Bp, Ep)

    # 3) input-to-hidden projection for every timestep in one MXU matmul,
    #    emitted directly in (T*Bp, 4*Hp) gate-band layout (no transpose).
    xp = matmul_bias(x_seq.reshape(T * Bp, Ep), kparams["w_ih"], kparams["b_gates"])
    xp = xp.reshape(T, Bp, 4 * Hp)

    # 4) sequential recurrence; h written directly in (Bp, T, Hp) layout.
    h_all = lstm_recurrence(xp, kparams["w_hh"])                   # (Bp, T, Hp)

    # 5) vocab projection + fused log_softmax over the padded, lane-dense vocab.
    h_bm = h_all[:B].reshape(B * T, Hp)
    logp = linear_log_softmax(h_bm, kparams["w_out"], kparams["b_out"])  # (B*T, Vp)
    return logp[:, :V].reshape(B, T, V)


# ----------------------------------------------------------------------------
# Deterministic synthetic parameters (PyTorch-style init, logical shapes)
# ----------------------------------------------------------------------------
def build_decoder_params(key, vocab_size, embed_size, hidden_size):
    E, H, V = embed_size, hidden_size, vocab_size
    ks = jax.random.split(key, 7)
    bound = 1.0 / (H ** 0.5)

    def u(k, shape):
        return jax.random.uniform(k, shape, jnp.float32, -bound, bound)

    return {
        "embedding": jax.random.normal(ks[0], (V, E), jnp.float32),  # nn.Embedding default N(0,1)
        "w_ih": u(ks[1], (E, 4 * H)),          # W_ih^T, gate order [i|f|g|o]
        "w_hh": u(ks[2], (H, 4 * H)),          # W_hh^T, gate order [i|f|g|o]
        "b_gates": u(ks[3], (4 * H,)) + u(ks[4], (4 * H,)),   # b_ih + b_hh
        "w_out": u(ks[5], (H, V)),             # linear weight^T
        "b_out": u(ks[6], (V,)),
    }


def prepare_kernel_params(params):
    """Pad lane dims to 128 multiples, place gate bands at 128-aligned offsets,
    pre-cast weights to bf16 (MXU operands), mask padded vocab bias with -1e30."""
    V, E = params["embedding"].shape
    H = params["w_hh"].shape[0]
    Vout = params["w_out"].shape[1]
    Ep, Hp, Vp = _round_up(E, 128), _round_up(H, 128), _round_up(Vout, 128)

    def pad_gate_cols(w, rows_pad):
        rows = w.shape[0]
        out = jnp.zeros((rows_pad, 4 * Hp), jnp.float32)
        for g in range(4):
            out = out.at[:rows, g * Hp:g * Hp + H].set(w[:, g * H:(g + 1) * H])
        return out

    b_g = jnp.zeros((4 * Hp,), jnp.float32)
    for g in range(4):
        b_g = b_g.at[g * Hp:g * Hp + H].set(params["b_gates"][g * H:(g + 1) * H])

    b_out = jnp.full((Vp,), -1e30, jnp.float32).at[:Vout].set(params["b_out"])

    return {
        "embedding": jnp.pad(params["embedding"], ((0, 0), (0, Ep - E))),        # (V, Ep) f32
        "w_ih": pad_gate_cols(params["w_ih"], Ep).astype(jnp.bfloat16),          # (Ep, 4*Hp)
        "b_gates": b_g,                                                          # (4*Hp,) f32
        "w_hh": pad_gate_cols(params["w_hh"], Hp).astype(jnp.bfloat16),          # (Hp, 4*Hp)
        "w_out": jnp.pad(params["w_out"],
                         ((0, Hp - H), (0, Vp - Vout))).astype(jnp.bfloat16),    # (Hp, Vp)
        "b_out": b_out,                                                          # (Vp,) f32
    }


# ----------------------------------------------------------------------------
# Pure-JAX reference for numerical cross-check (logical, unpadded params)
# ----------------------------------------------------------------------------
def decoder_rnn_reference(params, features, captions):
    B, T = captions.shape
    H = params["w_hh"].shape[0]

    emb = jnp.take(params["embedding"], captions[:, :-1], axis=0)               # (B, T-1, E)
    x_seq = jnp.concatenate([features[None], jnp.transpose(emb, (1, 0, 2))], axis=0)

    def step(carry, x_t):
        h, c = carry
        gates = x_t @ params["w_ih"] + params["b_gates"] + h @ params["w_hh"]
        i, f, g, o = jnp.split(gates, 4, axis=-1)
        i, f, g, o = jax.nn.sigmoid(i), jax.nn.sigmoid(f), jnp.tanh(g), jax.nn.sigmoid(o)
        c = f * c + i * g
        h = o * jnp.tanh(c)
        return (h, c), h

    init = (jnp.zeros((B, H), jnp.float32), jnp.zeros((B, H), jnp.float32))
    _, hs = jax.lax.scan(step, init, x_seq)                                      # (T, B, H)
    h_bm = jnp.transpose(hs, (1, 0, 2)).reshape(B * T, H)
    logits = h_bm @ params["w_out"] + params["b_out"]
    return jax.nn.log_softmax(logits, axis=-1).reshape(B, T, -1)


if __name__ == "__main__":
    key = jax.random.PRNGKey(0)
    kp, kf, kc = jax.random.split(key, 3)

    B, T = 2, 8
    embed_size, hidden_size, vocab_size = 32, 32, 50

    params = build_decoder_params(kp, vocab_size, embed_size, hidden_size)
    kparams = prepare_kernel_params(params)
    features = jax.random.normal(kf, (B, embed_size), jnp.float32)
    captions = jax.random.randint(kc, (B, T), 0, vocab_size, jnp.int32)

    fwd = jax.jit(decoder_rnn_forward)
    out = jax.block_until_ready(fwd(kparams, features, captions))

    assert out.shape == (B, T, vocab_size), out.shape
    assert bool(jnp.all(jnp.isfinite(out)))

    # rows are log-probabilities: exp must sum to 1
    row_sums = jnp.exp(out).sum(-1)
    assert bool(jnp.allclose(row_sums, 1.0, atol=1e-3)), row_sums

    # cross-check against the pure-JAX reference (bf16 MXU path -> looser tol)
    ref = decoder_rnn_reference(params, features, captions)
    err = float(jnp.max(jnp.abs(out - ref)))
    assert err < 5e-2, f"max abs diff vs reference: {err}"

    print("KERNEL_OK")
</pallas_src>

<mosaic_0001>
module attributes {stable_mosaic.version = 11 : i64} {
  func.func @_gather_row_kernel(%arg0: i32, %arg1: memref<14xi32, #tpu.memory_space<smem>>, %arg2: memref<1x1x128xf32, #tpu.memory_space<vmem>>, %arg3: memref<1x1x128xf32, #tpu.memory_space<vmem>>) attributes {dimension_semantics = [#tpu.dimension_semantics<arbitrary>], iteration_bounds = array<i64: 14>, scalar_prefetch = 1 : i64, scratch_operands = 0 : i64, tpu.core_type = #tpu.core_type<tc>, window_params = [{transform_indices = @transform_0, window_bounds = array<i64: 1, 1, 128>}, {transform_indices = @transform_1, window_bounds = array<i64: 1, 1, 128>}]} {
    %c0 = arith.constant 0 : index
    %c0_0 = arith.constant 0 : index
    %c0_1 = arith.constant 0 : index
    %0 = vector.load %arg2[%c0, %c0_0, %c0_1] : memref<1x1x128xf32, #tpu.memory_space<vmem>>, vector<1x1x128xf32>
    %c0_2 = arith.constant 0 : index
    %c0_3 = arith.constant 0 : index
    %c0_4 = arith.constant 0 : index
    %1 = vector.load %arg3[%c0_2, %c0_3, %c0_4] : memref<1x1x128xf32, #tpu.memory_space<vmem>>, vector<1x1x128xf32>
    tpu.vector_store %arg3[%c0_2, %c0_3, %c0_4], %0 {strides = array<i32>} : memref<1x1x128xf32, #tpu.memory_space<vmem>>, vector<1x1x128xf32>,
    return
  }
  func.func @transform_0(%arg0: i32, %arg1: memref<14xi32, #tpu.memory_space<smem>>) -> (i32, i32, i32) {
    %0 = arith.index_cast %arg0 : i32 to index
    %1 = memref.load %arg1[%0] : memref<14xi32, #tpu.memory_space<smem>>
    %c0_i32 = arith.constant 0 : i32
    %c0_i32_0 = arith.constant 0 : i32
    %c0_i32_1 = arith.constant 0 : i32
    return %1, %c0_i32, %c0_i32_0 : i32, i32, i32
  }
  func.func @transform_1(%arg0: i32, %arg1: memref<14xi32, #tpu.memory_space<smem>>) -> (i32, i32, i32) {
    %c0_i32 = arith.constant 0 : i32
    %c0_i32_0 = arith.constant 0 : i32
    %c0_i32_1 = arith.constant 0 : i32
    return %arg0, %c0_i32, %c0_i32_0 : i32, i32, i32
  }
}

module attributes {stable_mosaic.version = 11 : i64} {
  func.func @_matmul_bias_kernel(%arg0: i32, %arg1: i32, %arg2: i32, %arg3: memref<64x128xbf16, #tpu.memory_space<vmem>>, %arg4: memref<128x256xbf16, #tpu.memory_space<vmem>>, %arg5: memref<1x256xf32, #tpu.memory_space<vmem>>, %arg6: memref<64x256xf32, #tpu.memory_space<vmem>>) attributes {dimension_semantics = [#tpu.dimension_semantics<parallel>, #tpu.dimension_semantics<parallel>, #tpu.dimension_semantics<arbitrary>], iteration_bounds = array<i64: 1, 2, 1>, scalar_prefetch = 0 : i64, scratch_operands = 0 : i64, tpu.core_type = #tpu.core_type<tc>, window_params = [{transform_indices = @transform_0, window_bounds = array<i64: 64, 128>}, {transform_indices = @transform_1, window_bounds = array<i64: 128, 256>}, {transform_indices = @transform_2, window_bounds = array<i64: 1, 256>}, {transform_indices = @transform_3, window_bounds = array<i64: 64, 256>}]} {
    %c0_i32 = arith.constant 0 : i32
    %0 = arith.cmpi eq, %arg2, %c0_i32 : i32
    %1 = arith.extui %0 : i1 to i32
    %c0_i32_0 = arith.constant 0 : i32
    %2 = arith.cmpi ne, %1, %c0_i32_0 : i32
    scf.if %2 {
      %cst_10 = arith.constant 0.000000e+00 : f32
      %12 = vector.broadcast %cst_10 : f32 to vector<64x256xf32>
      %c0_11 = arith.constant 0 : index
      %c0_12 = arith.constant 0 : index
      %13 = vector.load %arg6[%c0_11, %c0_12] : memref<64x256xf32, #tpu.memory_space<vmem>>, vector<64x256xf32>
      tpu.vector_store %arg6[%c0_11, %c0_12], %12 {strides = array<i32>} : memref<64x256xf32, #tpu.memory_space<vmem>>, vector<64x256xf32>,
    } else {
    }
    %c0 = arith.constant 0 : index
    %c0_1 = arith.constant 0 : index
    %3 = vector.load %arg6[%c0, %c0_1] : memref<64x256xf32, #tpu.memory_space<vmem>>, vector<64x256xf32>
    %c0_2 = arith.constant 0 : index
    %c0_3 = arith.constant 0 : index
    %4 = vector.load %arg3[%c0_2, %c0_3] : memref<64x128xbf16, #tpu.memory_space<vmem>>, vector<64x128xbf16>
    %c0_4 = arith.constant 0 : index
    %c0_5 = arith.constant 0 : index
    %5 = vector.load %arg4[%c0_4, %c0_5] : memref<128x256xbf16, #tpu.memory_space<vmem>>, vector<128x256xbf16>
    %cst = arith.constant dense<0.000000e+00> : vector<64x256xf32>
    %6 = tpu.matmul %4, %5, %cst {dimension_numbers = #tpu.dot_dimension_numbers<[1], [0], [0], [1], [0, 0, 1, 1], [], []>} : vector<64x128xbf16>, vector<128x256xbf16>, vector<64x256xf32> -> vector<64x256xf32>
    %7 = arith.addf %3, %6 : vector<64x256xf32>
    %c0_6 = arith.constant 0 : index
    %c0_7 = arith.constant 0 : index
    %8 = vector.load %arg6[%c0_6, %c0_7] : memref<64x256xf32, #tpu.memory_space<vmem>>, vector<64x256xf32>
    tpu.vector_store %arg6[%c0_6, %c0_7], %7 {strides = array<i32>} : memref<64x256xf32, #tpu.memory_space<vmem>>, vector<64x256xf32>,
    %c0_i32_8 = arith.constant 0 : i32
    %9 = arith.cmpi eq, %arg2, %c0_i32_8 : i32
    %10 = arith.extui %9 : i1 to i32
    %c0_i32_9 = arith.constant 0 : i32
    %11 = arith.cmpi ne, %10, %c0_i32_9 : i32
    scf.if %11 {
      %c0_10 = arith.constant 0 : index
      %c0_11 = arith.constant 0 : index
      %12 = vector.load %arg6[%c0_10, %c0_11] : memref<64x256xf32, #tpu.memory_space<vmem>>, vector<64x256xf32>
      %c0_12 = arith.constant 0 : index
      %c0_13 = arith.constant 0 : index
      %13 = vector.load %arg5[%c0_12, %c0_13] : memref<1x256xf32, #tpu.memory_space<vmem>>, vector<1x256xf32>
      %14 = vector.broadcast %13 : vector<1x256xf32> to vector<64x256xf32>
      %15 = arith.addf %12, %14 : vector<64x256xf32>
      %c0_14 = arith.constant 0 : index
      %c0_15 = arith.constant 0 : index
      %16 = vector.load %arg6[%c0_14, %c0_15] : memref<64x256xf32, #tpu.memory_space<vmem>>, vector<64x256xf32>
      tpu.vector_store %arg6[%c0_14, %c0_15], %15 {strides = array<i32>} : memref<64x256xf32, #tpu.memory_space<vmem>>, vector<64x256xf32>,
    } else {
    }
    return
  }
  func.func @transform_0(%arg0: i32, %arg1: i32, %arg2: i32) -> (i32, i32) {
    %c0_i32 = arith.constant 0 : i32
    return %arg0, %arg2 : i32, i32
  }
  func.func @transform_1(%arg0: i32, %arg1: i32, %arg2: i32) -> (i32, i32) {
    %c0_i32 = arith.constant 0 : i32
    return %arg2, %arg1 : i32, i32
  }
  func.func @transform_2(%arg0: i32, %arg1: i32, %arg2: i32) -> (i32, i32) {
    %c0_i32 = arith.constant 0 : i32
    %c0_i32_0 = arith.constant 0 : i32
    return %c0_i32, %arg1 : i32, i32
  }
  func.func @transform_3(%arg0: i32, %arg1: i32, %arg2: i32) -> (i32, i32) {
    %c0_i32 = arith.constant 0 : i32
    return %arg0, %arg1 : i32, i32
  }
}

module attributes {stable_mosaic.version = 11 : i64} {
  func.func @_linear_logsoftmax_kernel(%arg0: i32, %arg1: i32, %arg2: memref<16x128xbf16, #tpu.memory_space<vmem>>, %arg3: memref<128x128xbf16, #tpu.memory_space<vmem>>, %arg4: memref<1x128xf32, #tpu.memory_space<vmem>>, %arg5: memref<16x128xf32, #tpu.memory_space<vmem>>) attributes {dimension_semantics = [#tpu.dimension_semantics<parallel>, #tpu.dimension_semantics<arbitrary>], iteration_bounds = array<i64: 1, 1>, scalar_prefetch = 0 : i64, scratch_operands = 0 : i64, tpu.core_type = #tpu.core_type<tc>, window_params = [{transform_indices = @transform_0, window_bounds = array<i64: 16, 128>}, {transform_indices = @transform_1, window_bounds = array<i64: 128, 128>}, {pipeline_mode = #tpu.pipeline_mode<synchronous>, transform_indices = @transform_2, window_bounds = array<i64: 1, 128>}, {transform_indices = @transform_3, window_bounds = array<i64: 16, 128>}]} {
    %c0_i32 = arith.constant 0 : i32
    %0 = arith.cmpi eq, %arg1, %c0_i32 : i32
    %1 = arith.extui %0 : i1 to i32
    %c0_i32_0 = arith.constant 0 : i32
    %2 = arith.cmpi ne, %1, %c0_i32_0 : i32
    scf.if %2 {
      %cst_10 = arith.constant 0.000000e+00 : f32
      %12 = vector.broadcast %cst_10 : f32 to vector<16x128xf32>
      %c0_11 = arith.constant 0 : index
      %c0_12 = arith.constant 0 : index
      %13 = vector.load %arg5[%c0_11, %c0_12] : memref<16x128xf32, #tpu.memory_space<vmem>>, vector<16x128xf32>
      tpu.vector_store %arg5[%c0_11, %c0_12], %12 {strides = array<i32>} : memref<16x128xf32, #tpu.memory_space<vmem>>, vector<16x128xf32>,
    } else {
    }
    %c0 = arith.constant 0 : index
    %c0_1 = arith.constant 0 : index
    %3 = vector.load %arg5[%c0, %c0_1] : memref<16x128xf32, #tpu.memory_space<vmem>>, vector<16x128xf32>
    %c0_2 = arith.constant 0 : index
    %c0_3 = arith.constant 0 : index
    %4 = vector.load %arg2[%c0_2, %c0_3] : memref<16x128xbf16, #tpu.memory_space<vmem>>, vector<16x128xbf16>
    %c0_4 = arith.constant 0 : index
    %c0_5 = arith.constant 0 : index
    %5 = vector.load %arg3[%c0_4, %c0_5] : memref<128x128xbf16, #tpu.memory_space<vmem>>, vector<128x128xbf16>
    %cst = arith.constant dense<0.000000e+00> : vector<16x128xf32>
    %6 = tpu.matmul %4, %5, %cst {dimension_numbers = #tpu.dot_dimension_numbers<[1], [0], [0], [1], [0, 0, 1, 1], [], []>} : vector<16x128xbf16>, vector<128x128xbf16>, vector<16x128xf32> -> vector<16x128xf32>
    %7 = arith.addf %3, %6 : vector<16x128xf32>
    %c0_6 = arith.constant 0 : index
    %c0_7 = arith.constant 0 : index
    %8 = vector.load %arg5[%c0_6, %c0_7] : memref<16x128xf32, #tpu.memory_space<vmem>>, vector<16x128xf32>
    tpu.vector_store %arg5[%c0_6, %c0_7], %7 {strides = array<i32>} : memref<16x128xf32, #tpu.memory_space<vmem>>, vector<16x128xf32>,
    %c0_i32_8 = arith.constant 0 : i32
    %9 = arith.cmpi eq, %arg1, %c0_i32_8 : i32
    %10 = arith.extui %9 : i1 to i32
    %c0_i32_9 = arith.constant 0 : i32
    %11 = arith.cmpi ne, %10, %c0_i32_9 : i32
    scf.if %11 {
      %c0_10 = arith.constant 0 : index
      %c0_11 = arith.constant 0 : index
      %12 = vector.load %arg5[%c0_10, %c0_11] : memref<16x128xf32, #tpu.memory_space<vmem>>, vector<16x128xf32>
      %c0_12 = arith.constant 0 : index
      %c0_13 = arith.constant 0 : index
      %13 = vector.load %arg4[%c0_12, %c0_13] : memref<1x128xf32, #tpu.memory_space<vmem>>, vector<1x128xf32>
      %14 = vector.broadcast %13 : vector<1x128xf32> to vector<16x128xf32>
      %15 = arith.addf %12, %14 : vector<16x128xf32>
      %cst_14 = arith.constant dense<0xFF800000> : vector<16xf32>
      %16 = vector.multi_reduction <maximumf>, %15, %cst_14 [1] : vector<16x128xf32> to vector<16xf32>
      %17 = vector.shape_cast %16 : vector<16xf32> to vector<16x1xf32>
      %18 = vector.broadcast %17 : vector<16x1xf32> to vector<16x128xf32>
      %19 = arith.subf %15, %18 : vector<16x128xf32>
      %20 = math.exp %19 : vector<16x128xf32>
      %cst_15 = arith.constant dense<0.000000e+00> : vector<16xf32>
      %21 = vector.multi_reduction <add>, %20, %cst_15 [1] : vector<16x128xf32> to vector<16xf32>
      %22 = vector.shape_cast %21 : vector<16xf32> to vector<16x1xf32>
      %23 = math.log %22 : vector<16x1xf32>
      %24 = vector.broadcast %23 : vector<16x1xf32> to vector<16x128xf32>
      %25 = arith.subf %19, %24 : vector<16x128xf32>
      %c0_16 = arith.constant 0 : index
      %c0_17 = arith.constant 0 : index
      %26 = vector.load %arg5[%c0_16, %c0_17] : memref<16x128xf32, #tpu.memory_space<vmem>>, vector<16x128xf32>
      tpu.vector_store %arg5[%c0_16, %c0_17], %25 {strides = array<i32>} : memref<16x128xf32, #tpu.memory_space<vmem>>, vector<16x128xf32>,
    } else {
    }
    return
  }
  func.func @transform_0(%arg0: i32, %arg1: i32) -> (i32, i32) {
    %c0_i32 = arith.constant 0 : i32
    return %arg0, %arg1 : i32, i32
  }
  func.func @transform_1(%arg0: i32, %arg1: i32) -> (i32, i32) {
    %c0_i32 = arith.constant 0 : i32
    %c0_i32_0 = arith.constant 0 : i32
    return %arg1, %c0_i32 : i32, i32
  }
  func.func @transform_2(%arg0: i32, %arg1: i32) -> (i32, i32) {
    %c0_i32 = arith.constant 0 : i32
    %c0_i32_0 = arith.constant 0 : i32
    %c0_i32_1 = arith.constant 0 : i32
    return %c0_i32, %c0_i32_0 : i32, i32
  }
  func.func @transform_3(%arg0: i32, %arg1: i32) -> (i32, i32) {
    %c0_i32 = arith.constant 0 : i32
    %c0_i32_0 = arith.constant 0 : i32
    return %arg0, %c0_i32 : i32, i32
  }
}

module attributes {stable_mosaic.version = 11 : i64} {
  func.func @_lstm_seq_kernel(%arg0: i32, %arg1: memref<8x8x512xf32, #tpu.memory_space<vmem>>, %arg2: memref<128x512xbf16, #tpu.memory_space<vmem>>, %arg3: memref<8x8x128xf32, #tpu.memory_space<vmem>>, %arg4: memref<8x128xf32, #tpu.memory_space<vmem>>, %arg5: memref<8x128xf32, #tpu.memory_space<vmem>>) attributes {dimension_semantics = [#tpu.dimension_semantics<arbitrary>], iteration_bounds = array<i64: 1>, scalar_prefetch = 0 : i64, scratch_operands = 2 : i64, tpu.core_type = #tpu.core_type<tc>, window_params = [{pipeline_mode = #tpu.pipeline_mode<synchronous>, transform_indices = @transform_0, window_bounds = array<i64: 8, 8, 512>}, {pipeline_mode = #tpu.pipeline_mode<synchronous>, transform_indices = @transform_1, window_bounds = array<i64: 128, 512>}, {pipeline_mode = #tpu.pipeline_mode<synchronous>, transform_indices = @transform_2, window_bounds = array<i64: 8, 8, 128>}]} {
    %cst = arith.constant 0.000000e+00 : f32
    %0 = vector.broadcast %cst : f32 to vector<8x128xf32>
    %c0 = arith.constant 0 : index
    %c0_0 = arith.constant 0 : index
    %1 = vector.load %arg4[%c0, %c0_0] : memref<8x128xf32, #tpu.memory_space<vmem>>, vector<8x128xf32>
    tpu.vector_store %arg4[%c0, %c0_0], %0 {strides = array<i32>} : memref<8x128xf32, #tpu.memory_space<vmem>>, vector<8x128xf32>,
    %cst_1 = arith.constant 0.000000e+00 : f32
    %2 = vector.broadcast %cst_1 : f32 to vector<8x128xf32>
    %c0_2 = arith.constant 0 : index
    %c0_3 = arith.constant 0 : index
    %3 = vector.load %arg5[%c0_2, %c0_3] : memref<8x128xf32, #tpu.memory_space<vmem>>, vector<8x128xf32>
    tpu.vector_store %arg5[%c0_2, %c0_3], %2 {strides = array<i32>} : memref<8x128xf32, #tpu.memory_space<vmem>>, vector<8x128xf32>,
    %c0_4 = arith.constant 0 : index
    %c0_5 = arith.constant 0 : index
    %c0_6 = arith.constant 0 : index
    %4 = vector.load %arg1[%c0_4, %c0_5, %c0_6] : memref<8x8x512xf32, #tpu.memory_space<vmem>>, vector<1x8x512xf32>
    %5 = vector.shape_cast %4 : vector<1x8x512xf32> to vector<8x512xf32>
    %c0_7 = arith.constant 0 : index
    %c0_8 = arith.constant 0 : index
    %6 = vector.load %arg4[%c0_7, %c0_8] : memref<8x128xf32, #tpu.memory_space<vmem>>, vector<8x128xf32>
    %7 = arith.truncf %6 : vector<8x128xf32> to vector<8x128xbf16>
    %c0_9 = arith.constant 0 : index
    %c0_10 = arith.constant 0 : index
    %8 = vector.load %arg2[%c0_9, %c0_10] : memref<128x512xbf16, #tpu.memory_space<vmem>>, vector<128x512xbf16>
    %cst_11 = arith.constant dense<0.000000e+00> : vector<8x512xf32>
    %9 = tpu.matmul %7, %8, %cst_11 {dimension_numbers = #tpu.dot_dimension_numbers<[1], [0], [0], [1], [0, 0, 1, 1], [], []>} : vector<8x128xbf16>, vector<128x512xbf16>, vector<8x512xf32> -> vector<8x512xf32>
    %10 = arith.addf %5, %9 : vector<8x512xf32>
    %11 = vector.extract_strided_slice %10 {offsets = [0, 0], sizes = [8, 128], strides = [1, 1]} : vector<8x512xf32> to vector<8x128xf32>
    %cst_12 = arith.constant 5.000000e-01 : f32
    %12 = vector.broadcast %cst_12 : f32 to vector<8x128xf32>
    %13 = arith.mulf %12, %11 : vector<8x128xf32>
    %14 = math.tanh %13 : vector<8x128xf32>
    %cst_13 = arith.constant 1.000000e+00 : f32
    %15 = vector.broadcast %cst_13 : f32 to vector<8x128xf32>
    %16 = arith.addf %14, %15 : vector<8x128xf32>
    %cst_14 = arith.constant 5.000000e-01 : f32
    %17 = vector.broadcast %cst_14 : f32 to vector<8x128xf32>
    %18 = arith.mulf %17, %16 : vector<8x128xf32>
    %19 = vector.extract_strided_slice %10 {offsets = [0, 128], sizes = [8, 128], strides = [1, 1]} : vector<8x512xf32> to vector<8x128xf32>
    %cst_15 = arith.constant 5.000000e-01 : f32
    %20 = vector.broadcast %cst_15 : f32 to vector<8x128xf32>
    %21 = arith.mulf %20, %19 : vector<8x128xf32>
    %22 = math.tanh %21 : vector<8x128xf32>
    %cst_16 = arith.constant 1.000000e+00 : f32
    %23 = vector.broadcast %cst_16 : f32 to vector<8x128xf32>
    %24 = arith.addf %22, %23 : vector<8x128xf32>
    %cst_17 = arith.constant 5.000000e-01 : f32
    %25 = vector.broadcast %cst_17 : f32 to vector<8x128xf32>
    %26 = arith.mulf %25, %24 : vector<8x128xf32>
    %27 = vector.extract_strided_slice %10 {offsets = [0, 256], sizes = [8, 128], strides = [1, 1]} : vector<8x512xf32> to vector<8x128xf32>
    %28 = math.tanh %27 : vector<8x128xf32>
    %29 = vector.extract_strided_slice %10 {offsets = [0, 384], sizes = [8, 128], strides = [1, 1]} : vector<8x512xf32> to vector<8x128xf32>
    %cst_18 = arith.constant 5.000000e-01 : f32
    %30 = vector.broadcast %cst_18 : f32 to vector<8x128xf32>
    %31 = arith.mulf %30, %29 : vector<8x128xf32>
    %32 = math.tanh %31 : vector<8x128xf32>
    %cst_19 = arith.constant 1.000000e+00 : f32
    %33 = vector.broadcast %cst_19 : f32 to vector<8x128xf32>
    %34 = arith.addf %32, %33 : vector<8x128xf32>
    %cst_20 = arith.constant 5.000000e-01 : f32
    %35 = vector.broadcast %cst_20 : f32 to vector<8x128xf32>
    %36 = arith.mulf %35, %34 : vector<8x128xf32>
    %c0_21 = arith.constant 0 : index
    %c0_22 = arith.constant 0 : index
    %37 = vector.load %arg5[%c0_21, %c0_22] : memref<8x128xf32, #tpu.memory_space<vmem>>, vector<8x128xf32>
    %38 = arith.mulf %26, %37 : vector<8x128xf32>
    %39 = arith.mulf %18, %28 : vector<8x128xf32>
    %40 = arith.addf %38, %39 : vector<8x128xf32>
    %41 = math.tanh %40 : vector<8x128xf32>
    %42 = arith.mulf %36, %41 : vector<8x128xf32>
    %c0_23 = arith.constant 0 : index
    %c0_24 = arith.constant 0 : index
    %43 = vector.load %arg5[%c0_23, %c0_24] : memref<8x128xf32, #tpu.memory_space<vmem>>, vector<8x128xf32>
    tpu.vector_store %arg5[%c0_23, %c0_24], %40 {strides = array<i32>} : memref<8x128xf32, #tpu.memory_space<vmem>>, vector<8x128xf32>,
    %c0_25 = arith.constant 0 : index
    %c0_26 = arith.constant 0 : index
    %44 = vector.load %arg4[%c0_25, %c0_26] : memref<8x128xf32, #tpu.memory_space<vmem>>, vector<8x128xf32>
    tpu.vector_store %arg4[%c0_25, %c0_26], %42 {strides = array<i32>} : memref<8x128xf32, #tpu.memory_space<vmem>>, vector<8x128xf32>,
    %c0_27 = arith.constant 0 : index
    %c0_28 = arith.constant 0 : index
    %c0_29 = arith.constant 0 : index
    %45 = vector.load %arg3[%c0_27, %c0_28, %c0_29] : memref<8x8x128xf32, #tpu.memory_space<vmem>>, vector<8x1x128xf32>
    %46 = vector.shape_cast %45 : vector<8x1x128xf32> to vector<8x128xf32>
    %47 = vector.shape_cast %42 : vector<8x128xf32> to vector<8x1x128xf32>
    tpu.vector_store %arg3[%c0_27, %c0_28, %c0_29], %47 {strides = array<i32>} : memref<8x8x128xf32, #tpu.memory_space<vmem>>, vector<8x1x128xf32>,
    %c1 = arith.constant 1 : index
    %c0_30 = arith.constant 0 : index
    %c0_31 = arith.constant 0 : index
    %48 = vector.load %arg1[%c1, %c0_30, %c0_31] : memref<8x8x512xf32, #tpu.memory_space<vmem>>, vector<1x8x512xf32>
    %49 = vector.shape_cast %48 : vector<1x8x512xf32> to vector<8x512xf32>
    %c0_32 = arith.constant 0 : index
    %c0_33 = arith.constant 0 : index
    %50 = vector.load %arg4[%c0_32, %c0_33] : memref<8x128xf32, #tpu.memory_space<vmem>>, vector<8x128xf32>
    %51 = arith.truncf %50 : vector<8x128xf32> to vector<8x128xbf16>
    %c0_34 = arith.constant 0 : index
    %c0_35 = arith.constant 0 : index
    %52 = vector.load %arg2[%c0_34, %c0_35] : memref<128x512xbf16, #tpu.memory_space<vmem>>, vector<128x512xbf16>
    %cst_36 = arith.constant dense<0.000000e+00> : vector<8x512xf32>
    %53 = tpu.matmul %51, %52, %cst_36 {dimension_numbers = #tpu.dot_dimension_numbers<[1], [0], [0], [1], [0, 0, 1, 1], [], []>} : vector<8x128xbf16>, vector<128x512xbf16>, vector<8x512xf32> -> vector<8x512xf32>
    %54 = arith.addf %49, %53 : vector<8x512xf32>
    %55 = vector.extract_strided_slice %54 {offsets = [0, 0], sizes = [8, 128], strides = [1, 1]} : vector<8x512xf32> to vector<8x128xf32>
    %cst_37 = arith.constant 5.000000e-01 : f32
    %56 = vector.broadcast %cst_37 : f32 to vector<8x128xf32>
    %57 = arith.mulf %56, %55 : vector<8x128xf32>
    %58 = math.tanh %57 : vector<8x128xf32>
    %cst_38 = arith.constant 1.000000e+00 : f32
    %59 = vector.broadcast %cst_38 : f32 to vector<8x128xf32>
    %60 = arith.addf %58, %59 : vector<8x128xf32>
    %cst_39 = arith.constant 5.000000e-01 : f32
    %61 = vector.broadcast %cst_39 : f32 to vector<8x128xf32>
    %62 = arith.mulf %61, %60 : vector<8x128xf32>
    %63 = vector.extract_strided_slice %54 {offsets = [0, 128], sizes = [8, 128], strides = [1, 1]} : vector<8x512xf32> to vector<8x128xf32>
    %cst_40 = arith.constant 5.000000e-01 : f32
    %64 = vector.broadcast %cst_40 : f32 to vector<8x128xf32>
    %65 = arith.mulf %64, %63 : vector<8x128xf32>
    %66 = math.tanh %65 : vector<8x128xf32>
    %cst_41 = arith.constant 1.000000e+00 : f32
    %67 = vector.broadcast %cst_41 : f32 to vector<8x128xf32>
    %68 = arith.addf %66, %67 : vector<8x128xf32>
    %cst_42 = arith.constant 5.000000e-01 : f32
    %69 = vector.broadcast %cst_42 : f32 to vector<8x128xf32>
    %70 = arith.mulf %69, %68 : vector<8x128xf32>
    %71 = vector.extract_strided_slice %54 {offsets = [0, 256], sizes = [8, 128], strides = [1, 1]} : vector<8x512xf32> to vector<8x128xf32>
    %72 = math.tanh %71 : vector<8x128xf32>
    %73 = vector.extract_strided_slice %54 {offsets = [0, 384], sizes = [8, 128], strides = [1, 1]} : vector<8x512xf32> to vector<8x128xf32>
    %cst_43 = arith.constant 5.000000e-01 : f32
    %74 = vector.broadcast %cst_43 : f32 to vector<8x128xf32>
    %75 = arith.mulf %74, %73 : vector<8x128xf32>
    %76 = math.tanh %75 : vector<8x128xf32>
    %cst_44 = arith.constant 1.000000e+00 : f32
    %77 = vector.broadcast %cst_44 : f32 to vector<8x128xf32>
    %78 = arith.addf %76, %77 : vector<8x128xf32>
    %cst_45 = arith.constant 5.000000e-01 : f32
    %79 = vector.broadcast %cst_45 : f32 to vector<8x128xf32>
    %80 = arith.mulf %79, %78 : vector<8x128xf32>
    %c0_46 = arith.constant 0 : index
    %c0_47 = arith.constant 0 : index
    %81 = vector.load %arg5[%c0_46, %c0_47] : memref<8x128xf32, #tpu.memory_space<vmem>>, vector<8x128xf32>
    %82 = arith.mulf %70, %81 : vector<8x128xf32>
    %83 = arith.mulf %62, %72 : vector<8x128xf32>
    %84 = arith.addf %82, %83 : vector<8x128xf32>
    %85 = math.tanh %84 : vector<8x128xf32>
    %86 = arith.mulf %80, %85 : vector<8x128xf32>
    %c0_48 = arith.constant 0 : index
    %c0_49 = arith.constant 0 : index
    %87 = vector.load %arg5[%c0_48, %c0_49] : memref<8x128xf32, #tpu.memory_space<vmem>>, vector<8x128xf32>
    tpu.vector_store %arg5[%c0_48, %c0_49], %84 {strides = array<i32>} : memref<8x128xf32, #tpu.memory_space<vmem>>, vector<8x128xf32>,
    %c0_50 = arith.constant 0 : index
    %c0_51 = arith.constant 0 : index
    %88 = vector.load %arg4[%c0_50, %c0_51] : memref<8x128xf32, #tpu.memory_space<vmem>>, vector<8x128xf32>
    tpu.vector_store %arg4[%c0_50, %c0_51], %86 {strides = array<i32>} : memref<8x128xf32, #tpu.memory_space<vmem>>, vector<8x128xf32>,
    %c0_52 = arith.constant 0 : index
    %c1_53 = arith.constant 1 : index
    %c0_54 = arith.constant 0 : index
    %89 = vector.load %arg3[%c0_52, %c1_53, %c0_54] : memref<8x8x128xf32, #tpu.memory_space<vmem>>, vector<8x1x128xf32>
    %90 = vector.shape_cast %89 : vector<8x1x128xf32> to vector<8x128xf32>
    %91 = vector.shape_cast %86 : vector<8x128xf32> to vector<8x1x128xf32>
    tpu.vector_store %arg3[%c0_52, %c1_53, %c0_54], %91 {strides = array<i32>} : memref<8x8x128xf32, #tpu.memory_space<vmem>>, vector<8x1x128xf32>,
    %c2 = arith.constant 2 : index
    %c0_55 = arith.constant 0 : index
    %c0_56 = arith.constant 0 : index
    %92 = vector.load %arg1[%c2, %c0_55, %c0_56] : memref<8x8x512xf32, #tpu.memory_space<vmem>>, vector<1x8x512xf32>
    %93 = vector.shape_cast %92 : vector<1x8x512xf32> to vector<8x512xf32>
    %c0_57 = arith.constant 0 : index
    %c0_58 = arith.constant 0 : index
    %94 = vector.load %arg4[%c0_57, %c0_58] : memref<8x128xf32, #tpu.memory_space<vmem>>, vector<8x128xf32>
    %95 = arith.truncf %94 : vector<8x128xf32> to vector<8x128xbf16>
    %c0_59 = arith.constant 0 : index
    %c0_60 = arith.constant 0 : index
    %96 = vector.load %arg2[%c0_59, %c0_60] : memref<128x512xbf16, #tpu.memory_space<vmem>>, vector<128x512xbf16>
    %cst_61 = arith.constant dense<0.000000e+00> : vector<8x512xf32>
    %97 = tpu.matmul %95, %96, %cst_61 {dimension_numbers = #tpu.dot_dimension_numbers<[1], [0], [0], [1], [0, 0, 1, 1], [], []>} : vector<8x128xbf16>, vector<128x512xbf16>, vector<8x512xf32> -> vector<8x512xf32>
    %98 = arith.addf %93, %97 : vector<8x512xf32>
    %99 = vector.extract_strided_slice %98 {offsets = [0, 0], sizes = [8, 128], strides = [1, 1]} : vector<8x512xf32> to vector<8x128xf32>
    %cst_62 = arith.constant 5.000000e-01 : f32
    %100 = vector.broadcast %cst_62 : f32 to vector<8x128xf32>
    %101 = arith.mulf %100, %99 : vector<8x128xf32>
    %102 = math.tanh %101 : vector<8x128xf32>
    %cst_63 = arith.constant 1.000000e+00 : f32
    %103 = vector.broadcast %cst_63 : f32 to vector<8x128xf32>
    %104 = arith.addf %102, %103 : vector<8x128xf32>
    %cst_64 = arith.constant 5.000000e-01 : f32
    %105 = vector.broadcast %cst_64 : f32 to vector<8x128xf32>
    %106 = arith.mulf %105, %104 : vector<8x128xf32>
    %107 = vector.extract_strided_slice %98 {offsets = [0, 128], sizes = [8, 128], strides = [1, 1]} : vector<8x512xf32> to vector<8x128xf32>
    %cst_65 = arith.constant 5.000000e-01 : f32
    %108 = vector.broadcast %cst_65 : f32 to vector<8x128xf32>
    %109 = arith.mulf %108, %107 : vector<8x128xf32>
    %110 = math.tanh %109 : vector<8x128xf32>
    %cst_66 = arith.constant 1.000000e+00 : f32
    %111 = vector.broadcast %cst_66 : f32 to vector<8x128xf32>
    %112 = arith.addf %110, %111 : vector<8x128xf32>
    %cst_67 = arith.constant 5.000000e-01 : f32
    %113 = vector.broadcast %cst_67 : f32 to vector<8x128xf32>
    %114 = arith.mulf %113, %112 : vector<8x128xf32>
    %115 = vector.extract_strided_slice %98 {offsets = [0, 256], sizes = [8, 128], strides = [1, 1]} : vector<8x512xf32> to vector<8x128xf32>
    %116 = math.tanh %115 : vector<8x128xf32>
    %117 = vector.extract_strided_slice %98 {offsets = [0, 384], sizes = [8, 128], strides = [1, 1]} : vector<8x512xf32> to vector<8x128xf32>
    %cst_68 = arith.constant 5.000000e-01 : f32
    %118 = vector.broadcast %cst_68 : f32 to vector<8x128xf32>
    %119 = arith.mulf %118, %117 : vector<8x128xf32>
    %120 = math.tanh %119 : vector<8x128xf32>
    %cst_69 = arith.constant 1.000000e+00 : f32
    %121 = vector.broadcast %cst_69 : f32 to vector<8x128xf32>
    %122 = arith.addf %120, %121 : vector<8x128xf32>
    %cst_70 = arith.constant 5.000000e-01 : f32
    %123 = vector.broadcast %cst_70 : f32 to vector<8x128xf32>
    %124 = arith.mulf %123, %122 : vector<8x128xf32>
    %c0_71 = arith.constant 0 : index
    %c0_72 = arith.constant 0 : index
    %125 = vector.load %arg5[%c0_71, %c0_72] : memref<8x128xf32, #tpu.memory_space<vmem>>, vector<8x128xf32>
    %126 = arith.mulf %114, %125 : vector<8x128xf32>
    %127 = arith.mulf %106, %116 : vector<8x128xf32>
    %128 = arith.addf %126, %127 : vector<8x128xf32>
    %129 = math.tanh %128 : vector<8x128xf32>
    %130 = arith.mulf %124, %129 : vector<8x128xf32>
    %c0_73 = arith.constant 0 : index
    %c0_74 = arith.constant 0 : index
    %131 = vector.load %arg5[%c0_73, %c0_74] : memref<8x128xf32, #tpu.memory_space<vmem>>, vector<8x128xf32>
    tpu.vector_store %arg5[%c0_73, %c0_74], %128 {strides = array<i32>} : memref<8x128xf32, #tpu.memory_space<vmem>>, vector<8x128xf32>,
    %c0_75 = arith.constant 0 : index
    %c0_76 = arith.constant 0 : index
    %132 = vector.load %arg4[%c0_75, %c0_76] : memref<8x128xf32, #tpu.memory_space<vmem>>, vector<8x128xf32>
    tpu.vector_store %arg4[%c0_75, %c0_76], %130 {strides = array<i32>} : memref<8x128xf32, #tpu.memory_space<vmem>>, vector<8x128xf32>,
    %c0_77 = arith.constant 0 : index
    %c2_78 = arith.constant 2 : index
    %c0_79 = arith.constant 0 : index
    %133 = vector.load %arg3[%c0_77, %c2_78, %c0_79] : memref<8x8x128xf32, #tpu.memory_space<vmem>>, vector<8x1x128xf32>
    %134 = vector.shape_cast %133 : vector<8x1x128xf32> to vector<8x128xf32>
    %135 = vector.shape_cast %130 : vector<8x128xf32> to vector<8x1x128xf32>
    tpu.vector_store %arg3[%c0_77, %c2_78, %c0_79], %135 {strides = array<i32>} : memref<8x8x128xf32, #tpu.memory_space<vmem>>, vector<8x1x128xf32>,
    %c3 = arith.constant 3 : index
    %c0_80 = arith.constant 0 : index
    %c0_81 = arith.constant 0 : index
    %136 = vector.load %arg1[%c3, %c0_80, %c0_81] : memref<8x8x512xf32, #tpu.memory_space<vmem>>, vector<1x8x512xf32>
    %137 = vector.shape_cast %136 : vector<1x8x512xf32> to vector<8x512xf32>
    %c0_82 = arith.constant 0 : index
    %c0_83 = arith.constant 0 : index
    %138 = vector.load %arg4[%c0_82, %c0_83] : memref<8x128xf32, #tpu.memory_space<vmem>>, vector<8x128xf32>
    %139 = arith.truncf %138 : vector<8x128xf32> to vector<8x128xbf16>
    %c0_84 = arith.constant 0 : index
    %c0_85 = arith.constant 0 : index
    %140 = vector.load %arg2[%c0_84, %c0_85] : memref<128x512xbf16, #tpu.memory_space<vmem>>, vector<128x512xbf16>
    %cst_86 = arith.constant dense<0.000000e+00> : vector<8x512xf32>
    %141 = tpu.matmul %139, %140, %cst_86 {dimension_numbers = #tpu.dot_dimension_numbers<[1], [0], [0], [1], [0, 0, 1, 1], [], []>} : vector<8x128xbf16>, vector<128x512xbf16>, vector<8x512xf32> -> vector<8x512xf32>
    %142 = arith.addf %137, %141 : vector<8x512xf32>
    %143 = vector.extract_strided_slice %142 {offsets = [0, 0], sizes = [8, 128], strides = [1, 1]} : vector<8x512xf32> to vector<8x128xf32>
    %cst_87 = arith.constant 5.000000e-01 : f32
    %144 = vector.broadcast %cst_87 : f32 to vector<8x128xf32>
    %145 = arith.mulf %144, %143 : vector<8x128xf32>
    %146 = math.tanh %145 : vector<8x128xf32>
    %cst_88 = arith.constant 1.000000e+00 : f32
    %147 = vector.broadcast %cst_88 : f32 to vector<8x128xf32>
    %148 = arith.addf %146, %147 : vector<8x128xf32>
    %cst_89 = arith.constant 5.000000e-01 : f32
    %149 = vector.broadcast %cst_89 : f32 to vector<8x128xf32>
    %150 = arith.mulf %149, %148 : vector<8x128xf32>
    %151 = vector.extract_strided_slice %142 {offsets = [0, 128], sizes = [8, 128], strides = [1, 1]} : vector<8x512xf32> to vector<8x128xf32>
    %cst_90 = arith.constant 5.000000e-01 : f32
    %152 = vector.broadcast %cst_90 : f32 to vector<8x128xf32>
    %153 = arith.mulf %152, %151 : vector<8x128xf32>
    %154 = math.tanh %153 : vector<8x128xf32>
    %cst_91 = arith.constant 1.000000e+00 : f32
    %155 = vector.broadcast %cst_91 : f32 to vector<8x128xf32>
    %156 = arith.addf %154, %155 : vector<8x128xf32>
    %cst_92 = arith.constant 5.000000e-01 : f32
    %157 = vector.broadcast %cst_92 : f32 to vector<8x128xf32>
    %158 = arith.mulf %157, %156 : vector<8x128xf32>
    %159 = vector.extract_strided_slice %142 {offsets = [0, 256], sizes = [8, 128], strides = [1, 1]} : vector<8x512xf32> to vector<8x128xf32>
    %160 = math.tanh %159 : vector<8x128xf32>
    %161 = vector.extract_strided_slice %142 {offsets = [0, 384], sizes = [8, 128], strides = [1, 1]} : vector<8x512xf32> to vector<8x128xf32>
    %cst_93 = arith.constant 5.000000e-01 : f32
    %162 = vector.broadcast %cst_93 : f32 to vector<8x128xf32>
    %163 = arith.mulf %162, %161 : vector<8x128xf32>
    %164 = math.tanh %163 : vector<8x128xf32>
    %cst_94 = arith.constant 1.000000e+00 : f32
    %165 = vector.broadcast %cst_94 : f32 to vector<8x128xf32>
    %166 = arith.addf %164, %165 : vector<8x128xf32>
    %cst_95 = arith.constant 5.000000e-01 : f32
    %167 = vector.broadcast %cst_95 : f32 to vector<8x128xf32>
    %168 = arith.mulf %167, %166 : vector<8x128xf32>
    %c0_96 = arith.constant 0 : index
    %c0_97 = arith.constant 0 : index
    %169 = vector.load %arg5[%c0_96, %c0_97] : memref<8x128xf32, #tpu.memory_space<vmem>>, vector<8x128xf32>
    %170 = arith.mulf %158, %169 : vector<8x128xf32>
    %171 = arith.mulf %150, %160 : vector<8x128xf32>
    %172 = arith.addf %170, %171 : vector<8x128xf32>
    %173 = math.tanh %172 : vector<8x128xf32>
    %174 = arith.mulf %168, %173 : vector<8x128xf32>
    %c0_98 = arith.constant 0 : index
    %c0_99 = arith.constant 0 : index
    %175 = vector.load %arg5[%c0_98, %c0_99] : memref<8x128xf32, #tpu.memory_space<vmem>>, vector<8x128xf32>
    tpu.vector_store %arg5[%c0_98, %c0_99], %172 {strides = array<i32>} : memref<8x128xf32, #tpu.memory_space<vmem>>, vector<8x128xf32>,
    %c0_100 = arith.constant 0 : index
    %c0_101 = arith.constant 0 : index
    %176 = vector.load %arg4[%c0_100, %c0_101] : memref<8x128xf32, #tpu.memory_space<vmem>>, vector<8x128xf32>
    tpu.vector_store %arg4[%c0_100, %c0_101], %174 {strides = array<i32>} : memref<8x128xf32, #tpu.memory_space<vmem>>, vector<8x128xf32>,
    %c0_102 = arith.constant 0 : index
    %c3_103 = arith.constant 3 : index
    %c0_104 = arith.constant 0 : index
    %177 = vector.load %arg3[%c0_102, %c3_103, %c0_104] : memref<8x8x128xf32, #tpu.memory_space<vmem>>, vector<8x1x128xf32>
    %178 = vector.shape_cast %177 : vector<8x1x128xf32> to vector<8x128xf32>
    %179 = vector.shape_cast %174 : vector<8x128xf32> to vector<8x1x128xf32>
    tpu.vector_store %arg3[%c0_102, %c3_103, %c0_104], %179 {strides = array<i32>} : memref<8x8x128xf32, #tpu.memory_space<vmem>>, vector<8x1x128xf32>,
    %c4 = arith.constant 4 : index
    %c0_105 = arith.constant 0 : index
    %c0_106 = arith.constant 0 : index
    %180 = vector.load %arg1[%c4, %c0_105, %c0_106] : memref<8x8x512xf32, #tpu.memory_space<vmem>>, vector<1x8x512xf32>
    %181 = vector.shape_cast %180 : vector<1x8x512xf32> to vector<8x512xf32>
    %c0_107 = arith.constant 0 : index
    %c0_108 = arith.constant 0 : index
    %182 = vector.load %arg4[%c0_107, %c0_108] : memref<8x128xf32, #tpu.memory_space<vmem>>, vector<8x128xf32>
    %183 = arith.truncf %182 : vector<8x128xf32> to vector<8x128xbf16>
    %c0_109 = arith.constant 0 : index
    %c0_110 = arith.constant 0 : index
    %184 = vector.load %arg2[%c0_109, %c0_110] : memref<128x512xbf16, #tpu.memory_space<vmem>>, vector<128x512xbf16>
    %cst_111 = arith.constant dense<0.000000e+00> : vector<8x512xf32>
    %185 = tpu.matmul %183, %184, %cst_111 {dimension_numbers = #tpu.dot_dimension_numbers<[1], [0], [0], [1], [0, 0, 1, 1], [], []>} : vector<8x128xbf16>, vector<128x512xbf16>, vector<8x512xf32> -> vector<8x512xf32>
    %186 = arith.addf %181, %185 : vector<8x512xf32>
    %187 = vector.extract_strided_slice %186 {offsets = [0, 0], sizes = [8, 128], strides = [1, 1]} : vector<8x512xf32> to vector<8x128xf32>
    %cst_112 = arith.constant 5.000000e-01 : f32
    %188 = vector.broadcast %cst_112 : f32 to vector<8x128xf32>
    %189 = arith.mulf %188, %187 : vector<8x128xf32>
    %190 = math.tanh %189 : vector<8x128xf32>
    %cst_113 = arith.constant 1.000000e+00 : f32
    %191 = vector.broadcast %cst_113 : f32 to vector<8x128xf32>
    %192 = arith.addf %190, %191 : vector<8x128xf32>
    %cst_114 = arith.constant 5.000000e-01 : f32
    %193 = vector.broadcast %cst_114 : f32 to vector<8x128xf32>
    %194 = arith.mulf %193, %192 : vector<8x128xf32>
    %195 = vector.extract_strided_slice %186 {offsets = [0, 128], sizes = [8, 128], strides = [1, 1]} : vector<8x512xf32> to vector<8x128xf32>
    %cst_115 = arith.constant 5.000000e-01 : f32
    %196 = vector.broadcast %cst_115 : f32 to vector<8x128xf32>
    %197 = arith.mulf %196, %195 : vector<8x128xf32>
    %198 = math.tanh %197 : vector<8x128xf32>
    %cst_116 = arith.constant 1.000000e+00 : f32
    %199 = vector.broadcast %cst_116 : f32 to vector<8x128xf32>
    %200 = arith.addf %198, %199 : vector<8x128xf32>
    %cst_117 = arith.constant 5.000000e-01 : f32
    %201 = vector.broadcast %cst_117 : f32 to vector<8x128xf32>
    %202 = arith.mulf %201, %200 : vector<8x128xf32>
    %203 = vector.extract_strided_slice %186 {offsets = [0, 256], sizes = [8, 128], strides = [1, 1]} : vector<8x512xf32> to vector<8x128xf32>
    %204 = math.tanh %203 : vector<8x128xf32>
    %205 = vector.extract_strided_slice %186 {offsets = [0, 384], sizes = [8, 128], strides = [1, 1]} : vector<8x512xf32> to vector<8x128xf32>
    %cst_118 = arith.constant 5.000000e-01 : f32
    %206 = vector.broadcast %cst_118 : f32 to vector<8x128xf32>
    %207 = arith.mulf %206, %205 : vector<8x128xf32>
    %208 = math.tanh %207 : vector<8x128xf32>
    %cst_119 = arith.constant 1.000000e+00 : f32
    %209 = vector.broadcast %cst_119 : f32 to vector<8x128xf32>
    %210 = arith.addf %208, %209 : vector<8x128xf32>
    %cst_120 = arith.constant 5.000000e-01 : f32
    %211 = vector.broadcast %cst_120 : f32 to vector<8x128xf32>
    %212 = arith.mulf %211, %210 : vector<8x128xf32>
    %c0_121 = arith.constant 0 : index
    %c0_122 = arith.constant 0 : index
    %213 = vector.load %arg5[%c0_121, %c0_122] : memref<8x128xf32, #tpu.memory_space<vmem>>, vector<8x128xf32>
    %214 = arith.mulf %202, %213 : vector<8x128xf32>
    %215 = arith.mulf %194, %204 : vector<8x128xf32>
    %216 = arith.addf %214, %215 : vector<8x128xf32>
    %217 = math.tanh %216 : vector<8x128xf32>
    %218 = arith.mulf %212, %217 : vector<8x128xf32>
    %c0_123 = arith.constant 0 : index
    %c0_124 = arith.constant 0 : index
    %219 = vector.load %arg5[%c0_123, %c0_124] : memref<8x128xf32, #tpu.memory_space<vmem>>, vector<8x128xf32>
    tpu.vector_store %arg5[%c0_123, %c0_124], %216 {strides = array<i32>} : memref<8x128xf32, #tpu.memory_space<vmem>>, vector<8x128xf32>,
    %c0_125 = arith.constant 0 : index
    %c0_126 = arith.constant 0 : index
    %220 = vector.load %arg4[%c0_125, %c0_126] : memref<8x128xf32, #tpu.memory_space<vmem>>, vector<8x128xf32>
    tpu.vector_store %arg4[%c0_125, %c0_126], %218 {strides = array<i32>} : memref<8x128xf32, #tpu.memory_space<vmem>>, vector<8x128xf32>,
    %c0_127 = arith.constant 0 : index
    %c4_128 = arith.constant 4 : index
    %c0_129 = arith.constant 0 : index
    %221 = vector.load %arg3[%c0_127, %c4_128, %c0_129] : memref<8x8x128xf32, #tpu.memory_space<vmem>>, vector<8x1x128xf32>
    %222 = vector.shape_cast %221 : vector<8x1x128xf32> to vector<8x128xf32>
    %223 = vector.shape_cast %218 : vector<8x128xf32> to vector<8x1x128xf32>
    tpu.vector_store %arg3[%c0_127, %c4_128, %c0_129], %223 {strides = array<i32>} : memref<8x8x128xf32, #tpu.memory_space<vmem>>, vector<8x1x128xf32>,
    %c5 = arith.constant 5 : index
    %c0_130 = arith.constant 0 : index
    %c0_131 = arith.constant 0 : index
    %224 = vector.load %arg1[%c5, %c0_130, %c0_131] : memref<8x8x512xf32, #tpu.memory_space<vmem>>, vector<1x8x512xf32>
    %225 = vector.shape_cast %224 : vector<1x8x512xf32> to vector<8x512xf32>
    %c0_132 = arith.constant 0 : index
    %c0_133 = arith.constant 0 : index
    %226 = vector.load %arg4[%c0_132, %c0_133] : memref<8x128xf32, #tpu.memory_space<vmem>>, vector<8x128xf32>
    %227 = arith.truncf %226 : vector<8x128xf32> to vector<8x128xbf16>
    %c0_134 = arith.constant 0 : index
    %c0_135 = arith.constant 0 : index
    %228 = vector.load %arg2[%c0_134, %c0_135] : memref<128x512xbf16, #tpu.memory_space<vmem>>, vector<128x512xbf16>
    %cst_136 = arith.constant dense<0.000000e+00> : vector<8x512xf32>
    %229 = tpu.matmul %227, %228, %cst_136 {dimension_numbers = #tpu.dot_dimension_numbers<[1], [0], [0], [1], [0, 0, 1, 1], [], []>} : vector<8x128xbf16>, vector<128x512xbf16>, vector<8x512xf32> -> vector<8x512xf32>
    %230 = arith.addf %225, %229 : vector<8x512xf32>
    %231 = vector.extract_strided_slice %230 {offsets = [0, 0], sizes = [8, 128], strides = [1, 1]} : vector<8x512xf32> to vector<8x128xf32>
    %cst_137 = arith.constant 5.000000e-01 : f32
    %232 = vector.broadcast %cst_137 : f32 to vector<8x128xf32>
    %233 = arith.mulf %232, %231 : vector<8x128xf32>
    %234 = math.tanh %233 : vector<8x128xf32>
    %cst_138 = arith.constant 1.000000e+00 : f32
    %235 = vector.broadcast %cst_138 : f32 to vector<8x128xf32>
    %236 = arith.addf %234, %235 : vector<8x128xf32>
    %cst_139 = arith.constant 5.000000e-01 : f32
    %237 = vector.broadcast %cst_139 : f32 to vector<8x128xf32>
    %238 = arith.mulf %237, %236 : vector<8x128xf32>
    %239 = vector.extract_strided_slice %230 {offsets = [0, 128], sizes = [8, 128], strides = [1, 1]} : vector<8x512xf32> to vector<8x128xf32>
    %cst_140 = arith.constant 5.000000e-01 : f32
    %240 = vector.broadcast %cst_140 : f32 to vector<8x128xf32>
    %241 = arith.mulf %240, %239 : vector<8x128xf32>
    %242 = math.tanh %241 : vector<8x128xf32>
    %cst_141 = arith.constant 1.000000e+00 : f32
    %243 = vector.broadcast %cst_141 : f32 to vector<8x128xf32>
    %244 = arith.addf %242, %243 : vector<8x128xf32>
    %cst_142 = arith.constant 5.000000e-01 : f32
    %245 = vector.broadcast %cst_142 : f32 to vector<8x128xf32>
    %246 = arith.mulf %245, %244 : vector<8x128xf32>
    %247 = vector.extract_strided_slice %230 {offsets = [0, 256], sizes = [8, 128], strides = [1, 1]} : vector<8x512xf32> to vector<8x128xf32>
    %248 = math.tanh %247 : vector<8x128xf32>
    %249 = vector.extract_strided_slice %230 {offsets = [0, 384], sizes = [8, 128], strides = [1, 1]} : vector<8x512xf32> to vector<8x128xf32>
    %cst_143 = arith.constant 5.000000e-01 : f32
    %250 = vector.broadcast %cst_143 : f32 to vector<8x128xf32>
    %251 = arith.mulf %250, %249 : vector<8x128xf32>
    %252 = math.tanh %251 : vector<8x128xf32>
    %cst_144 = arith.constant 1.000000e+00 : f32
    %253 = vector.broadcast %cst_144 : f32 to vector<8x128xf32>
    %254 = arith.addf %252, %253 : vector<8x128xf32>
    %cst_145 = arith.constant 5.000000e-01 : f32
    %255 = vector.broadcast %cst_145 : f32 to vector<8x128xf32>
    %256 = arith.mulf %255, %254 : vector<8x128xf32>
    %c0_146 = arith.constant 0 : index
    %c0_147 = arith.constant 0 : index
    %257 = vector.load %arg5[%c0_146, %c0_147] : memref<8x128xf32, #tpu.memory_space<vmem>>, vector<8x128xf32>
    %258 = arith.mulf %246, %257 : vector<8x128xf32>
    %259 = arith.mulf %238, %248 : vector<8x128xf32>
    %260 = arith.addf %258, %259 : vector<8x128xf32>
    %261 = math.tanh %260 : vector<8x128xf32>
    %262 = arith.mulf %256, %261 : vector<8x128xf32>
    %c0_148 = arith.constant 0 : index
    %c0_149 = arith.constant 0 : index
    %263 = vector.load %arg5[%c0_148, %c0_149] : memref<8x128xf32, #tpu.memory_space<vmem>>, vector<8x128xf32>
    tpu.vector_store %arg5[%c0_148, %c0_149], %260 {strides = array<i32>} : memref<8x128xf32, #tpu.memory_space<vmem>>, vector<8x128xf32>,
    %c0_150 = arith.constant 0 : index
    %c0_151 = arith.constant 0 : index
    %264 = vector.load %arg4[%c0_150, %c0_151] : memref<8x128xf32, #tpu.memory_space<vmem>>, vector<8x128xf32>
    tpu.vector_store %arg4[%c0_150, %c0_151], %262 {strides = array<i32>} : memref<8x128xf32, #tpu.memory_space<vmem>>, vector<8x128xf32>,
    %c0_152 = arith.constant 0 : index
    %c5_153 = arith.constant 5 : index
    %c0_154 = arith.constant 0 : index
    %265 = vector.load %arg3[%c0_152, %c5_153, %c0_154] : memref<8x8x128xf32, #tpu.memory_space<vmem>>, vector<8x1x128xf32>
    %266 = vector.shape_cast %265 : vector<8x1x128xf32> to vector<8x128xf32>
    %267 = vector.shape_cast %262 : vector<8x128xf32> to vector<8x1x128xf32>
    tpu.vector_store %arg3[%c0_152, %c5_153, %c0_154], %267 {strides = array<i32>} : memref<8x8x128xf32, #tpu.memory_space<vmem>>, vector<8x1x128xf32>,
    %c6 = arith.constant 6 : index
    %c0_155 = arith.constant 0 : index
    %c0_156 = arith.constant 0 : index
    %268 = vector.load %arg1[%c6, %c0_155, %c0_156] : memref<8x8x512xf32, #tpu.memory_space<vmem>>, vector<1x8x512xf32>
    %269 = vector.shape_cast %268 : vector<1x8x512xf32> to vector<8x512xf32>
    %c0_157 = arith.constant 0 : index
    %c0_158 = arith.constant 0 : index
    %270 = vector.load %arg4[%c0_157, %c0_158] : memref<8x128xf32, #tpu.memory_space<vmem>>, vector<8x128xf32>
    %271 = arith.truncf %270 : vector<8x128xf32> to vector<8x128xbf16>
    %c0_159 = arith.constant 0 : index
    %c0_160 = arith.constant 0 : index
    %272 = vector.load %arg2[%c0_159, %c0_160] : memref<128x512xbf16, #tpu.memory_space<vmem>>, vector<128x512xbf16>
    %cst_161 = arith.constant dense<0.000000e+00> : vector<8x512xf32>
    %273 = tpu.matmul %271, %272, %cst_161 {dimension_numbers = #tpu.dot_dimension_numbers<[1], [0], [0], [1], [0, 0, 1, 1], [], []>} : vector<8x128xbf16>, vector<128x512xbf16>, vector<8x512xf32> -> vector<8x512xf32>
    %274 = arith.addf %269, %273 : vector<8x512xf32>
    %275 = vector.extract_strided_slice %274 {offsets = [0, 0], sizes = [8, 128], strides = [1, 1]} : vector<8x512xf32> to vector<8x128xf32>
    %cst_162 = arith.constant 5.000000e-01 : f32
    %276 = vector.broadcast %cst_162 : f32 to vector<8x128xf32>
    %277 = arith.mulf %276, %275 : vector<8x128xf32>
    %278 = math.tanh %277 : vector<8x128xf32>
    %cst_163 = arith.constant 1.000000e+00 : f32
    %279 = vector.broadcast %cst_163 : f32 to vector<8x128xf32>
    %280 = arith.addf %278, %279 : vector<8x128xf32>
    %cst_164 = arith.constant 5.000000e-01 : f32
    %281 = vector.broadcast %cst_164 : f32 to vector<8x128xf32>
    %282 = arith.mulf %281, %280 : vector<8x128xf32>
    %283 = vector.extract_strided_slice %274 {offsets = [0, 128], sizes = [8, 128], strides = [1, 1]} : vector<8x512xf32> to vector<8x128xf32>
    %cst_165 = arith.constant 5.000000e-01 : f32
    %284 = vector.broadcast %cst_165 : f32 to vector<8x128xf32>
    %285 = arith.mulf %284, %283 : vector<8x128xf32>
    %286 = math.tanh %285 : vector<8x128xf32>
    %cst_166 = arith.constant 1.000000e+00 : f32
    %287 = vector.broadcast %cst_166 : f32 to vector<8x128xf32>
    %288 = arith.addf %286, %287 : vector<8x128xf32>
    %cst_167 = arith.constant 5.000000e-01 : f32
    %289 = vector.broadcast %cst_167 : f32 to vector<8x128xf32>
    %290 = arith.mulf %289, %288 : vector<8x128xf32>
    %291 = vector.extract_strided_slice %274 {offsets = [0, 256], sizes = [8, 128], strides = [1, 1]} : vector<8x512xf32> to vector<8x128xf32>
    %292 = math.tanh %291 : vector<8x128xf32>
    %293 = vector.extract_strided_slice %274 {offsets = [0, 384], sizes = [8, 128], strides = [1, 1]} : vector<8x512xf32> to vector<8x128xf32>
    %cst_168 = arith.constant 5.000000e-01 : f32
    %294 = vector.broadcast %cst_168 : f32 to vector<8x128xf32>
    %295 = arith.mulf %294, %293 : vector<8x128xf32>
    %296 = math.tanh %295 : vector<8x128xf32>
    %cst_169 = arith.constant 1.000000e+00 : f32
    %297 = vector.broadcast %cst_169 : f32 to vector<8x128xf32>
    %298 = arith.addf %296, %297 : vector<8x128xf32>
    %cst_170 = arith.constant 5.000000e-01 : f32
    %299 = vector.broadcast %cst_170 : f32 to vector<8x128xf32>
    %300 = arith.mulf %299, %298 : vector<8x128xf32>
    %c0_171 = arith.constant 0 : index
    %c0_172 = arith.constant 0 : index
    %301 = vector.load %arg5[%c0_171, %c0_172] : memref<8x128xf32, #tpu.memory_space<vmem>>, vector<8x128xf32>
    %302 = arith.mulf %290, %301 : vector<8x128xf32>
    %303 = arith.mulf %282, %292 : vector<8x128xf32>
    %304 = arith.addf %302, %303 : vector<8x128xf32>
    %305 = math.tanh %304 : vector<8x128xf32>
    %306 = arith.mulf %300, %305 : vector<8x128xf32>
    %c0_173 = arith.constant 0 : index
    %c0_174 = arith.constant 0 : index
    %307 = vector.load %arg5[%c0_173, %c0_174] : memref<8x128xf32, #tpu.memory_space<vmem>>, vector<8x128xf32>
    tpu.vector_store %arg5[%c0_173, %c0_174], %304 {strides = array<i32>} : memref<8x128xf32, #tpu.memory_space<vmem>>, vector<8x128xf32>,
    %c0_175 = arith.constant 0 : index
    %c0_176 = arith.constant 0 : index
    %308 = vector.load %arg4[%c0_175, %c0_176] : memref<8x128xf32, #tpu.memory_space<vmem>>, vector<8x128xf32>
    tpu.vector_store %arg4[%c0_175, %c0_176], %306 {strides = array<i32>} : memref<8x128xf32, #tpu.memory_space<vmem>>, vector<8x128xf32>,
    %c0_177 = arith.constant 0 : index
    %c6_178 = arith.constant 6 : index
    %c0_179 = arith.constant 0 : index
    %309 = vector.load %arg3[%c0_177, %c6_178, %c0_179] : memref<8x8x128xf32, #tpu.memory_space<vmem>>, vector<8x1x128xf32>
    %310 = vector.shape_cast %309 : vector<8x1x128xf32> to vector<8x128xf32>
    %311 = vector.shape_cast %306 : vector<8x128xf32> to vector<8x1x128xf32>
    tpu.vector_store %arg3[%c0_177, %c6_178, %c0_179], %311 {strides = array<i32>} : memref<8x8x128xf32, #tpu.memory_space<vmem>>, vector<8x1x128xf32>,
    %c7 = arith.constant 7 : index
    %c0_180 = arith.constant 0 : index
    %c0_181 = arith.constant 0 : index
    %312 = vector.load %arg1[%c7, %c0_180, %c0_181] : memref<8x8x512xf32, #tpu.memory_space<vmem>>, vector<1x8x512xf32>
    %313 = vector.shape_cast %312 : vector<1x8x512xf32> to vector<8x512xf32>
    %c0_182 = arith.constant 0 : index
    %c0_183 = arith.constant 0 : index
    %314 = vector.load %arg4[%c0_182, %c0_183] : memref<8x128xf32, #tpu.memory_space<vmem>>, vector<8x128xf32>
    %315 = arith.truncf %314 : vector<8x128xf32> to vector<8x128xbf16>
    %c0_184 = arith.constant 0 : index
    %c0_185 = arith.constant 0 : index
    %316 = vector.load %arg2[%c0_184, %c0_185] : memref<128x512xbf16, #tpu.memory_space<vmem>>, vector<128x512xbf16>
    %cst_186 = arith.constant dense<0.000000e+00> : vector<8x512xf32>
    %317 = tpu.matmul %315, %316, %cst_186 {dimension_numbers = #tpu.dot_dimension_numbers<[1], [0], [0], [1], [0, 0, 1, 1], [], []>} : vector<8x128xbf16>, vector<128x512xbf16>, vector<8x512xf32> -> vector<8x512xf32>
    %318 = arith.addf %313, %317 : vector<8x512xf32>
    %319 = vector.extract_strided_slice %318 {offsets = [0, 0], sizes = [8, 128], strides = [1, 1]} : vector<8x512xf32> to vector<8x128xf32>
    %cst_187 = arith.constant 5.000000e-01 : f32
    %320 = vector.broadcast %cst_187 : f32 to vector<8x128xf32>
    %321 = arith.mulf %320, %319 : vector<8x128xf32>
    %322 = math.tanh %321 : vector<8x128xf32>
    %cst_188 = arith.constant 1.000000e+00 : f32
    %323 = vector.broadcast %cst_188 : f32 to vector<8x128xf32>
    %324 = arith.addf %322, %323 : vector<8x128xf32>
    %cst_189 = arith.constant 5.000000e-01 : f32
    %325 = vector.broadcast %cst_189 : f32 to vector<8x128xf32>
    %326 = arith.mulf %325, %324 : vector<8x128xf32>
    %327 = vector.extract_strided_slice %318 {offsets = [0, 128], sizes = [8, 128], strides = [1, 1]} : vector<8x512xf32> to vector<8x128xf32>
    %cst_190 = arith.constant 5.000000e-01 : f32
    %328 = vector.broadcast %cst_190 : f32 to vector<8x128xf32>
    %329 = arith.mulf %328, %327 : vector<8x128xf32>
    %330 = math.tanh %329 : vector<8x128xf32>
    %cst_191 = arith.constant 1.000000e+00 : f32
    %331 = vector.broadcast %cst_191 : f32 to vector<8x128xf32>
    %332 = arith.addf %330, %331 : vector<8x128xf32>
    %cst_192 = arith.constant 5.000000e-01 : f32
    %333 = vector.broadcast %cst_192 : f32 to vector<8x128xf32>
    %334 = arith.mulf %333, %332 : vector<8x128xf32>
    %335 = vector.extract_strided_slice %318 {offsets = [0, 256], sizes = [8, 128], strides = [1, 1]} : vector<8x512xf32> to vector<8x128xf32>
    %336 = math.tanh %335 : vector<8x128xf32>
    %337 = vector.extract_strided_slice %318 {offsets = [0, 384], sizes = [8, 128], strides = [1, 1]} : vector<8x512xf32> to vector<8x128xf32>
    %cst_193 = arith.constant 5.000000e-01 : f32
    %338 = vector.broadcast %cst_193 : f32 to vector<8x128xf32>
    %339 = arith.mulf %338, %337 : vector<8x128xf32>
    %340 = math.tanh %339 : vector<8x128xf32>
    %cst_194 = arith.constant 1.000000e+00 : f32
    %341 = vector.broadcast %cst_194 : f32 to vector<8x128xf32>
    %342 = arith.addf %340, %341 : vector<8x128xf32>
    %cst_195 = arith.constant 5.000000e-01 : f32
    %343 = vector.broadcast %cst_195 : f32 to vector<8x128xf32>
    %344 = arith.mulf %343, %342 : vector<8x128xf32>
    %c0_196 = arith.constant 0 : index
    %c0_197 = arith.constant 0 : index
    %345 = vector.load %arg5[%c0_196, %c0_197] : memref<8x128xf32, #tpu.memory_space<vmem>>, vector<8x128xf32>
    %346 = arith.mulf %334, %345 : vector<8x128xf32>
    %347 = arith.mulf %326, %336 : vector<8x128xf32>
    %348 = arith.addf %346, %347 : vector<8x128xf32>
    %349 = math.tanh %348 : vector<8x128xf32>
    %350 = arith.mulf %344, %349 : vector<8x128xf32>
    %c0_198 = arith.constant 0 : index
    %c0_199 = arith.constant 0 : index
    %351 = vector.load %arg5[%c0_198, %c0_199] : memref<8x128xf32, #tpu.memory_space<vmem>>, vector<8x128xf32>
    tpu.vector_store %arg5[%c0_198, %c0_199], %348 {strides = array<i32>} : memref<8x128xf32, #tpu.memory_space<vmem>>, vector<8x128xf32>,
    %c0_200 = arith.constant 0 : index
    %c0_201 = arith.constant 0 : index
    %352 = vector.load %arg4[%c0_200, %c0_201] : memref<8x128xf32, #tpu.memory_space<vmem>>, vector<8x128xf32>
    tpu.vector_store %arg4[%c0_200, %c0_201], %350 {strides = array<i32>} : memref<8x128xf32, #tpu.memory_space<vmem>>, vector<8x128xf32>,
    %c0_202 = arith.constant 0 : index
    %c7_203 = arith.constant 7 : index
    %c0_204 = arith.constant 0 : index
    %353 = vector.load %arg3[%c0_202, %c7_203, %c0_204] : memref<8x8x128xf32, #tpu.memory_space<vmem>>, vector<8x1x128xf32>
    %354 = vector.shape_cast %353 : vector<8x1x128xf32> to vector<8x128xf32>
    %355 = vector.shape_cast %350 : vector<8x128xf32> to vector<8x1x128xf32>
    tpu.vector_store %arg3[%c0_202, %c7_203, %c0_204], %355 {strides = array<i32>} : memref<8x8x128xf32, #tpu.memory_space<vmem>>, vector<8x1x128xf32>,
    return
  }
  func.func @transform_0(%arg0: i32) -> (i32, i32, i32) {
    %c0_i32 = arith.constant 0 : i32
    %c0_i32_0 = arith.constant 0 : i32
    %c0_i32_1 = arith.constant 0 : i32
    %c0_i32_2 = arith.constant 0 : i32
    return %c0_i32, %c0_i32_0, %c0_i32_1 : i32, i32, i32
  }
  func.func @transform_1(%arg0: i32) -> (i32, i32) {
    %c0_i32 = arith.constant 0 : i32
    %c0_i32_0 = arith.constant 0 : i32
    %c0_i32_1 = arith.constant 0 : i32
    return %c0_i32, %c0_i32_0 : i32, i32
  }
  func.func @transform_2(%arg0: i32) -> (i32, i32, i32) {
    %c0_i32 = arith.constant 0 : i32
    %c0_i32_0 = arith.constant 0 : i32
    %c0_i32_1 = arith.constant 0 : i32
    %c0_i32_2 = arith.constant 0 : i32
    return %c0_i32, %c0_i32_0, %c0_i32_1 : i32, i32, i32
  }
}

</mosaic_0001>

<bundles_post_ra>
// kernel: decoder_rnn_forward.4
= control target key start
LH: loop header
LB: loop body
LE: loop exit
PB: predicated region body
PF: predicated region fallthrough
CT: control target
= control target key end

     0   :  { %s230_s0 = inlined_call_operand.vmem [shape: s32[14], index: 0, kind: input, shape index: {}]   ;;  %s231_s1 = inlined_call_operand.vmem [shape: f32[50,1,128], index: 1, kind: input, shape index: {}]   ;;  %s232_s2 = inlined_call_operand.vmem [shape: f32[14,1,128], index: 2, kind: output, shape index: {}]  }
   0x1   :  { %s7_s11 = sshll.u32 %s230_s0, 4  ;;  %s8_s11 = int_to_ptr.vmem [resolvable:$true] %s7_s11 }
   0x2   :  { %s183_s12 = scalar_lea.vmem %s8_s11, 16  ;;  %p188_p1 = scmp.lt.s32.totalorder %s8_s11, %s8_s11 }
   0x3   :  { %p184_p0 = scmp.ne.s32.totalorder %s8_s11, %s183_s12  ;;  %p189_p2 = scmp.lt.s32.totalorder %s183_s12, %s183_s12 }
   0x5   :  { %p190_p3 = por %p189_p2, %p188_p1 }
   0x7   :  { %p191_p4 = pnand %p190_p3, %p184_p0 }
   0x9   :  { %194 = shalt.err (!%p191_p4)  }
   0xa   :  { %s205_s13 = smov [#allocation3]  }
   0xb   :  { %10 = dma.vmem_to_smem %s8_s11, 16, %s205_s13, [#allocation2] }
   0xc   :  { %199 = dma.done.wait [#allocation2], 16 }
   0xd   :  { %200 = vsyncadd [#allocation2], 4294967280 }
   0xe   :  { %12 = sfence }
   0xf   :  { %s201_s14 = smov 0  }
  0x10 LB: > { %s167_s15 = sadd.s32 4294967295, %s203_s14   ;;  %p171_p5 = scmp.ge.s32.totalorder %s203_s14, 1  ;;  %s203_s14 = sphi %s201_s14, %s18_s14  }
  0x11   : > { %p96_p6 = scmp.lt.s32.totalorder %s203_s14, 15 }
  0x13   : > { %p97_p7 = pnand %p171_p5, %p96_p6 }
  0x14   : > { %s113_s0 = sld [smem:[#allocation3 + %s167_s15]] (!%p97_p7)  ;;  %p118_p8 = scmp.lt.s32.totalorder (!%p97_p7), %s167_s15, 13 }
  0x15   : > { %100 = sbr.rel (%p97_p7) target bundleno = 32 (0x20), region = 24 }
  0x1a   : > { %p114_p9 = scmp.lt.s32.totalorder (!%p97_p7), %s113_s0, 49 }
  0x1c   : > { %s234_s15 = smov (!%p118_p8, %s167_s15), 13  ;;  %s236_s0 = smov (!%p114_p9, %s113_s0), 49 }
  0x1d   : > { %s120_s18 = scalar_lea.vmem %s232_s2, %s234_s15  ;;  %s116_s21 = scalar_lea.vmem %s231_s1, %s236_s0 }
  0x1e   : > { %v121_v0 = vld [vmem:[%s116_s21] sm:$0x1] }
  0x1f   : > { %122 = vst [vmem:[%s120_s18] sm:$0x1] %v121_v0 }
  0x20 PF: > { %s18_s14 = sadd.s32 1, %s203_s14  }
  0x21   : > { %p15_p10 = scmp.ge.s32.totalorder %s18_s14, 16  }
  0x23   :  { %17 = sbr.rel (!%p15_p10) target bundleno = 16 (0x10), region = 54 }

// kernel: decoder_rnn_forward.7
= control target key start
LH: loop header
LB: loop body
LE: loop exit
PB: predicated region body
PF: predicated region fallthrough
CT: control target
= control target key end

     0   :  { %v238_v0 = vmov 0.0   ;;  %vm239_vm0 = vmmov 0   ;;  %s296_s1 = inlined_call_operand.vmem [shape: bf16[128,128], index: 1, kind: input, shape index: {}]   ;;  %s297_s0 = inlined_call_operand.vmem [shape: bf16[16,128], index: 0, kind: input, shape index: {}]   ;;  %s298_s2 = inlined_call_operand.vmem [shape: f32[1,128], index: 2, kind: input, shape index: {}]   ;;  %s299_s3 = inlined_call_operand.vmem [shape: f32[16,128], index: 3, kind: output, shape index: {}]  }
   0x1   :  { %199 = vmatprep.subr.bf16.mxu0 %v238_v0  ;;  %v221_v1 = vld [vmem:[%s296_s1] sm:$0xff]   ;;  %215 = vmatprep.mubr.msk.bf16.mxu0 %vm239_vm0, %v238_v0  ;;  %v222_v2 = vld [vmem:[%s296_s1 + $0x8] sm:$0xff]   ;;  %v223_v3 = vld [vmem:[%s296_s1 + $0x10] sm:$0xff]  }
   0x2   :  { %200 = vmatpush3.bf16.msra.mxu0 %v221_v1  ;;  %v224_v4 = vld [vmem:[%s296_s1 + $0x18] sm:$0xff]   ;;  %v225_v5 = vld [vmem:[%s296_s1 + $0x20] sm:$0xff]   ;;  %v226_v6 = vld [vmem:[%s296_s1 + $0x28] sm:$0xff]  }
   0x3   :  { %201 = vmatprep.subr.bf16.mxu0 %v238_v0  ;;  %v227_v7 = vld [vmem:[%s296_s1 + $0x30] sm:$0xff]   ;;  %v228_v8 = vld [vmem:[%s296_s1 + $0x38] sm:$0xff]   ;;  %v229_v9 = vld [vmem:[%s297_s0] sm:$0xff]  }
   0x4   :  { %v189_v11 = vld [vmem:[%s298_s2] ss:$0 sm:$0xff] }
   0x6   :  { %202 = vmatpush3.bf16.msra.mxu0 %v222_v2 }
   0x7   :  { %203 = vmatprep.subr.bf16.mxu0 %v238_v0 }
   0xa   :  { %204 = vmatpush3.bf16.msra.mxu0 %v223_v3 }
   0xb   :  { %205 = vmatprep.subr.bf16.mxu0 %v238_v0 }
   0xe   :  { %206 = vmatpush3.bf16.msra.mxu0 %v224_v4 }
   0xf   :  { %207 = vmatprep.subr.bf16.mxu0 %v238_v0 }
  0x12   :  { %208 = vmatpush3.bf16.msra.mxu0 %v225_v5 }
  0x13   :  { %209 = vmatprep.subr.bf16.mxu0 %v238_v0 }
  0x16   :  { %210 = vmatpush3.bf16.msra.mxu0 %v226_v6 }
  0x17   :  { %211 = vmatprep.subr.bf16.mxu0 %v238_v0 }
  0x1a   :  { %212 = vmatpush3.bf16.msra.mxu0 %v227_v7 }
  0x1b   :  { %213 = vmatprep.subr.bf16.mxu0 %v238_v0 }
  0x1e   :  { %214 = vmatpush3.bf16.msra.mxu0 %v228_v8 }
  0x21   :  { %216 = vmatmul.mubr.bf16.vlgmr.msra.gmra.mrb[0].mxu0 %v229_v9 }
  0xf4   :  { %v129_v10 = vpop.f32.mrb[0].mxu0 }
  0xf5   :  { %v217_v12 = vpop.f32.mrb[1].mxu0  ;;  %v152_v15 = vadd.f32 %v189_v11, %v129_v10 }
  0xf6   :  { %v132_v13 = vpop.f32.mrb[2].mxu0 }
  0xf7   :  { %v218_v14 = vpop.f32.mrb[3].mxu0  ;;  %154 = vmax.xlane.f32.xlu0 %v152_v15  ;;  %v153_v16 = vadd.f32 %v189_v11, %v132_v13 }
  0xfb   :  { %156 = vmax.xlane.f32.xlu0 %v153_v16 }
 0x184   :  { %v155_v17 = vpop.xlane.xlu0 %154 }
 0x185   :  { %v158_v18 = vsub.f32 %v152_v15, %v155_v17 }
 0x187   :  { %v160_v19 = vmul.f32 1.442695, %v158_v18 }
 0x188   :  { %v157_v20 = vpop.xlane.xlu0 %156 }
 0x189   :  { %v159_v21 = vsub.f32 %v153_v16, %v157_v20  ;;  %230 = vpow2.f32 %v160_v19 }
 0x18b   :  { %v162_v22 = vmul.f32 1.442695, %v159_v21 }
 0x18d   :  { %232 = vpow2.f32 %v162_v22 }
 0x193   :  { %v231_v23 = vpop.eup %230 }
 0x194   :  { %164 = vadd.xlane.f32.xlu1 %v231_v23 }
 0x197   :  { %v233_v24 = vpop.eup %232 }
 0x198   :  { %166 = vadd.xlane.f32.xlu1 %v233_v24 }
 0x221   :  { %v165_v25 = vpop.xlane.xlu1 %164 }
 0x222   :  { %234 = vlog2.f32 %v165_v25 }
 0x225   :  { %v167_v26 = vpop.xlane.xlu1 %166 }
 0x226   :  { %236 = vlog2.f32 %v167_v26 }
 0x22c   :  { %v235_v27 = vpop.eup %234 }
 0x22d   :  { %v169_v28 = vmul.f32 0.6931472, %v235_v27 }
 0x22f   :  { %v172_v29 = vsub.f32 %v158_v18, %v169_v28 }
 0x230   :  { %v237_v30 = vpop.eup %236 }
 0x231   :  { %174 = vst [vmem:[%s299_s3] sm:$0xff] %v172_v29  ;;  %v171_v31 = vmul.f32 0.6931472, %v237_v30 }
 0x233   :  { %v173_v32 = vsub.f32 %v159_v21, %v171_v31 }
 0x235   :  { %175 = vst [vmem:[%s299_s3 + $0x8] sm:$0xff] %v173_v32 }

// kernel: decoder_rnn_forward.5
= control target key start
LH: loop header
LB: loop body
LE: loop exit
PB: predicated region body
PF: predicated region fallthrough
CT: control target
= control target key end

     0   :  { %s1022_s12 = smov 0   ;;  %s1024_s13 = smov 0   ;;  %s1184_s0 = inlined_call_operand.vmem [shape: bf16[64,128], index: 0, kind: input, shape index: {}]   ;;  %s1185_s1 = inlined_call_operand.vmem [shape: bf16[128,512], index: 1, kind: input, shape index: {}]   ;;  %s1186_s2 = inlined_call_operand.vmem [shape: f32[1,512], index: 2, kind: input, shape index: {}]   ;;  %s1187_s3 = inlined_call_operand.vmem [shape: f32[64,512], index: 3, kind: output, shape index: {}]  }
   0x1   :  { %s1026_s14 = smov 0   ;;  %s1028_s15 = smov 0  }
   0x2   :  { %s1030_s16 = smov 0  }
   0x3 LB: > { %s28_s17 = sadd.s32 1, %s995_s15  ;;  %s836_s18 = sadd.s32 4294967295, %s999_s16   ;;  %s999_s16 = sphi %s1030_s16, %s13_s16   ;;  %s995_s15 = sphi %s1028_s15, %s1192_s15   ;;  %s991_s14 = sphi %s1026_s14, %s1191_s14   ;;  %s987_s13 = sphi %s1024_s13, %s1190_s13   ;;  %s983_s12 = sphi %s1022_s12, %s1189_s12  }
   0x4   : > { %p30_p0 = scmp.ge.s32.totalorder %s28_s17, 2  ;;  %p76_p1 = scmp.ne.s32.totalorder %s987_s13, %s983_s12 }
   0x5   : > { %p77_p2 = scmp.eq.s32.totalorder %s999_s16, 0  ;;  %p134_p4 = scmp.eq.s32.totalorder %s836_s18, 1 }
   0x6   : > { %s1194_s17 = smov (%p30_p0, %s28_s17), 0  ;;  %s69_s20 = sadd.s32 1, %s987_s13 }
   0x7   : > { %p78_p3 = por %p77_p2, %p76_p1  ;;  %s65_s19 = ssub.s32 %s995_s15, %s1194_s17 }
   0x8   : > { %p67_p5 = scmp.eq.s32.totalorder %s65_s19, 0  ;;  %p1057_p6 = por %p134_p4, %p76_p1 }
   0x9   : > { %p840_p7 = scmp.ge.s32.totalorder %s999_s16, 2 }
   0xa   : > { %s1062_s22 = scalar_select %p67_p5, %s987_s13, %s69_s20  }
   0xb   : > { %168 = sbr.rel (%p840_p7) target bundleno = 30 (0x1e), region = 20 }
  0x12   : > { %171 = sbr.rel (!%p78_p3) target bundleno = 30 (0x1e), region = 24  ;;  %s173_s23 = sand.u32 (%p78_p3), 1, %s987_s13  }
  0x13   : > { %s873_s24 = sshll.u32 (%p78_p3), %s995_s15, 3  ;;  %s841_s25 = sshll.u32 (%p78_p3), %s173_s23, 7 }
  0x14   : > { %s1070_s28 = scalar_lea.vmem (%p78_p3), %s1185_s1, %s873_s24  ;;  %s175_s29 = scalar_lea.vmem (%p78_p3), [#allocation2], %s841_s25 }
  0x15   : > { %v239_v0 = vld [vmem:[%s1070_s28] sm:$0xff] (%p78_p3)  ;;  %v241_v1 = vld [vmem:[%s1070_s28 + $0x10] sm:$0xff] (%p78_p3) }
  0x16   : > { %v243_v2 = vld [vmem:[%s1070_s28 + $0x20] sm:$0xff] (%p78_p3)  ;;  %240 = vst [vmem:[%s175_s29] sm:$0xff] (%p78_p3), %v239_v0  ;;  %242 = vst [vmem:[%s175_s29 + $0x8] sm:$0xff] (%p78_p3), %v241_v1  ;;  %v245_v3 = vld [vmem:[%s1070_s28 + $0x30] sm:$0xff] (%p78_p3) }
  0x17   : > { %244 = vst [vmem:[%s175_s29 + $0x10] sm:$0xff] (%p78_p3), %v243_v2  ;;  %v247_v4 = vld [vmem:[%s1070_s28 + $0x40] sm:$0xff] (%p78_p3)  ;;  %v249_v5 = vld [vmem:[%s1070_s28 + $0x50] sm:$0xff] (%p78_p3)  ;;  %246 = vst [vmem:[%s175_s29 + $0x18] sm:$0xff] (%p78_p3), %v245_v3 }
  0x18   : > { %248 = vst [vmem:[%s175_s29 + $0x20] sm:$0xff] (%p78_p3), %v247_v4  ;;  %250 = vst [vmem:[%s175_s29 + $0x28] sm:$0xff] (%p78_p3), %v249_v5  ;;  %v251_v6 = vld [vmem:[%s1070_s28 + $0x60] sm:$0xff] (%p78_p3)  ;;  %v253_v7 = vld [vmem:[%s1070_s28 + $0x70] sm:$0xff] (%p78_p3) }
  0x19   : > { %v255_v8 = vld [vmem:[%s1070_s28 + $0x80] sm:$0xff]  ;;  %252 = vst [vmem:[%s175_s29 + $0x30] sm:$0xff] %v251_v6  ;;  %254 = vst [vmem:[%s175_s29 + $0x38] sm:$0xff] %v253_v7  ;;  %v257_v9 = vld [vmem:[%s1070_s28 + $0x90] sm:$0xff] }
  0x1a   : > { %256 = vst [vmem:[%s175_s29 + $0x40] sm:$0xff] %v255_v8  ;;  %v259_v10 = vld [vmem:[%s1070_s28 + $0xa0] sm:$0xff]  ;;  %v261_v11 = vld [vmem:[%s1070_s28 + $0xb0] sm:$0xff]  ;;  %258 = vst [vmem:[%s175_s29 + $0x48] sm:$0xff] %v257_v9 }
  0x1b   : > { %260 = vst [vmem:[%s175_s29 + $0x50] sm:$0xff] %v259_v10  ;;  %262 = vst [vmem:[%s175_s29 + $0x58] sm:$0xff] %v261_v11  ;;  %v263_v12 = vld [vmem:[%s1070_s28 + $0xc0] sm:$0xff]  ;;  %v265_v13 = vld [vmem:[%s1070_s28 + $0xd0] sm:$0xff] }
  0x1c   : > { %v267_v14 = vld [vmem:[%s1070_s28 + $0xe0] sm:$0xff]  ;;  %264 = vst [vmem:[%s175_s29 + $0x60] sm:$0xff] %v263_v12  ;;  %266 = vst [vmem:[%s175_s29 + $0x68] sm:$0xff] %v265_v13  ;;  %v269_v15 = vld [vmem:[%s1070_s28 + $0xf0] sm:$0xff] }
  0x1d   : > { %268 = vst [vmem:[%s175_s29 + $0x70] sm:$0xff] %v267_v14  ;;  %270 = vst [vmem:[%s175_s29 + $0x78] sm:$0xff] %v269_v15 }
  0x1e PF: > { %p844_p8 = scmp.ge.s32.totalorder %s999_s16, 1  ;;  %p283_p9 = scmp.lt.s32.totalorder %s999_s16, 3 }
  0x20   : > { %p284_p10 = pnand %p844_p8, %p283_p9 }
  0x21   : > { %s290_s30 = sand.u32 (!%p284_p10), 1, %s983_s12   ;;  %v1001_v16 = vmov (!%p284_p10), 0   ;;  %v957_v33 = vld [vmem:[%s1184_s0] sm:$0xff] (!%p284_p10)   ;;  %v958_v34 = vld [vmem:[%s1184_s0 + $0x10] sm:$0xff] (!%p284_p10)   ;;  %v959_v35 = vld [vmem:[%s1184_s0 + $0x8] sm:$0xff] (!%p284_p10)   ;;  %s847_s19 = sshll.u32 (!%p284_p10), %s991_s14, 1  ;;  %v633_v37 = vlaneseq (!%p284_p10) }
  0x22   : > { %287 = sbr.rel (%p284_p10) target bundleno = 304 (0x130), region = 66  ;;  %s1091_s4 = sshll.u32 (!%p284_p10), %s290_s30, 7  ;;  %539 = vmatprep.mubr.bf16.mxu0 (!%p284_p10), %v1001_v16  ;;  %559 = vmatprep.mubr.bf16.mxu1 (!%p284_p10), %v1001_v16  ;;  %v960_v36 = vld [vmem:[%s1184_s0 + $0x18] sm:$0xff] (!%p284_p10)  }
  0x23   : > { %s1094_s5 = scalar_lea.vmem (!%p284_p10), [#allocation2], %s1091_s4  ;;  %p336_p11 = scmp.lt.s32.totalorder (!%p284_p10), %s847_s19, 3  ;;  %v634_v38 = vshrl.u32 (!%p284_p10), %v633_v37, 7 }
  0x24   : > { %v933_v17 = vld [vmem:[%s1094_s5 + $0x4] ss:$8 sps:$4 sm:$0xff] (!%p284_p10)   ;;  %v935_v18 = vld [vmem:[%s1094_s5] ss:$8 sps:$4 sm:$0xff] (!%p284_p10)   ;;  %v936_v19 = vld [vmem:[%s1094_s5 + $0x14] ss:$8 sps:$4 sm:$0xff] (!%p284_p10)  }
  0x25   : > { %507 = vmatprep.subr.bf16.mxu0 (!%p284_p10), %v933_v17  ;;  %875 = vmatprep.subr.bf16.mxu1 (!%p284_p10), %v933_v17  ;;  %v938_v20 = vld [vmem:[%s1094_s5 + $0x10] ss:$8 sps:$4 sm:$0xff] (!%p284_p10)   ;;  %v939_v21 = vld [vmem:[%s1094_s5 + $0x24] ss:$8 sps:$4 sm:$0xff] (!%p284_p10)   ;;  %v941_v22 = vld [vmem:[%s1094_s5 + $0x20] ss:$8 sps:$4 sm:$0xff] (!%p284_p10)  }
  0x26   : > { %508 = vmatpush1.bf16.msra.mxu0 (!%p284_p10), %v935_v18  ;;  %883 = vmatpush1.bf16.msra.mxu1 (!%p284_p10), %v935_v18  ;;  %v942_v23 = vld [vmem:[%s1094_s5 + $0x34] ss:$8 sps:$4 sm:$0xff] (!%p284_p10)   ;;  %v944_v24 = vld [vmem:[%s1094_s5 + $0x30] ss:$8 sps:$4 sm:$0xff] (!%p284_p10)   ;;  %v945_v25 = vld [vmem:[%s1094_s5 + $0x44] ss:$8 sps:$4 sm:$0xff] (!%p284_p10)  }
  0x27   : > { %509 = vmatprep.subr.bf16.mxu0 (!%p284_p10), %v936_v19  ;;  %876 = vmatprep.subr.bf16.mxu1 (!%p284_p10), %v936_v19  ;;  %v947_v26 = vld [vmem:[%s1094_s5 + $0x40] ss:$8 sps:$4 sm:$0xff] (!%p284_p10)   ;;  %v948_v27 = vld [vmem:[%s1094_s5 + $0x54] ss:$8 sps:$4 sm:$0xff] (!%p284_p10)   ;;  %v950_v28 = vld [vmem:[%s1094_s5 + $0x50] ss:$8 sps:$4 sm:$0xff] (!%p284_p10)  }
  0x28   : > { %v951_v29 = vld [vmem:[%s1094_s5 + $0x64] ss:$8 sps:$4 sm:$0xff] (!%p284_p10)   ;;  %v953_v30 = vld [vmem:[%s1094_s5 + $0x60] ss:$8 sps:$4 sm:$0xff] (!%p284_p10)   ;;  %v954_v31 = vld [vmem:[%s1094_s5 + $0x74] ss:$8 sps:$4 sm:$0xff] (!%p284_p10)  }
  0x29   : > { %v956_v32 = vld [vmem:[%s1094_s5 + $0x70] ss:$8 sps:$4 sm:$0xff]   ;;  %s1196_s19 = smov (!%p336_p11, %s847_s19), 3  ;;  %v635_v39 = vsub.s32 0, %v634_v38  ;;  %v639_v41 = vsub.s32 1, %v634_v38  ;;  %s1129_s25 = scalar_lea.vmem [#allocation3], %s1091_s4 }
  0x2a   : > { %510 = vmatpush1.bf16.msra.mxu0 %v938_v20  ;;  %884 = vmatpush1.bf16.msra.mxu1 %v938_v20  ;;  %s338_s24 = scalar_lea.vmem %s1186_s2, %s1196_s19  ;;  %s874_s26 = sshll.u32 (%p1057_p6), %s991_s14, 4 }
  0x2b   : > { %511 = vmatprep.subr.bf16.mxu0 %v939_v21  ;;  %877 = vmatprep.subr.bf16.mxu1 %v939_v21  ;;  %v631_v40 = vld [vmem:[%s338_s24] sm:$0x3]  ;;  %s687_s29 = scalar_lea.vmem (%p1057_p6), %s1187_s3, %s874_s26 }
  0x2c   : > { %v636_v42 = vrot.slane %v631_v40, %v635_v39  ;;  %v640_v45 = vrot.slane %v631_v40, %v639_v41 }
  0x2e   : > { %512 = vmatpush1.bf16.msra.mxu0 %v941_v22  ;;  %885 = vmatpush1.bf16.msra.mxu1 %v941_v22 }
  0x2f   : > { %513 = vmatprep.subr.bf16.mxu0 %v942_v23  ;;  %878 = vmatprep.subr.bf16.mxu1 %v942_v23 }
  0x32   : > { %514 = vmatpush1.bf16.msra.mxu0 %v944_v24  ;;  %886 = vmatpush1.bf16.msra.mxu1 %v944_v24 }
  0x33   : > { %515 = vmatprep.subr.bf16.mxu0 %v945_v25  ;;  %879 = vmatprep.subr.bf16.mxu1 %v945_v25 }
  0x36   : > { %516 = vmatpush1.bf16.msra.mxu0 %v947_v26  ;;  %887 = vmatpush1.bf16.msra.mxu1 %v947_v26 }
  0x37   : > { %517 = vmatprep.subr.bf16.mxu0 %v948_v27  ;;  %880 = vmatprep.subr.bf16.mxu1 %v948_v27 }
  0x3a   : > { %518 = vmatpush1.bf16.msra.mxu0 %v950_v28  ;;  %888 = vmatpush1.bf16.msra.mxu1 %v950_v28 }
  0x3b   : > { %519 = vmatprep.subr.bf16.mxu0 %v951_v29  ;;  %881 = vmatprep.subr.bf16.mxu1 %v951_v29 }
  0x3e   : > { %520 = vmatpush1.bf16.msra.mxu0 %v953_v30  ;;  %889 = vmatpush1.bf16.msra.mxu1 %v953_v30 }
  0x3f   : > { %521 = vmatprep.subr.bf16.mxu0 %v954_v31  ;;  %882 = vmatprep.subr.bf16.mxu1 %v954_v31 }
  0x42   : > { %522 = vmatpush1.bf16.msra.mxu0 %v956_v32  ;;  %890 = vmatpush1.bf16.msra.mxu1 %v956_v32 }
  0x45   : > { %540 = vmatmul.mubr.bf16.vlgmr.msra.gmra.mrb[0].mxu0 %v957_v33  ;;  %560 = vmatmul.mubr.bf16.vlgmr.msra.gmra.mrb[0].mxu1 %v958_v34 }
  0x46   : > { %549 = vmatprep.mubr.bf16.mxu0 %v1001_v16  ;;  %569 = vmatprep.mubr.bf16.mxu1 %v1001_v16 }
  0x4d   : > { %550 = vmatmul.mubr.bf16.gmra.mrb[4].mxu0 %v959_v35  ;;  %570 = vmatmul.mubr.bf16.gmra.mrb[4].mxu1 %v960_v36 }
 0x118   : > { %v541_v43 = vpop.f32.mrb[0].mxu0  ;;  %v561_v44 = vpop.f32.mrb[0].mxu1 }
 0x119   : > { %v543_v46 = vpop.f32.mrb[1].mxu0  ;;  %v563_v47 = vpop.f32.mrb[1].mxu1  ;;  %v643_v50 = vadd.f32 %v636_v42, %v541_v43  ;;  %v651_v51 = vadd.f32 %v636_v42, %v561_v44 }
 0x11a   : > { %v545_v48 = vpop.f32.mrb[2].mxu0  ;;  %v565_v49 = vpop.f32.mrb[2].mxu1  ;;  %v644_v54 = vadd.f32 %v640_v45, %v543_v46  ;;  %v652_v55 = vadd.f32 %v640_v45, %v563_v47 }
 0x11b   : > { %v547_v52 = vpop.f32.mrb[3].mxu0  ;;  %v567_v53 = vpop.f32.mrb[3].mxu1  ;;  %659 = vst [vmem:[%s1129_s25] sm:$0xff] %v643_v50  ;;  %667 = vst [vmem:[%s1129_s25 + $0x40] sm:$0xff] %v651_v51  ;;  %v645_v56 = vadd.f32 %v636_v42, %v545_v48  ;;  %v653_v57 = vadd.f32 %v636_v42, %v565_v49 }
 0x11c   : > { %660 = vst [vmem:[%s1129_s25 + $0x8] sm:$0xff] %v644_v54  ;;  %668 = vst [vmem:[%s1129_s25 + $0x48] sm:$0xff] %v652_v55  ;;  %v646_v58 = vadd.f32 %v640_v45, %v547_v52  ;;  %v654_v59 = vadd.f32 %v640_v45, %v567_v53 }
 0x11d   : > { %661 = vst [vmem:[%s1129_s25 + $0x10] sm:$0xff] %v645_v56  ;;  %669 = vst [vmem:[%s1129_s25 + $0x50] sm:$0xff] %v653_v57 }
 0x11e   : > { %662 = vst [vmem:[%s1129_s25 + $0x18] sm:$0xff] %v646_v58  ;;  %670 = vst [vmem:[%s1129_s25 + $0x58] sm:$0xff] %v654_v59 }
 0x120   : > { %v551_v60 = vpop.f32.mrb[4].mxu0  ;;  %v571_v61 = vpop.f32.mrb[4].mxu1  ;;  %681 = sbr.rel (!%p1057_p6) target bundleno = 304 (0x130), region = 82 }
 0x121   : > { %v553_v62 = vpop.f32.mrb[5].mxu0  ;;  %v573_v63 = vpop.f32.mrb[5].mxu1  ;;  %v647_v2 = vadd.f32 %v636_v42, %v551_v60  ;;  %v655_v3 = vadd.f32 %v636_v42, %v571_v61 }
 0x122   : > { %v555_v0 = vpop.f32.mrb[6].mxu0  ;;  %v575_v1 = vpop.f32.mrb[6].mxu1  ;;  %v648_v6 = vadd.f32 %v640_v45, %v553_v62  ;;  %v656_v7 = vadd.f32 %v640_v45, %v573_v63  ;;  %v700_v12 = vld [vmem:[%s1129_s25] sm:$0xff] (%p1057_p6) }
 0x123   : > { %v557_v4 = vpop.f32.mrb[7].mxu0  ;;  %v577_v5 = vpop.f32.mrb[7].mxu1  ;;  %663 = vst [vmem:[%s1129_s25 + $0x20] sm:$0xff] %v647_v2  ;;  %671 = vst [vmem:[%s1129_s25 + $0x60] sm:$0xff] %v655_v3  ;;  %v649_v8 = vadd.f32 %v636_v42, %v555_v0  ;;  %v657_v9 = vadd.f32 %v636_v42, %v575_v1  ;;  %v702_v13 = vld [vmem:[%s1129_s25 + $0x8] sm:$0xff] (%p1057_p6)  ;;  %v716_v20 = vld [vmem:[%s1129_s25 + $0x40] sm:$0xff] (%p1057_p6) }
 0x124   : > { %664 = vst [vmem:[%s1129_s25 + $0x28] sm:$0xff] %v648_v6  ;;  %672 = vst [vmem:[%s1129_s25 + $0x68] sm:$0xff] %v656_v7  ;;  %v650_v10 = vadd.f32 %v640_v45, %v557_v4  ;;  %v658_v11 = vadd.f32 %v640_v45, %v577_v5  ;;  %v704_v14 = vld [vmem:[%s1129_s25 + $0x10] sm:$0xff] (%p1057_p6)  ;;  %v718_v21 = vld [vmem:[%s1129_s25 + $0x48] sm:$0xff] (%p1057_p6) }
 0x125   : > { %665 = vst [vmem:[%s1129_s25 + $0x30] sm:$0xff] %v649_v8  ;;  %673 = vst [vmem:[%s1129_s25 + $0x70] sm:$0xff] %v657_v9  ;;  %v706_v15 = vld [vmem:[%s1129_s25 + $0x18] sm:$0xff] (%p1057_p6)  ;;  %v720_v22 = vld [vmem:[%s1129_s25 + $0x50] sm:$0xff] (%p1057_p6) }
 0x126   : > { %666 = vst [vmem:[%s1129_s25 + $0x38] sm:$0xff] %v650_v10  ;;  %674 = vst [vmem:[%s1129_s25 + $0x78] sm:$0xff] %v658_v11  ;;  %v722_v23 = vld [vmem:[%s1129_s25 + $0x58] sm:$0xff] (%p1057_p6) }
 0x127   : > { %701 = vst [vmem:[%s687_s29] sm:$0xff] %v700_v12  ;;  %703 = vst [vmem:[%s687_s29 + $0x8] sm:$0xff] %v702_v13 }
 0x128   : > { %705 = vst [vmem:[%s687_s29 + $0x20] sm:$0xff] %v704_v14  ;;  %707 = vst [vmem:[%s687_s29 + $0x28] sm:$0xff] %v706_v15 }
 0x129   : > { %717 = vst [vmem:[%s687_s29 + $0x80] sm:$0xff] %v716_v20  ;;  %719 = vst [vmem:[%s687_s29 + $0x88] sm:$0xff] %v718_v21 }
 0x12a   : > { %v708_v16 = vld [vmem:[%s1129_s25 + $0x20] sm:$0xff]  ;;  %721 = vst [vmem:[%s687_s29 + $0xa0] sm:$0xff] %v720_v22  ;;  %723 = vst [vmem:[%s687_s29 + $0xa8] sm:$0xff] %v722_v23 }
 0x12b   : > { %v710_v17 = vld [vmem:[%s1129_s25 + $0x28] sm:$0xff]  ;;  %709 = vst [vmem:[%s687_s29 + $0x40] sm:$0xff] %v708_v16  ;;  %v724_v24 = vld [vmem:[%s1129_s25 + $0x60] sm:$0xff] }
 0x12c   : > { %711 = vst [vmem:[%s687_s29 + $0x48] sm:$0xff] %v710_v17  ;;  %v712_v18 = vld [vmem:[%s1129_s25 + $0x30] sm:$0xff]  ;;  %v726_v25 = vld [vmem:[%s1129_s25 + $0x68] sm:$0xff]  ;;  %725 = vst [vmem:[%s687_s29 + $0xc0] sm:$0xff] %v724_v24 }
 0x12d   : > { %v714_v19 = vld [vmem:[%s1129_s25 + $0x38] sm:$0xff]  ;;  %713 = vst [vmem:[%s687_s29 + $0x60] sm:$0xff] %v712_v18  ;;  %v728_v26 = vld [vmem:[%s1129_s25 + $0x70] sm:$0xff]  ;;  %727 = vst [vmem:[%s687_s29 + $0xc8] sm:$0xff] %v726_v25 }
 0x12e   : > { %715 = vst [vmem:[%s687_s29 + $0x68] sm:$0xff] %v714_v19  ;;  %729 = vst [vmem:[%s687_s29 + $0xe0] sm:$0xff] %v728_v26  ;;  %v730_v27 = vld [vmem:[%s1129_s25 + $0x78] sm:$0xff] }
 0x12f   : > { %731 = vst [vmem:[%s687_s29 + $0xe8] sm:$0xff] %v730_v27 }
 0x130 PF: > { %s13_s16 = sadd.s32 1, %s999_s16   ;;  %s1189_s12 = smov %s987_s13 }
 0x131   : > { %p10_p12 = scmp.ge.s32.totalorder %s13_s16, 4   ;;  %s1190_s13 = smov %s1062_s22 }
 0x132   : > { %s1191_s14 = smov %s995_s15  ;;  %s1192_s15 = smov %s1194_s17 }
 0x133   :  { %12 = sbr.rel (!%p10_p12) target bundleno = 3 (0x3), region = 142 }

// kernel: decoder_rnn_forward.6
= control target key start
LH: loop header
LB: loop body
LE: loop exit
PB: predicated region body
PF: predicated region fallthrough
CT: control target
= control target key end

     0   :  { %v3488_v1 = vmov 0   ;;  %v3489_v33 = vmov 0.0|0.0   ;;  %v3490_v63 = vmov 1966171168   ;;  %s4460_s1 = inlined_call_operand.vmem [shape: bf16[128,512], index: 1, kind: input, shape index: {}]   ;;  %s4461_s0 = inlined_call_operand.vmem [shape: f32[8,8,512], index: 0, kind: input, shape index: {}]   ;;  %s4462_s2 = inlined_call_operand.vmem [shape: f32[8,8,128], index: 2, kind: output, shape index: {}]  }
   0x1   :  { %v3509_v0 = vld [vmem:[%s4460_s1 + $0x4] ss:$16 sps:$4 sm:$0xff]   ;;  %244 = vmatprep.mubr.bf16.mxu0 %v3488_v1  ;;  %285 = vmatprep.mubr.bf16.mxu1 %v3488_v1  ;;  %v3516_v2 = vld [vmem:[%s4460_s1] ss:$16 sps:$4 sm:$0xff]   ;;  %v3528_v4 = vld [vmem:[%s4460_s1 + $0xc] ss:$16 sps:$4 sm:$0xff]  }
   0x2   :  { %212 = vmatprep.subr.bf16.mxu0 %v3509_v0  ;;  %v3522_v3 = vld [vmem:[%s4460_s1 + $0x24] ss:$16 sps:$4 sm:$0xff]   ;;  %v3533_v5 = vld [vmem:[%s4460_s1 + $0x20] ss:$16 sps:$4 sm:$0xff]   ;;  %v3538_v6 = vld [vmem:[%s4460_s1 + $0x8] ss:$16 sps:$4 sm:$0xff]   ;;  %253 = vmatprep.subr.bf16.mxu1 %v3528_v4 }
   0x3   :  { %213 = vmatpush1.bf16.msra.mxu0 %v3516_v2  ;;  %v3544_v7 = vld [vmem:[%s4460_s1 + $0x44] ss:$16 sps:$4 sm:$0xff]   ;;  %v3550_v8 = vld [vmem:[%s4460_s1 + $0x2c] ss:$16 sps:$4 sm:$0xff]   ;;  %254 = vmatpush1.bf16.msra.mxu1 %v3538_v6  ;;  %v3556_v9 = vld [vmem:[%s4460_s1 + $0x28] ss:$16 sps:$4 sm:$0xff]  }
   0x4   :  { %214 = vmatprep.subr.bf16.mxu0 %v3522_v3  ;;  %255 = vmatprep.subr.bf16.mxu1 %v3550_v8  ;;  %v3563_v10 = vld [vmem:[%s4460_s1 + $0x40] ss:$16 sps:$4 sm:$0xff]   ;;  %v3569_v11 = vld [vmem:[%s4460_s1 + $0x64] ss:$16 sps:$4 sm:$0xff]   ;;  %v3574_v12 = vld [vmem:[%s4460_s1 + $0x4c] ss:$16 sps:$4 sm:$0xff]  }
   0x5   :  { %v3580_v13 = vld [vmem:[%s4460_s1 + $0x48] ss:$16 sps:$4 sm:$0xff]   ;;  %v3587_v14 = vld [vmem:[%s4460_s1 + $0x60] ss:$16 sps:$4 sm:$0xff]   ;;  %v3592_v15 = vld [vmem:[%s4460_s1 + $0x6c] ss:$16 sps:$4 sm:$0xff]  }
   0x6   :  { %v3598_v16 = vld [vmem:[%s4460_s1 + $0x84] ss:$16 sps:$4 sm:$0xff]   ;;  %v3604_v17 = vld [vmem:[%s4460_s1 + $0x80] ss:$16 sps:$4 sm:$0xff]   ;;  %v3609_v18 = vld [vmem:[%s4460_s1 + $0x68] ss:$16 sps:$4 sm:$0xff]  }
   0x7   :  { %215 = vmatpush1.bf16.msra.mxu0 %v3533_v5  ;;  %256 = vmatpush1.bf16.msra.mxu1 %v3556_v9  ;;  %v3616_v19 = vld [vmem:[%s4460_s1 + $0x8c] ss:$16 sps:$4 sm:$0xff]   ;;  %v3622_v20 = vld [vmem:[%s4460_s1 + $0xa4] ss:$16 sps:$4 sm:$0xff]   ;;  %v3628_v21 = vld [vmem:[%s4460_s1 + $0x88] ss:$16 sps:$4 sm:$0xff]  }
   0x8   :  { %216 = vmatprep.subr.bf16.mxu0 %v3544_v7  ;;  %257 = vmatprep.subr.bf16.mxu1 %v3574_v12  ;;  %v3635_v22 = vld [vmem:[%s4460_s1 + $0xa0] ss:$16 sps:$4 sm:$0xff]   ;;  %v3640_v23 = vld [vmem:[%s4460_s1 + $0xac] ss:$16 sps:$4 sm:$0xff]   ;;  %v3646_v24 = vld [vmem:[%s4460_s1 + $0xc4] ss:$16 sps:$4 sm:$0xff]  }
   0x9   :  { %v3651_v25 = vld [vmem:[%s4460_s1 + $0xc0] ss:$16 sps:$4 sm:$0xff]   ;;  %v3656_v26 = vld [vmem:[%s4460_s1 + $0xa8] ss:$16 sps:$4 sm:$0xff]   ;;  %v3661_v27 = vld [vmem:[%s4460_s1 + $0xcc] ss:$16 sps:$4 sm:$0xff]  }
   0xa   :  { %v3667_v28 = vld [vmem:[%s4460_s1 + $0xe4] ss:$16 sps:$4 sm:$0xff]   ;;  %v3675_v29 = vld [vmem:[%s4460_s1 + $0xc8] ss:$16 sps:$4 sm:$0xff]   ;;  %v3680_v30 = vld [vmem:[%s4460_s1 + $0xe0] ss:$16 sps:$4 sm:$0xff]  }
   0xb   :  { %217 = vmatpush1.bf16.msra.mxu0 %v3563_v10  ;;  %258 = vmatpush1.bf16.msra.mxu1 %v3580_v13  ;;  %v3685_v31 = vld [vmem:[%s4460_s1 + $0xec] ss:$16 sps:$4 sm:$0xff]   ;;  %v3694_v32 = vld [vmem:[%s4460_s1 + $0xe8] ss:$16 sps:$4 sm:$0xff]   ;;  %v14_v34 = vld [vmem:[%s4461_s0] sm:$0xff] }
   0xc   :  { %218 = vmatprep.subr.bf16.mxu0 %v3569_v11  ;;  %259 = vmatprep.subr.bf16.mxu1 %v3592_v15  ;;  %v15_v35 = vld [vmem:[%s4461_s0 + $0x8] sm:$0xff]  ;;  %v16_v39 = vld [vmem:[%s4461_s0 + $0x10] sm:$0xff]  ;;  %v17_v49 = vld [vmem:[%s4461_s0 + $0x18] sm:$0xff] }
   0xf   :  { %219 = vmatpush1.bf16.msra.mxu0 %v3587_v14  ;;  %260 = vmatpush1.bf16.msra.mxu1 %v3609_v18 }
  0x10   :  { %220 = vmatprep.subr.bf16.mxu0 %v3598_v16  ;;  %261 = vmatprep.subr.bf16.mxu1 %v3616_v19 }
  0x13   :  { %221 = vmatpush1.bf16.msra.mxu0 %v3604_v17  ;;  %262 = vmatpush1.bf16.msra.mxu1 %v3628_v21 }
  0x14   :  { %222 = vmatprep.subr.bf16.mxu0 %v3622_v20  ;;  %263 = vmatprep.subr.bf16.mxu1 %v3640_v23 }
  0x17   :  { %223 = vmatpush1.bf16.msra.mxu0 %v3635_v22  ;;  %264 = vmatpush1.bf16.msra.mxu1 %v3656_v26 }
  0x18   :  { %224 = vmatprep.subr.bf16.mxu0 %v3646_v24  ;;  %265 = vmatprep.subr.bf16.mxu1 %v3661_v27 }
  0x1b   :  { %225 = vmatpush1.bf16.msra.mxu0 %v3651_v25  ;;  %266 = vmatpush1.bf16.msra.mxu1 %v3675_v29 }
  0x1c   :  { %226 = vmatprep.subr.bf16.mxu0 %v3667_v28  ;;  %267 = vmatprep.subr.bf16.mxu1 %v3685_v31 }
  0x1f   :  { %227 = vmatpush1.bf16.msra.mxu0 %v3680_v30  ;;  %268 = vmatpush1.bf16.msra.mxu1 %v3694_v32 }
  0x20   :  { %584 = vmatprep.subr.bf16.mxu0 %v3509_v0  ;;  %625 = vmatprep.subr.bf16.mxu1 %v3528_v4 }
  0x22   :  { %245 = vmatmul.mubr.bf16.vlgmr.msra.gmra.mrb[0].mxu0 %v3489_v33  ;;  %286 = vmatmul.mubr.bf16.vlgmr.msra.gmra.mrb[0].mxu1 %v3489_v33  ;;  %v322_v33 = vunpack.c.l.s4 %v3490_v63 }
  0x23   :  { %585 = vmatpush1.bf16.msra.mxu0 %v3516_v2  ;;  %616 = vmatprep.mubr.bf16.mxu0 %v3488_v1 }
  0x24   :  { %586 = vmatprep.subr.bf16.mxu0 %v3522_v3  ;;  %626 = vmatpush1.bf16.msra.mxu1 %v3538_v6 }
  0x25   :  { %657 = vmatprep.mubr.bf16.mxu1 %v3488_v1  ;;  %627 = vmatprep.subr.bf16.mxu1 %v3550_v8 }
  0x27   :  { %587 = vmatpush1.bf16.msra.mxu0 %v3533_v5 }
  0x28   :  { %588 = vmatprep.subr.bf16.mxu0 %v3544_v7  ;;  %628 = vmatpush1.bf16.msra.mxu1 %v3556_v9 }
  0x29   :  { %629 = vmatprep.subr.bf16.mxu1 %v3574_v12 }
  0x2b   :  { %589 = vmatpush1.bf16.msra.mxu0 %v3563_v10 }
  0x2c   :  { %590 = vmatprep.subr.bf16.mxu0 %v3569_v11  ;;  %630 = vmatpush1.bf16.msra.mxu1 %v3580_v13 }
  0x2d   :  { %631 = vmatprep.subr.bf16.mxu1 %v3592_v15 }
  0x2f   :  { %591 = vmatpush1.bf16.msra.mxu0 %v3587_v14 }
  0x30   :  { %592 = vmatprep.subr.bf16.mxu0 %v3598_v16  ;;  %632 = vmatpush1.bf16.msra.mxu1 %v3609_v18 }
  0x31   :  { %633 = vmatprep.subr.bf16.mxu1 %v3616_v19 }
  0x33   :  { %593 = vmatpush1.bf16.msra.mxu0 %v3604_v17 }
  0x34   :  { %594 = vmatprep.subr.bf16.mxu0 %v3622_v20  ;;  %634 = vmatpush1.bf16.msra.mxu1 %v3628_v21 }
  0x35   :  { %635 = vmatprep.subr.bf16.mxu1 %v3640_v23 }
  0x37   :  { %595 = vmatpush1.bf16.msra.mxu0 %v3635_v22 }
  0x38   :  { %596 = vmatprep.subr.bf16.mxu0 %v3646_v24  ;;  %636 = vmatpush1.bf16.msra.mxu1 %v3656_v26 }
  0x39   :  { %637 = vmatprep.subr.bf16.mxu1 %v3661_v27 }
  0x3b   :  { %597 = vmatpush1.bf16.msra.mxu0 %v3651_v25 }
  0x3c   :  { %598 = vmatprep.subr.bf16.mxu0 %v3667_v28  ;;  %638 = vmatpush1.bf16.msra.mxu1 %v3675_v29 }
  0x3d   :  { %639 = vmatprep.subr.bf16.mxu1 %v3685_v31 }
  0x3f   :  { %599 = vmatpush1.bf16.msra.mxu0 %v3680_v30 }
  0x40   :  { %956 = vmatprep.subr.bf16.mxu0 %v3509_v0  ;;  %640 = vmatpush1.bf16.msra.mxu1 %v3694_v32 }
  0x41   :  { %997 = vmatprep.subr.bf16.mxu1 %v3528_v4 }
  0xf5   :  { %v246_v36 = vpop.f32.mrb[0].mxu0  ;;  %v287_v44 = vpop.f32.mrb[0].mxu1 }
  0xf6   :  { %v294_v37 = vadd.f32 %v246_v36, %v14_v34  ;;  %v248_v38 = vpop.f32.mrb[1].mxu0  ;;  %v296_v46 = vadd.f32 %v287_v44, %v16_v39  ;;  %v289_v47 = vpop.f32.mrb[1].mxu1  ;;  %v324_v34 = vlaneseq }
  0xf7   :  { %v295_v40 = vadd.f32 %v248_v38, %v15_v35  ;;  %v250_v41 = vpop.f32.mrb[2].mxu0  ;;  %v291_v48 = vpop.f32.mrb[2].mxu1  ;;  %v297_v51 = vadd.f32 %v289_v47, %v17_v49 }
  0xf8   :  { %v298_v42 = vmul.f32 0.5, %v294_v37  ;;  %v251_v43 = vpop.f32.mrb[3].mxu0  ;;  %v292_v50 = vpop.f32.mrb[3].mxu1  ;;  %v323_v37 = vunpack.c.0.s8 %v322_v33  ;;  %v325_v38 = vshrl.u32 %v324_v34, 7  ;;  %v3031_v34 = vld [vmem:[%s4461_s0 + $0x30] sm:$0xff] }
  0xf9   :  { %v302_v45 = vmul.f32 0.5, %v295_v40  ;;  %v307_v52 = vmul.f32 0.5, %v297_v51 }
  0xfa   :  { %3408 = vtanh.f32 %v298_v42  ;;  %v3751_v40 = vsub.s32 %v323_v37, %v325_v38 }
  0xfb   :  { %3410 = vtanh.f32 %v302_v45 }
  0xfc   :  { %3412 = vtanh.f32 %v296_v46 }
  0xfd   :  { %3414 = vtanh.f32 %v307_v52 }
 0x104   :  { %v3409_v53 = vpop.eup %3408 }
 0x105   :  { %v3411_v54 = vpop.eup %3410  ;;  %v300_v55 = vadd.f32 1.0, %v3409_v53 }
 0x106   :  { %v3413_v56 = vpop.eup %3412  ;;  %v304_v57 = vadd.f32 1.0, %v3411_v54 }
 0x107   :  { %v301_v58 = vmul.f32 0.5, %v300_v55  ;;  %v3415_v35 = vpop.eup %3414 }
 0x108   :  { %v305_v59 = vmul.f32 0.5, %v304_v57  ;;  %v309_v36 = vadd.f32 1.0, %v3415_v35  ;;  %v3029_v57 = vld [vmem:[%s4461_s0 + $0x20] sm:$0xff] }
 0x109   :  { %v313_v60 = vmul.f32 %v3413_v56, %v301_v58  ;;  %v3030_v58 = vld [vmem:[%s4461_s0 + $0x28] sm:$0xff] }
 0x10a   :  { %v312_v61 = vmul.f32 0.0, %v305_v59  ;;  %v310_v39 = vmul.f32 0.5, %v309_v36 }
 0x10c   :  { %v3748_v62 = vadd.f32 %v313_v60, %v312_v61 }
 0x10e   :  { %3416 = vtanh.f32 %v3748_v62 }
 0x118   :  { %v3417_v41 = vpop.eup %3416 }
 0x119   :  { %v316_v42 = vmul.f32 %v3417_v41, %v310_v39 }
 0x11b   :  { %v320_v43 = vcombine.high %v316_v42, %v316_v42  ;;  %v327_v44 = vrot.slane %v316_v42, %v3751_v40  ;;  %v391_v45 = vpack.c.bf16 %v316_v42, %v316_v42  ;;  %v3032_v42 = vld [vmem:[%s4461_s0 + $0x38] sm:$0xff] }
 0x11d   :  { %v334_v46 = vrot.slane %v320_v43, %v3751_v40  ;;  %v335_v47 = vcombine.high %v327_v44, %v327_v44  ;;  %v343_v48 = vrot.slane %v327_v44, %v3751_v40  ;;  %3025 = vst.sshfl [vmem:[%s4462_s2] sm:$0x1 pattern:$0x73625140] %v327_v44  ;;  %617 = vmatmul.mubr.bf16.vlgmr.msra.gmra.mrb[4].mxu0 %v391_v45 }
 0x11e   :  { %658 = vmatmul.mubr.bf16.vlgmr.msra.gmra.mrb[4].mxu1 %v391_v45  ;;  %957 = vmatpush1.bf16.msra.mxu0 %v3516_v2 }
 0x11f   :  { %998 = vmatpush1.bf16.msra.mxu1 %v3538_v6  ;;  %v336_v49 = vcombine.high %v334_v46, %v334_v46  ;;  %v350_v50 = vrot.slane %v334_v46, %v3751_v40  ;;  %v357_v51 = vrot.slane %v335_v47, %v3751_v40  ;;  %v365_v52 = vcombine.high %v343_v48, %v343_v48 }
 0x120   :  { %3026 = vst.sshfl [vmem:[%s4462_s2 + $0x8] sm:$0x1 pattern:$0x73625140] %v335_v47  ;;  %958 = vmatprep.subr.bf16.mxu0 %v3522_v3  ;;  %999 = vmatprep.subr.bf16.mxu1 %v3550_v8 }
 0x121   :  { %3027 = vst.sshfl [vmem:[%s4462_s2 + $0x20] sm:$0x1 pattern:$0x73625140] %v334_v46  ;;  %988 = vmatprep.mubr.bf16.mxu0 %v3488_v1  ;;  %v364_v53 = vrot.slane %v336_v49, %v3751_v40  ;;  %v366_v54 = vcombine.high %v350_v50, %v350_v50  ;;  %v367_v55 = vcombine.high %v357_v51, %v357_v51  ;;  %379 = vst [vmem:[%s4462_s2 + $0x10] sm:$0x1] %v365_v52 }
 0x122   :  { %3028 = vst.sshfl [vmem:[%s4462_s2 + $0x28] sm:$0x1 pattern:$0x73625140] %v336_v49  ;;  %1029 = vmatprep.mubr.bf16.mxu1 %v3488_v1  ;;  %959 = vmatpush1.bf16.msra.mxu0 %v3533_v5 }
 0x123   :  { %1000 = vmatpush1.bf16.msra.mxu1 %v3556_v9  ;;  %v368_v56 = vcombine.high %v364_v53, %v364_v53  ;;  %380 = vst [vmem:[%s4462_s2 + $0x18] sm:$0x1] %v367_v55  ;;  %383 = vst [vmem:[%s4462_s2 + $0x30] sm:$0x1] %v366_v54  ;;  %960 = vmatprep.subr.bf16.mxu0 %v3544_v7 }
 0x124   :  { %1001 = vmatprep.subr.bf16.mxu1 %v3574_v12 }
 0x125   :  { %384 = vst [vmem:[%s4462_s2 + $0x38] sm:$0x1] %v368_v56 }
 0x126   :  { %961 = vmatpush1.bf16.msra.mxu0 %v3563_v10 }
 0x127   :  { %1002 = vmatpush1.bf16.msra.mxu1 %v3580_v13  ;;  %962 = vmatprep.subr.bf16.mxu0 %v3569_v11 }
 0x128   :  { %1003 = vmatprep.subr.bf16.mxu1 %v3592_v15 }
 0x12a   :  { %963 = vmatpush1.bf16.msra.mxu0 %v3587_v14 }
 0x12b   :  { %1004 = vmatpush1.bf16.msra.mxu1 %v3609_v18  ;;  %964 = vmatprep.subr.bf16.mxu0 %v3598_v16 }
 0x12c   :  { %1005 = vmatprep.subr.bf16.mxu1 %v3616_v19 }
 0x12e   :  { %965 = vmatpush1.bf16.msra.mxu0 %v3604_v17 }
 0x12f   :  { %1006 = vmatpush1.bf16.msra.mxu1 %v3628_v21  ;;  %966 = vmatprep.subr.bf16.mxu0 %v3622_v20 }
 0x130   :  { %1007 = vmatprep.subr.bf16.mxu1 %v3640_v23 }
 0x132   :  { %967 = vmatpush1.bf16.msra.mxu0 %v3635_v22 }
 0x133   :  { %1008 = vmatpush1.bf16.msra.mxu1 %v3656_v26  ;;  %968 = vmatprep.subr.bf16.mxu0 %v3646_v24 }
 0x134   :  { %1009 = vmatprep.subr.bf16.mxu1 %v3661_v27 }
 0x136   :  { %969 = vmatpush1.bf16.msra.mxu0 %v3651_v25 }
 0x137   :  { %1010 = vmatpush1.bf16.msra.mxu1 %v3675_v29  ;;  %970 = vmatprep.subr.bf16.mxu0 %v3667_v28 }
 0x138   :  { %1011 = vmatprep.subr.bf16.mxu1 %v3685_v31 }
 0x13a   :  { %971 = vmatpush1.bf16.msra.mxu0 %v3680_v30 }
 0x13b   :  { %1012 = vmatpush1.bf16.msra.mxu1 %v3694_v32  ;;  %1328 = vmatprep.subr.bf16.mxu0 %v3509_v0 }
 0x13c   :  { %1369 = vmatprep.subr.bf16.mxu1 %v3528_v4 }
 0x1f0   :  { %v618_v59 = vpop.f32.mrb[4].mxu0 }
 0x1f1   :  { %v659_v60 = vpop.f32.mrb[4].mxu1  ;;  %v666_v61 = vadd.f32 %v3029_v57, %v618_v59  ;;  %v620_v63 = vpop.f32.mrb[5].mxu0 }
 0x1f2   :  { %v661_v33 = vpop.f32.mrb[5].mxu1  ;;  %v667_v0 = vadd.f32 %v3030_v58, %v620_v63  ;;  %v622_v35 = vpop.f32.mrb[6].mxu0  ;;  %v668_v41 = vadd.f32 %v3031_v34, %v659_v60 }
 0x1f3   :  { %v663_v4 = vpop.f32.mrb[6].mxu1  ;;  %v670_v36 = vmul.f32 0.5, %v666_v61  ;;  %v623_v37 = vpop.f32.mrb[7].mxu0  ;;  %v669_v43 = vadd.f32 %v3032_v42, %v661_v33 }
 0x1f4   :  { %v664_v38 = vpop.f32.mrb[7].mxu1  ;;  %v674_v39 = vmul.f32 0.5, %v667_v0 }
 0x1f5   :  { %3418 = vtanh.f32 %v670_v36  ;;  %v679_v44 = vmul.f32 0.5, %v669_v43 }
 0x1f6   :  { %3420 = vtanh.f32 %v674_v39 }
 0x1f7   :  { %3422 = vtanh.f32 %v668_v41 }
 0x1f8   :  { %3424 = vtanh.f32 %v679_v44 }
 0x1ff   :  { %v3419_v45 = vpop.eup %3418 }
 0x200   :  { %v3421_v46 = vpop.eup %3420  ;;  %v672_v47 = vadd.f32 1.0, %v3419_v45 }
 0x201   :  { %v676_v48 = vadd.f32 1.0, %v3421_v46  ;;  %v3423_v50 = vpop.eup %3422 }
 0x202   :  { %v673_v49 = vmul.f32 0.5, %v672_v47  ;;  %v3425_v55 = vpop.eup %3424 }
 0x203   :  { %v677_v51 = vmul.f32 0.5, %v676_v48  ;;  %v681_v56 = vadd.f32 1.0, %v3425_v55 }
 0x204   :  { %v685_v52 = vmul.f32 %v3423_v50, %v673_v49 }
 0x205   :  { %v684_v53 = vmul.f32 %v677_v51, %v3748_v62  ;;  %v682_v57 = vmul.f32 0.5, %v681_v56 }
 0x207   :  { %v3830_v54 = vadd.f32 %v685_v52, %v684_v53 }
 0x209   :  { %3426 = vtanh.f32 %v3830_v54 }
 0x213   :  { %v3427_v58 = vpop.eup %3426 }
 0x214   :  { %v688_v59 = vmul.f32 %v3427_v58, %v682_v57 }
 0x216   :  { %v692_v60 = vcombine.high %v688_v59, %v688_v59  ;;  %v699_v61 = vrot.slane %v688_v59, %v3751_v40  ;;  %v763_v63 = vpack.c.bf16 %v688_v59, %v688_v59 }
 0x218   :  { %v706_v33 = vrot.slane %v692_v60, %v3751_v40  ;;  %v707_v34 = vcombine.high %v699_v61, %v699_v61  ;;  %v715_v0 = vrot.slane %v699_v61, %v3751_v40  ;;  %3065 = vst.sshfl [vmem:[%s4462_s2 + $0x1] sm:$0x1 pattern:$0x73625140] %v699_v61  ;;  %989 = vmatmul.mubr.bf16.vlgmr.msra.gmra.mrb[8].mxu0 %v763_v63  ;;  %v3946_v60 = vld [vmem:[%s4460_s1 + $0x4] ss:$16 sps:$4 sm:$0xff]  }
 0x219   :  { %1030 = vmatmul.mubr.bf16.vlgmr.msra.gmra.mrb[8].mxu1 %v763_v63  ;;  %1329 = vmatpush1.bf16.msra.mxu0 %v3516_v2  ;;  %v3951_v61 = vld [vmem:[%s4460_s1 + $0xc] ss:$16 sps:$4 sm:$0xff]   ;;  %v3956_v63 = vld [vmem:[%s4460_s1] ss:$16 sps:$4 sm:$0xff]  }
 0x21a   :  { %1370 = vmatpush1.bf16.msra.mxu1 %v3538_v6  ;;  %v708_v62 = vcombine.high %v706_v33, %v706_v33  ;;  %v722_v35 = vrot.slane %v706_v33, %v3751_v40  ;;  %v729_v4 = vrot.slane %v707_v34, %v3751_v40  ;;  %v737_v36 = vcombine.high %v715_v0, %v715_v0  ;;  %v3975_v0 = vld [vmem:[%s4460_s1 + $0x2c] ss:$16 sps:$4 sm:$0xff]  }
 0x21b   :  { %3066 = vst.sshfl [vmem:[%s4462_s2 + $0x9] sm:$0x1 pattern:$0x73625140] %v707_v34  ;;  %1330 = vmatprep.subr.bf16.mxu0 %v3522_v3  ;;  %1371 = vmatprep.subr.bf16.mxu1 %v3550_v8  ;;  %v3970_v34 = vld [vmem:[%s4460_s1 + $0x24] ss:$16 sps:$4 sm:$0xff]  }
 0x21c   :  { %3067 = vst.sshfl [vmem:[%s4462_s2 + $0x21] sm:$0x1 pattern:$0x73625140] %v706_v33  ;;  %1360 = vmatprep.mubr.bf16.mxu0 %v3488_v1  ;;  %v736_v2 = vrot.slane %v708_v62, %v3751_v40  ;;  %v738_v6 = vcombine.high %v722_v35, %v722_v35  ;;  %v739_v37 = vcombine.high %v729_v4, %v729_v4  ;;  %751 = vst [vmem:[%s4462_s2 + $0x11] sm:$0x1] %v737_v36 }
 0x21d   :  { %3068 = vst.sshfl [vmem:[%s4462_s2 + $0x29] sm:$0x1 pattern:$0x73625140] %v708_v62  ;;  %1401 = vmatprep.mubr.bf16.mxu1 %v3488_v1  ;;  %1331 = vmatpush1.bf16.msra.mxu0 %v3533_v5  ;;  %v3069_v5 = vld [vmem:[%s4461_s0 + $0x40] sm:$0xff] }
 0x21e   :  { %1372 = vmatpush1.bf16.msra.mxu1 %v3556_v9  ;;  %v740_v3 = vcombine.high %v736_v2, %v736_v2  ;;  %752 = vst [vmem:[%s4462_s2 + $0x19] sm:$0x1] %v739_v37  ;;  %755 = vst [vmem:[%s4462_s2 + $0x31] sm:$0x1] %v738_v6  ;;  %1332 = vmatprep.subr.bf16.mxu0 %v3544_v7  ;;  %v3070_v7 = vld [vmem:[%s4461_s0 + $0x48] sm:$0xff] }
 0x21f   :  { %1373 = vmatprep.subr.bf16.mxu1 %v3574_v12  ;;  %v3961_v33 = vld [vmem:[%s4460_s1 + $0x8] ss:$16 sps:$4 sm:$0xff]   ;;  %v3980_v62 = vld [vmem:[%s4460_s1 + $0x20] ss:$16 sps:$4 sm:$0xff]   ;;  %v3994_v4 = vld [vmem:[%s4460_s1 + $0x44] ss:$16 sps:$4 sm:$0xff]  }
 0x220   :  { %756 = vst [vmem:[%s4462_s2 + $0x39] sm:$0x1] %v740_v3  ;;  %v3985_v35 = vld [vmem:[%s4460_s1 + $0x28] ss:$16 sps:$4 sm:$0xff]   ;;  %v3999_v36 = vld [vmem:[%s4460_s1 + $0x4c] ss:$16 sps:$4 sm:$0xff]  }
 0x221   :  { %1333 = vmatpush1.bf16.msra.mxu0 %v3563_v10  ;;  %v4004_v2 = vld [vmem:[%s4460_s1 + $0x40] ss:$16 sps:$4 sm:$0xff]   ;;  %v4009_v6 = vld [vmem:[%s4460_s1 + $0x48] ss:$16 sps:$4 sm:$0xff]   ;;  %v4018_v37 = vld [vmem:[%s4460_s1 + $0x64] ss:$16 sps:$4 sm:$0xff]  }
 0x222   :  { %1374 = vmatpush1.bf16.msra.mxu1 %v3580_v13  ;;  %1334 = vmatprep.subr.bf16.mxu0 %v3569_v11  ;;  %v3071_v13 = vld [vmem:[%s4461_s0 + $0x50] sm:$0xff]  ;;  %v4023_v3 = vld [vmem:[%s4460_s1 + $0x6c] ss:$16 sps:$4 sm:$0xff]  }
 0x223   :  { %1375 = vmatprep.subr.bf16.mxu1 %v3592_v15 }
 0x225   :  { %1335 = vmatpush1.bf16.msra.mxu0 %v3587_v14 }
 0x226   :  { %1376 = vmatpush1.bf16.msra.mxu1 %v3609_v18  ;;  %1336 = vmatprep.subr.bf16.mxu0 %v3598_v16 }
 0x227   :  { %1377 = vmatprep.subr.bf16.mxu1 %v3616_v19 }
 0x229   :  { %1337 = vmatpush1.bf16.msra.mxu0 %v3604_v17 }
 0x22a   :  { %1378 = vmatpush1.bf16.msra.mxu1 %v3628_v21  ;;  %1338 = vmatprep.subr.bf16.mxu0 %v3622_v20 }
 0x22b   :  { %1379 = vmatprep.subr.bf16.mxu1 %v3640_v23 }
 0x22d   :  { %1339 = vmatpush1.bf16.msra.mxu0 %v3635_v22  ;;  %v3072_v22 = vld [vmem:[%s4461_s0 + $0x58] sm:$0xff] }
 0x22e   :  { %1380 = vmatpush1.bf16.msra.mxu1 %v3656_v26  ;;  %1340 = vmatprep.subr.bf16.mxu0 %v3646_v24 }
 0x22f   :  { %1381 = vmatprep.subr.bf16.mxu1 %v3661_v27 }
 0x231   :  { %1341 = vmatpush1.bf16.msra.mxu0 %v3651_v25 }
 0x232   :  { %1382 = vmatpush1.bf16.msra.mxu1 %v3675_v29  ;;  %1342 = vmatprep.subr.bf16.mxu0 %v3667_v28 }
 0x233   :  { %1383 = vmatprep.subr.bf16.mxu1 %v3685_v31 }
 0x235   :  { %1343 = vmatpush1.bf16.msra.mxu0 %v3680_v30 }
 0x236   :  { %1384 = vmatpush1.bf16.msra.mxu1 %v3694_v32  ;;  %1700 = vmatprep.subr.bf16.mxu0 %v3946_v60 }
 0x237   :  { %1741 = vmatprep.subr.bf16.mxu1 %v3951_v61 }
 0x2eb   :  { %v990_v8 = vpop.f32.mrb[8].mxu0 }
 0x2ec   :  { %v1031_v9 = vpop.f32.mrb[8].mxu1  ;;  %v1038_v10 = vadd.f32 %v3069_v5, %v990_v8  ;;  %v992_v11 = vpop.f32.mrb[9].mxu0  ;;  %v4028_v5 = vld [vmem:[%s4460_s1 + $0x60] ss:$16 sps:$4 sm:$0xff]   ;;  %v4042_v8 = vld [vmem:[%s4460_s1 + $0x84] ss:$16 sps:$4 sm:$0xff]  }
 0x2ed   :  { %v1033_v12 = vpop.f32.mrb[9].mxu1  ;;  %v1039_v14 = vadd.f32 %v3070_v7, %v992_v11  ;;  %v994_v15 = vpop.f32.mrb[10].mxu0  ;;  %v1040_v21 = vadd.f32 %v3071_v13, %v1031_v9  ;;  %v4033_v7 = vld [vmem:[%s4460_s1 + $0x68] ss:$16 sps:$4 sm:$0xff]   ;;  %v4047_v9 = vld [vmem:[%s4460_s1 + $0x8c] ss:$16 sps:$4 sm:$0xff]  }
 0x2ee   :  { %v1035_v16 = vpop.f32.mrb[10].mxu1  ;;  %v1042_v17 = vmul.f32 0.5, %v1038_v10  ;;  %v995_v18 = vpop.f32.mrb[11].mxu0  ;;  %v1041_v23 = vadd.f32 %v3072_v22, %v1033_v12  ;;  %v4052_v10 = vld [vmem:[%s4460_s1 + $0x80] ss:$16 sps:$4 sm:$0xff]  }
 0x2ef   :  { %v1036_v19 = vpop.f32.mrb[11].mxu1  ;;  %v1046_v20 = vmul.f32 0.5, %v1039_v14  ;;  %v4057_v11 = vld [vmem:[%s4460_s1 + $0x88] ss:$16 sps:$4 sm:$0xff]   ;;  %v4066_v12 = vld [vmem:[%s4460_s1 + $0xa4] ss:$16 sps:$4 sm:$0xff]  }
 0x2f0   :  { %3428 = vtanh.f32 %v1042_v17  ;;  %v1051_v24 = vmul.f32 0.5, %v1041_v23  ;;  %v4071_v13 = vld [vmem:[%s4460_s1 + $0xac] ss:$16 sps:$4 sm:$0xff]   ;;  %v4076_v14 = vld [vmem:[%s4460_s1 + $0xa0] ss:$16 sps:$4 sm:$0xff]  }
 0x2f1   :  { %3430 = vtanh.f32 %v1046_v20  ;;  %v4081_v15 = vld [vmem:[%s4460_s1 + $0xa8] ss:$16 sps:$4 sm:$0xff]   ;;  %v4090_v16 = vld [vmem:[%s4460_s1 + $0xc4] ss:$16 sps:$4 sm:$0xff]   ;;  %v4095_v17 = vld [vmem:[%s4460_s1 + $0xcc] ss:$16 sps:$4 sm:$0xff]  }
 0x2f2   :  { %3432 = vtanh.f32 %v1040_v21  ;;  %v4100_v18 = vld [vmem:[%s4460_s1 + $0xc0] ss:$16 sps:$4 sm:$0xff]   ;;  %v4105_v19 = vld [vmem:[%s4460_s1 + $0xc8] ss:$16 sps:$4 sm:$0xff]   ;;  %v4114_v20 = vld [vmem:[%s4460_s1 + $0xe4] ss:$16 sps:$4 sm:$0xff]  }
 0x2f3   :  { %3434 = vtanh.f32 %v1051_v24  ;;  %v4119_v21 = vld [vmem:[%s4460_s1 + $0xec] ss:$16 sps:$4 sm:$0xff]   ;;  %v4124_v22 = vld [vmem:[%s4460_s1 + $0xe0] ss:$16 sps:$4 sm:$0xff]   ;;  %v4129_v23 = vld [vmem:[%s4460_s1 + $0xe8] ss:$16 sps:$4 sm:$0xff]  }
 0x2f4   :  { %v3109_v24 = vld [vmem:[%s4461_s0 + $0x60] sm:$0xff] }
 0x2fa   :  { %v3429_v25 = vpop.eup %3428 }
 0x2fb   :  { %v3431_v26 = vpop.eup %3430  ;;  %v1044_v27 = vadd.f32 1.0, %v3429_v25  ;;  %v3110_v25 = vld [vmem:[%s4461_s0 + $0x68] sm:$0xff] }
 0x2fc   :  { %v1048_v28 = vadd.f32 1.0, %v3431_v26  ;;  %v3433_v30 = vpop.eup %3432 }
 0x2fd   :  { %v1045_v29 = vmul.f32 0.5, %v1044_v27  ;;  %v3435_v41 = vpop.eup %3434 }
 0x2fe   :  { %v1049_v31 = vmul.f32 0.5, %v1048_v28  ;;  %v1053_v42 = vadd.f32 1.0, %v3435_v41 }
 0x2ff   :  { %v1057_v32 = vmul.f32 %v3433_v30, %v1045_v29 }
 0x300   :  { %v1056_v38 = vmul.f32 %v1049_v31, %v3830_v54  ;;  %v1054_v43 = vmul.f32 0.5, %v1053_v42  ;;  %v3111_v31 = vld [vmem:[%s4461_s0 + $0x70] sm:$0xff] }
 0x302   :  { %v3908_v39 = vadd.f32 %v1057_v32, %v1056_v38 }
 0x304   :  { %3436 = vtanh.f32 %v3908_v39 }
 0x30e   :  { %v3437_v44 = vpop.eup %3436 }
 0x30f   :  { %v1060_v45 = vmul.f32 %v3437_v44, %v1054_v43 }
 0x311   :  { %v1064_v46 = vcombine.high %v1060_v45, %v1060_v45  ;;  %v1071_v47 = vrot.slane %v1060_v45, %v3751_v40  ;;  %v1135_v48 = vpack.c.bf16 %v1060_v45, %v1060_v45 }
 0x313   :  { %v1078_v49 = vrot.slane %v1064_v46, %v3751_v40  ;;  %v1079_v50 = vcombine.high %v1071_v47, %v1071_v47  ;;  %v1087_v51 = vrot.slane %v1071_v47, %v3751_v40  ;;  %3105 = vst.sshfl [vmem:[%s4462_s2 + $0x2] sm:$0x1 pattern:$0x73625140] %v1071_v47  ;;  %1361 = vmatmul.mubr.bf16.vlgmr.msra.gmra.mrb[12].mxu0 %v1135_v48  ;;  %v3112_v47 = vld [vmem:[%s4461_s0 + $0x78] sm:$0xff] }
 0x314   :  { %1402 = vmatmul.mubr.bf16.vlgmr.msra.gmra.mrb[12].mxu1 %v1135_v48  ;;  %1732 = vmatprep.mubr.bf16.mxu0 %v3488_v1 }
 0x315   :  { %1773 = vmatprep.mubr.bf16.mxu1 %v3488_v1  ;;  %v1080_v52 = vcombine.high %v1078_v49, %v1078_v49  ;;  %v1094_v53 = vrot.slane %v1078_v49, %v3751_v40  ;;  %v1101_v54 = vrot.slane %v1079_v50, %v3751_v40  ;;  %v1109_v55 = vcombine.high %v1087_v51, %v1087_v51 }
 0x316   :  { %3106 = vst.sshfl [vmem:[%s4462_s2 + $0xa] sm:$0x1 pattern:$0x73625140] %v1079_v50  ;;  %1701 = vmatpush1.bf16.msra.mxu0 %v3956_v63  ;;  %1742 = vmatpush1.bf16.msra.mxu1 %v3961_v33 }
 0x317   :  { %3107 = vst.sshfl [vmem:[%s4462_s2 + $0x22] sm:$0x1 pattern:$0x73625140] %v1078_v49  ;;  %v1108_v56 = vrot.slane %v1080_v52, %v3751_v40  ;;  %v1110_v57 = vcombine.high %v1094_v53, %v1094_v53  ;;  %v1111_v58 = vcombine.high %v1101_v54, %v1101_v54  ;;  %1123 = vst [vmem:[%s4462_s2 + $0x12] sm:$0x1] %v1109_v55  ;;  %1702 = vmatprep.subr.bf16.mxu0 %v3970_v34 }
 0x318   :  { %3108 = vst.sshfl [vmem:[%s4462_s2 + $0x2a] sm:$0x1 pattern:$0x73625140] %v1080_v52  ;;  %1743 = vmatprep.subr.bf16.mxu1 %v3975_v0 }
 0x319   :  { %v1112_v59 = vcombine.high %v1108_v56, %v1108_v56  ;;  %1124 = vst [vmem:[%s4462_s2 + $0x1a] sm:$0x1] %v1111_v58  ;;  %1127 = vst [vmem:[%s4462_s2 + $0x32] sm:$0x1] %v1110_v57 }
 0x31a   :  { %1703 = vmatpush1.bf16.msra.mxu0 %v3980_v62  ;;  %1744 = vmatpush1.bf16.msra.mxu1 %v3985_v35 }
 0x31b   :  { %1128 = vst [vmem:[%s4462_s2 + $0x3a] sm:$0x1] %v1112_v59  ;;  %1704 = vmatprep.subr.bf16.mxu0 %v3994_v4  ;;  %1745 = vmatprep.subr.bf16.mxu1 %v3999_v36 }
 0x31e   :  { %1705 = vmatpush1.bf16.msra.mxu0 %v4004_v2  ;;  %1746 = vmatpush1.bf16.msra.mxu1 %v4009_v6 }
 0x31f   :  { %1706 = vmatprep.subr.bf16.mxu0 %v4018_v37  ;;  %1747 = vmatprep.subr.bf16.mxu1 %v4023_v3 }
 0x322   :  { %1707 = vmatpush1.bf16.msra.mxu0 %v4028_v5  ;;  %1748 = vmatpush1.bf16.msra.mxu1 %v4033_v7 }
 0x323   :  { %1708 = vmatprep.subr.bf16.mxu0 %v4042_v8  ;;  %1749 = vmatprep.subr.bf16.mxu1 %v4047_v9 }
 0x326   :  { %1709 = vmatpush1.bf16.msra.mxu0 %v4052_v10  ;;  %1750 = vmatpush1.bf16.msra.mxu1 %v4057_v11 }
 0x327   :  { %1710 = vmatprep.subr.bf16.mxu0 %v4066_v12  ;;  %1751 = vmatprep.subr.bf16.mxu1 %v4071_v13 }
 0x32a   :  { %1711 = vmatpush1.bf16.msra.mxu0 %v4076_v14  ;;  %1752 = vmatpush1.bf16.msra.mxu1 %v4081_v15 }
 0x32b   :  { %1712 = vmatprep.subr.bf16.mxu0 %v4090_v16  ;;  %1753 = vmatprep.subr.bf16.mxu1 %v4095_v17 }
 0x32e   :  { %1713 = vmatpush1.bf16.msra.mxu0 %v4100_v18  ;;  %1754 = vmatpush1.bf16.msra.mxu1 %v4105_v19 }
 0x32f   :  { %1714 = vmatprep.subr.bf16.mxu0 %v4114_v20  ;;  %1755 = vmatprep.subr.bf16.mxu1 %v4119_v21 }
 0x332   :  { %1715 = vmatpush1.bf16.msra.mxu0 %v4124_v22  ;;  %1756 = vmatpush1.bf16.msra.mxu1 %v4129_v23 }
 0x333   :  { %2072 = vmatprep.subr.bf16.mxu0 %v3946_v60  ;;  %2113 = vmatprep.subr.bf16.mxu1 %v3951_v61 }
 0x3e6   :  { %v1362_v26 = vpop.f32.mrb[12].mxu0 }
 0x3e7   :  { %v1403_v27 = vpop.f32.mrb[12].mxu1  ;;  %v1410_v28 = vadd.f32 %v3109_v24, %v1362_v26  ;;  %v1364_v29 = vpop.f32.mrb[13].mxu0 }
 0x3e8   :  { %v1405_v30 = vpop.f32.mrb[13].mxu1  ;;  %v1411_v32 = vadd.f32 %v3110_v25, %v1364_v29  ;;  %v1366_v38 = vpop.f32.mrb[14].mxu0  ;;  %v1412_v46 = vadd.f32 %v3111_v31, %v1403_v27 }
 0x3e9   :  { %v1407_v41 = vpop.f32.mrb[14].mxu1  ;;  %v1414_v42 = vmul.f32 0.5, %v1410_v28  ;;  %v1367_v43 = vpop.f32.mrb[15].mxu0  ;;  %v1413_v48 = vadd.f32 %v3112_v47, %v1405_v30 }
 0x3ea   :  { %v1408_v44 = vpop.f32.mrb[15].mxu1  ;;  %v1418_v45 = vmul.f32 0.5, %v1411_v32 }
 0x3eb   :  { %3438 = vtanh.f32 %v1414_v42  ;;  %v1423_v49 = vmul.f32 0.5, %v1413_v48 }
 0x3ec   :  { %3440 = vtanh.f32 %v1418_v45 }
 0x3ed   :  { %3442 = vtanh.f32 %v1412_v46 }
 0x3ee   :  { %3444 = vtanh.f32 %v1423_v49  ;;  %v3149_v49 = vld [vmem:[%s4461_s0 + $0x80] sm:$0xff] }
 0x3f5   :  { %v3439_v50 = vpop.eup %3438 }
 0x3f6   :  { %v3441_v51 = vpop.eup %3440  ;;  %v1416_v52 = vadd.f32 1.0, %v3439_v50  ;;  %v3150_v50 = vld [vmem:[%s4461_s0 + $0x88] sm:$0xff] }
 0x3f7   :  { %v1420_v53 = vadd.f32 1.0, %v3441_v51  ;;  %v3443_v55 = vpop.eup %3442 }
 0x3f8   :  { %v1417_v54 = vmul.f32 0.5, %v1416_v52  ;;  %v3445_v24 = vpop.eup %3444 }
 0x3f9   :  { %v1421_v56 = vmul.f32 0.5, %v1420_v53  ;;  %v1425_v25 = vadd.f32 1.0, %v3445_v24 }
 0x3fa   :  { %v1429_v57 = vmul.f32 %v3443_v55, %v1417_v54 }
 0x3fb   :  { %v1428_v58 = vmul.f32 %v1421_v56, %v3908_v39  ;;  %v1426_v26 = vmul.f32 0.5, %v1425_v25  ;;  %v3151_v56 = vld [vmem:[%s4461_s0 + $0x90] sm:$0xff] }
 0x3fd   :  { %v4150_v59 = vadd.f32 %v1429_v57, %v1428_v58 }
 0x3ff   :  { %3446 = vtanh.f32 %v4150_v59 }
 0x409   :  { %v3447_v27 = vpop.eup %3446 }
 0x40a   :  { %v1432_v28 = vmul.f32 %v3447_v27, %v1426_v26 }
 0x40c   :  { %v1436_v29 = vcombine.high %v1432_v28, %v1432_v28  ;;  %v1443_v30 = vrot.slane %v1432_v28, %v3751_v40  ;;  %v1507_v31 = vpack.c.bf16 %v1432_v28, %v1432_v28 }
 0x40e   :  { %v1450_v32 = vrot.slane %v1436_v29, %v3751_v40  ;;  %v1451_v38 = vcombine.high %v1443_v30, %v1443_v30  ;;  %v1459_v41 = vrot.slane %v1443_v30, %v3751_v40  ;;  %3145 = vst.sshfl [vmem:[%s4462_s2 + $0x3] sm:$0x1 pattern:$0x73625140] %v1443_v30  ;;  %1733 = vmatmul.mubr.bf16.vlgmr.msra.gmra.mrb[16].mxu0 %v1507_v31  ;;  %v3152_v30 = vld [vmem:[%s4461_s0 + $0x98] sm:$0xff] }
 0x40f   :  { %1774 = vmatmul.mubr.bf16.vlgmr.msra.gmra.mrb[16].mxu1 %v1507_v31  ;;  %2073 = vmatpush1.bf16.msra.mxu0 %v3956_v63 }
 0x410   :  { %2114 = vmatpush1.bf16.msra.mxu1 %v3961_v33  ;;  %v1452_v39 = vcombine.high %v1450_v32, %v1450_v32  ;;  %v1466_v42 = vrot.slane %v1450_v32, %v3751_v40  ;;  %v1473_v43 = vrot.slane %v1451_v38, %v3751_v40  ;;  %v1481_v44 = vcombine.high %v1459_v41, %v1459_v41 }
 0x411   :  { %3146 = vst.sshfl [vmem:[%s4462_s2 + $0xb] sm:$0x1 pattern:$0x73625140] %v1451_v38  ;;  %2074 = vmatprep.subr.bf16.mxu0 %v3970_v34  ;;  %2115 = vmatprep.subr.bf16.mxu1 %v3975_v0 }
 0x412   :  { %3147 = vst.sshfl [vmem:[%s4462_s2 + $0x23] sm:$0x1 pattern:$0x73625140] %v1450_v32  ;;  %2104 = vmatprep.mubr.bf16.mxu0 %v3488_v1  ;;  %v1480_v45 = vrot.slane %v1452_v39, %v3751_v40  ;;  %v1482_v46 = vcombine.high %v1466_v42, %v1466_v42  ;;  %v1483_v47 = vcombine.high %v1473_v43, %v1473_v43  ;;  %1495 = vst [vmem:[%s4462_s2 + $0x13] sm:$0x1] %v1481_v44 }
 0x413   :  { %3148 = vst.sshfl [vmem:[%s4462_s2 + $0x2b] sm:$0x1 pattern:$0x73625140] %v1452_v39  ;;  %2145 = vmatprep.mubr.bf16.mxu1 %v3488_v1  ;;  %2075 = vmatpush1.bf16.msra.mxu0 %v3980_v62 }
 0x414   :  { %2116 = vmatpush1.bf16.msra.mxu1 %v3985_v35  ;;  %v1484_v48 = vcombine.high %v1480_v45, %v1480_v45  ;;  %1496 = vst [vmem:[%s4462_s2 + $0x1b] sm:$0x1] %v1483_v47  ;;  %1499 = vst [vmem:[%s4462_s2 + $0x33] sm:$0x1] %v1482_v46  ;;  %2076 = vmatprep.subr.bf16.mxu0 %v3994_v4 }
 0x415   :  { %2117 = vmatprep.subr.bf16.mxu1 %v3999_v36 }
 0x416   :  { %1500 = vst [vmem:[%s4462_s2 + $0x3b] sm:$0x1] %v1484_v48 }
 0x417   :  { %2077 = vmatpush1.bf16.msra.mxu0 %v4004_v2 }
 0x418   :  { %2118 = vmatpush1.bf16.msra.mxu1 %v4009_v6  ;;  %2078 = vmatprep.subr.bf16.mxu0 %v4018_v37 }
 0x419   :  { %2119 = vmatprep.subr.bf16.mxu1 %v4023_v3 }
 0x41b   :  { %2079 = vmatpush1.bf16.msra.mxu0 %v4028_v5 }
 0x41c   :  { %2120 = vmatpush1.bf16.msra.mxu1 %v4033_v7  ;;  %2080 = vmatprep.subr.bf16.mxu0 %v4042_v8 }
 0x41d   :  { %2121 = vmatprep.subr.bf16.mxu1 %v4047_v9 }
 0x41f   :  { %2081 = vmatpush1.bf16.msra.mxu0 %v4052_v10 }
 0x420   :  { %2122 = vmatpush1.bf16.msra.mxu1 %v4057_v11  ;;  %2082 = vmatprep.subr.bf16.mxu0 %v4066_v12 }
 0x421   :  { %2123 = vmatprep.subr.bf16.mxu1 %v4071_v13 }
 0x423   :  { %2083 = vmatpush1.bf16.msra.mxu0 %v4076_v14 }
 0x424   :  { %2124 = vmatpush1.bf16.msra.mxu1 %v4081_v15  ;;  %2084 = vmatprep.subr.bf16.mxu0 %v4090_v16 }
 0x425   :  { %2125 = vmatprep.subr.bf16.mxu1 %v4095_v17 }
 0x427   :  { %2085 = vmatpush1.bf16.msra.mxu0 %v4100_v18 }
 0x428   :  { %2126 = vmatpush1.bf16.msra.mxu1 %v4105_v19  ;;  %2086 = vmatprep.subr.bf16.mxu0 %v4114_v20 }
 0x429   :  { %2127 = vmatprep.subr.bf16.mxu1 %v4119_v21 }
 0x42b   :  { %2087 = vmatpush1.bf16.msra.mxu0 %v4124_v22 }
 0x42c   :  { %2128 = vmatpush1.bf16.msra.mxu1 %v4129_v23  ;;  %2444 = vmatprep.subr.bf16.mxu0 %v3946_v60 }
 0x42d   :  { %2485 = vmatprep.subr.bf16.mxu1 %v3951_v61 }
 0x4e1   :  { %v1734_v51 = vpop.f32.mrb[16].mxu0 }
 0x4e2   :  { %v1775_v52 = vpop.f32.mrb[16].mxu1  ;;  %v1782_v53 = vadd.f32 %v3149_v49, %v1734_v51  ;;  %v1736_v54 = vpop.f32.mrb[17].mxu0 }
 0x4e3   :  { %v1777_v55 = vpop.f32.mrb[17].mxu1  ;;  %v1783_v57 = vadd.f32 %v3150_v50, %v1736_v54  ;;  %v1738_v58 = vpop.f32.mrb[18].mxu0  ;;  %v1784_v29 = vadd.f32 %v3151_v56, %v1775_v52 }
 0x4e4   :  { %v1779_v24 = vpop.f32.mrb[18].mxu1  ;;  %v1786_v25 = vmul.f32 0.5, %v1782_v53  ;;  %v1739_v26 = vpop.f32.mrb[19].mxu0  ;;  %v1785_v31 = vadd.f32 %v3152_v30, %v1777_v55 }
 0x4e5   :  { %v1780_v27 = vpop.f32.mrb[19].mxu1  ;;  %v1790_v28 = vmul.f32 0.5, %v1783_v57 }
 0x4e6   :  { %3448 = vtanh.f32 %v1786_v25  ;;  %v1795_v32 = vmul.f32 0.5, %v1785_v31 }
 0x4e7   :  { %3450 = vtanh.f32 %v1790_v28 }
 0x4e8   :  { %3452 = vtanh.f32 %v1784_v29 }
 0x4e9   :  { %3454 = vtanh.f32 %v1795_v32  ;;  %v3189_v32 = vld [vmem:[%s4461_s0 + $0xa0] sm:$0xff] }
 0x4f0   :  { %v3449_v38 = vpop.eup %3448 }
 0x4f1   :  { %v3451_v41 = vpop.eup %3450  ;;  %v1788_v39 = vadd.f32 1.0, %v3449_v38  ;;  %v3190_v38 = vld [vmem:[%s4461_s0 + $0xa8] sm:$0xff] }
 0x4f2   :  { %v1792_v42 = vadd.f32 1.0, %v3451_v41  ;;  %v3453_v44 = vpop.eup %3452 }
 0x4f3   :  { %v1789_v43 = vmul.f32 0.5, %v1788_v39  ;;  %v3455_v49 = vpop.eup %3454 }
 0x4f4   :  { %v1793_v45 = vmul.f32 0.5, %v1792_v42  ;;  %v1797_v50 = vadd.f32 1.0, %v3455_v49 }
 0x4f5   :  { %v1801_v46 = vmul.f32 %v3453_v44, %v1789_v43 }
 0x4f6   :  { %v1800_v47 = vmul.f32 %v1793_v45, %v4150_v59  ;;  %v1798_v51 = vmul.f32 0.5, %v1797_v50  ;;  %v3191_v45 = vld [vmem:[%s4461_s0 + $0xb0] sm:$0xff] }
 0x4f8   :  { %v4230_v48 = vadd.f32 %v1801_v46, %v1800_v47 }
 0x4fa   :  { %3456 = vtanh.f32 %v4230_v48 }
 0x504   :  { %v3457_v52 = vpop.eup %3456 }
 0x505   :  { %v1804_v53 = vmul.f32 %v3457_v52, %v1798_v51 }
 0x507   :  { %v1808_v54 = vcombine.high %v1804_v53, %v1804_v53  ;;  %v1815_v55 = vrot.slane %v1804_v53, %v3751_v40  ;;  %v1879_v56 = vpack.c.bf16 %v1804_v53, %v1804_v53  ;;  %v3192_v53 = vld [vmem:[%s4461_s0 + $0xb8] sm:$0xff] }
 0x509   :  { %v1822_v57 = vrot.slane %v1808_v54, %v3751_v40  ;;  %v1823_v58 = vcombine.high %v1815_v55, %v1815_v55  ;;  %v1831_v24 = vrot.slane %v1815_v55, %v3751_v40  ;;  %3185 = vst.sshfl [vmem:[%s4462_s2 + $0x4] sm:$0x1 pattern:$0x73625140] %v1815_v55  ;;  %2105 = vmatmul.mubr.bf16.vlgmr.msra.gmra.mrb[20].mxu0 %v1879_v56 }
 0x50a   :  { %2146 = vmatmul.mubr.bf16.vlgmr.msra.gmra.mrb[20].mxu1 %v1879_v56  ;;  %2445 = vmatpush1.bf16.msra.mxu0 %v3956_v63 }
 0x50b   :  { %2486 = vmatpush1.bf16.msra.mxu1 %v3961_v33  ;;  %v1824_v59 = vcombine.high %v1822_v57, %v1822_v57  ;;  %v1838_v25 = vrot.slane %v1822_v57, %v3751_v40  ;;  %v1845_v26 = vrot.slane %v1823_v58, %v3751_v40  ;;  %v1853_v27 = vcombine.high %v1831_v24, %v1831_v24 }
 0x50c   :  { %3186 = vst.sshfl [vmem:[%s4462_s2 + $0xc] sm:$0x1 pattern:$0x73625140] %v1823_v58  ;;  %2446 = vmatprep.subr.bf16.mxu0 %v3970_v34  ;;  %2487 = vmatprep.subr.bf16.mxu1 %v3975_v0 }
 0x50d   :  { %3187 = vst.sshfl [vmem:[%s4462_s2 + $0x24] sm:$0x1 pattern:$0x73625140] %v1822_v57  ;;  %2476 = vmatprep.mubr.bf16.mxu0 %v3488_v1  ;;  %v1852_v28 = vrot.slane %v1824_v59, %v3751_v40  ;;  %v1854_v29 = vcombine.high %v1838_v25, %v1838_v25  ;;  %v1855_v30 = vcombine.high %v1845_v26, %v1845_v26  ;;  %1867 = vst [vmem:[%s4462_s2 + $0x14] sm:$0x1] %v1853_v27 }
 0x50e   :  { %3188 = vst.sshfl [vmem:[%s4462_s2 + $0x2c] sm:$0x1 pattern:$0x73625140] %v1824_v59  ;;  %2517 = vmatprep.mubr.bf16.mxu1 %v3488_v1  ;;  %2447 = vmatpush1.bf16.msra.mxu0 %v3980_v62 }
 0x50f   :  { %2488 = vmatpush1.bf16.msra.mxu1 %v3985_v35  ;;  %v1856_v31 = vcombine.high %v1852_v28, %v1852_v28  ;;  %1868 = vst [vmem:[%s4462_s2 + $0x1c] sm:$0x1] %v1855_v30  ;;  %1871 = vst [vmem:[%s4462_s2 + $0x34] sm:$0x1] %v1854_v29  ;;  %2448 = vmatprep.subr.bf16.mxu0 %v3994_v4 }
 0x510   :  { %2489 = vmatprep.subr.bf16.mxu1 %v3999_v36 }
 0x511   :  { %1872 = vst [vmem:[%s4462_s2 + $0x3c] sm:$0x1] %v1856_v31 }
 0x512   :  { %2449 = vmatpush1.bf16.msra.mxu0 %v4004_v2 }
 0x513   :  { %2490 = vmatpush1.bf16.msra.mxu1 %v4009_v6  ;;  %2450 = vmatprep.subr.bf16.mxu0 %v4018_v37 }
 0x514   :  { %2491 = vmatprep.subr.bf16.mxu1 %v4023_v3 }
 0x516   :  { %2451 = vmatpush1.bf16.msra.mxu0 %v4028_v5 }
 0x517   :  { %2492 = vmatpush1.bf16.msra.mxu1 %v4033_v7  ;;  %2452 = vmatprep.subr.bf16.mxu0 %v4042_v8 }
 0x518   :  { %2493 = vmatprep.subr.bf16.mxu1 %v4047_v9 }
 0x51a   :  { %2453 = vmatpush1.bf16.msra.mxu0 %v4052_v10 }
 0x51b   :  { %2494 = vmatpush1.bf16.msra.mxu1 %v4057_v11  ;;  %2454 = vmatprep.subr.bf16.mxu0 %v4066_v12 }
 0x51c   :  { %2495 = vmatprep.subr.bf16.mxu1 %v4071_v13 }
 0x51e   :  { %2455 = vmatpush1.bf16.msra.mxu0 %v4076_v14 }
 0x51f   :  { %2496 = vmatpush1.bf16.msra.mxu1 %v4081_v15  ;;  %2456 = vmatprep.subr.bf16.mxu0 %v4090_v16 }
 0x520   :  { %2497 = vmatprep.subr.bf16.mxu1 %v4095_v17 }
 0x522   :  { %2457 = vmatpush1.bf16.msra.mxu0 %v4100_v18 }
 0x523   :  { %2498 = vmatpush1.bf16.msra.mxu1 %v4105_v19  ;;  %2458 = vmatprep.subr.bf16.mxu0 %v4114_v20 }
 0x524   :  { %2499 = vmatprep.subr.bf16.mxu1 %v4119_v21 }
 0x526   :  { %2459 = vmatpush1.bf16.msra.mxu0 %v4124_v22 }
 0x527   :  { %2500 = vmatpush1.bf16.msra.mxu1 %v4129_v23  ;;  %2816 = vmatprep.subr.bf16.mxu0 %v3946_v60 }
 0x528   :  { %2857 = vmatprep.subr.bf16.mxu1 %v3951_v61 }
 0x5dc   :  { %v2106_v41 = vpop.f32.mrb[20].mxu0 }
 0x5dd   :  { %v2147_v39 = vpop.f32.mrb[20].mxu1  ;;  %v2154_v42 = vadd.f32 %v3189_v32, %v2106_v41  ;;  %v2108_v43 = vpop.f32.mrb[21].mxu0 }
 0x5de   :  { %v2149_v44 = vpop.f32.mrb[21].mxu1  ;;  %v2155_v60 = vadd.f32 %v3190_v38, %v2108_v43  ;;  %v2110_v46 = vpop.f32.mrb[22].mxu0  ;;  %v2156_v52 = vadd.f32 %v3191_v45, %v2147_v39 }
 0x5df   :  { %v2151_v61 = vpop.f32.mrb[22].mxu1  ;;  %v2158_v47 = vmul.f32 0.5, %v2154_v42  ;;  %v2111_v49 = vpop.f32.mrb[23].mxu0  ;;  %v2157_v54 = vadd.f32 %v3192_v53, %v2149_v44 }
 0x5e0   :  { %v2152_v50 = vpop.f32.mrb[23].mxu1  ;;  %v2162_v51 = vmul.f32 0.5, %v2155_v60 }
 0x5e1   :  { %3458 = vtanh.f32 %v2158_v47  ;;  %v2167_v55 = vmul.f32 0.5, %v2157_v54 }
 0x5e2   :  { %3460 = vtanh.f32 %v2162_v51 }
 0x5e3   :  { %3462 = vtanh.f32 %v2156_v52 }
 0x5e4   :  { %3464 = vtanh.f32 %v2167_v55 }
 0x5eb   :  { %v3459_v56 = vpop.eup %3458 }
 0x5ec   :  { %v3461_v57 = vpop.eup %3460  ;;  %v2160_v58 = vadd.f32 1.0, %v3459_v56 }
 0x5ed   :  { %v2164_v24 = vadd.f32 1.0, %v3461_v57  ;;  %v3463_v25 = vpop.eup %3462 }
 0x5ee   :  { %v2161_v59 = vmul.f32 0.5, %v2160_v58  ;;  %v3465_v30 = vpop.eup %3464 }
 0x5ef   :  { %v2165_v26 = vmul.f32 0.5, %v2164_v24  ;;  %v2169_v31 = vadd.f32 1.0, %v3465_v30 }
 0x5f0   :  { %v2173_v27 = vmul.f32 %v3463_v25, %v2161_v59 }
 0x5f1   :  { %v2172_v28 = vmul.f32 %v2165_v26, %v4230_v48  ;;  %v2170_v32 = vmul.f32 0.5, %v2169_v31 }
 0x5f3   :  { %v4310_v29 = vadd.f32 %v2173_v27, %v2172_v28 }
 0x5f5   :  { %3466 = vtanh.f32 %v4310_v29 }
 0x5ff   :  { %v3467_v38 = vpop.eup %3466 }
 0x600   :  { %v2176_v41 = vmul.f32 %v3467_v38, %v2170_v32 }
 0x602   :  { %v2180_v39 = vcombine.high %v2176_v41, %v2176_v41  ;;  %v2187_v42 = vrot.slane %v2176_v41, %v3751_v40  ;;  %v2251_v43 = vpack.c.bf16 %v2176_v41, %v2176_v41  ;;  %v3269_v41 = vld [vmem:[%s4461_s0 + $0xe0] sm:$0xff] }
 0x604   :  { %v2194_v44 = vrot.slane %v2180_v39, %v3751_v40  ;;  %v2195_v45 = vcombine.high %v2187_v42, %v2187_v42  ;;  %v2203_v60 = vrot.slane %v2187_v42, %v3751_v40  ;;  %3225 = vst.sshfl [vmem:[%s4462_s2 + $0x5] sm:$0x1 pattern:$0x73625140] %v2187_v42  ;;  %2477 = vmatmul.mubr.bf16.vlgmr.msra.gmra.mrb[24].mxu0 %v2251_v43  ;;  %v3270_v39 = vld [vmem:[%s4461_s0 + $0xe8] sm:$0xff] }
 0x605   :  { %2518 = vmatmul.mubr.bf16.vlgmr.msra.gmra.mrb[24].mxu1 %v2251_v43  ;;  %2817 = vmatpush1.bf16.msra.mxu0 %v3956_v63 }
 0x606   :  { %2858 = vmatpush1.bf16.msra.mxu1 %v3961_v33  ;;  %v2196_v48 = vcombine.high %v2194_v44, %v2194_v44  ;;  %v2210_v46 = vrot.slane %v2194_v44, %v3751_v40  ;;  %v2217_v61 = vrot.slane %v2195_v45, %v3751_v40  ;;  %v2225_v47 = vcombine.high %v2203_v60, %v2203_v60 }
 0x607   :  { %3226 = vst.sshfl [vmem:[%s4462_s2 + $0xd] sm:$0x1 pattern:$0x73625140] %v2195_v45  ;;  %2818 = vmatprep.subr.bf16.mxu0 %v3970_v34  ;;  %2859 = vmatprep.subr.bf16.mxu1 %v3975_v0  ;;  %v3230_v0 = vld [vmem:[%s4461_s0 + $0xc8] sm:$0xff] }
 0x608   :  { %3227 = vst.sshfl [vmem:[%s4462_s2 + $0x25] sm:$0x1 pattern:$0x73625140] %v2194_v44  ;;  %2848 = vmatprep.mubr.bf16.mxu0 %v3488_v1  ;;  %v2224_v63 = vrot.slane %v2196_v48, %v3751_v40  ;;  %v2226_v33 = vcombine.high %v2210_v46, %v2210_v46  ;;  %v2227_v49 = vcombine.high %v2217_v61, %v2217_v61  ;;  %2239 = vst [vmem:[%s4462_s2 + $0x15] sm:$0x1] %v2225_v47 }
 0x609   :  { %3228 = vst.sshfl [vmem:[%s4462_s2 + $0x2d] sm:$0x1 pattern:$0x73625140] %v2196_v48  ;;  %2889 = vmatprep.mubr.bf16.mxu1 %v3488_v1  ;;  %2819 = vmatpush1.bf16.msra.mxu0 %v3980_v62  ;;  %v3229_v1 = vld [vmem:[%s4461_s0 + $0xc0] sm:$0xff]  ;;  %v3271_v48 = vld [vmem:[%s4461_s0 + $0xf0] sm:$0xff] }
 0x60a   :  { %2860 = vmatpush1.bf16.msra.mxu1 %v3985_v35  ;;  %v2228_v34 = vcombine.high %v2224_v63, %v2224_v63  ;;  %2240 = vst [vmem:[%s4462_s2 + $0x1d] sm:$0x1] %v2227_v49  ;;  %2243 = vst [vmem:[%s4462_s2 + $0x35] sm:$0x1] %v2226_v33  ;;  %2820 = vmatprep.subr.bf16.mxu0 %v3994_v4 }
 0x60b   :  { %2861 = vmatprep.subr.bf16.mxu1 %v3999_v36 }
 0x60c   :  { %2244 = vst [vmem:[%s4462_s2 + $0x3d] sm:$0x1] %v2228_v34 }
 0x60d   :  { %2821 = vmatpush1.bf16.msra.mxu0 %v4004_v2 }
 0x60e   :  { %2862 = vmatpush1.bf16.msra.mxu1 %v4009_v6  ;;  %2822 = vmatprep.subr.bf16.mxu0 %v4018_v37  ;;  %v3231_v6 = vld [vmem:[%s4461_s0 + $0xd0] sm:$0xff] }
 0x60f   :  { %2863 = vmatprep.subr.bf16.mxu1 %v4023_v3 }
 0x611   :  { %2823 = vmatpush1.bf16.msra.mxu0 %v4028_v5 }
 0x612   :  { %2864 = vmatpush1.bf16.msra.mxu1 %v4033_v7  ;;  %2824 = vmatprep.subr.bf16.mxu0 %v4042_v8 }
 0x613   :  { %2865 = vmatprep.subr.bf16.mxu1 %v4047_v9 }
 0x615   :  { %2825 = vmatpush1.bf16.msra.mxu0 %v4052_v10 }
 0x616   :  { %2866 = vmatpush1.bf16.msra.mxu1 %v4057_v11  ;;  %2826 = vmatprep.subr.bf16.mxu0 %v4066_v12  ;;  %v3232_v12 = vld [vmem:[%s4461_s0 + $0xd8] sm:$0xff] }
 0x617   :  { %2867 = vmatprep.subr.bf16.mxu1 %v4071_v13 }
 0x619   :  { %2827 = vmatpush1.bf16.msra.mxu0 %v4076_v14 }
 0x61a   :  { %2868 = vmatpush1.bf16.msra.mxu1 %v4081_v15  ;;  %2828 = vmatprep.subr.bf16.mxu0 %v4090_v16 }
 0x61b   :  { %2869 = vmatprep.subr.bf16.mxu1 %v4095_v17 }
 0x61d   :  { %2829 = vmatpush1.bf16.msra.mxu0 %v4100_v18 }
 0x61e   :  { %2870 = vmatpush1.bf16.msra.mxu1 %v4105_v19  ;;  %2830 = vmatprep.subr.bf16.mxu0 %v4114_v20 }
 0x61f   :  { %2871 = vmatprep.subr.bf16.mxu1 %v4119_v21 }
 0x621   :  { %2831 = vmatpush1.bf16.msra.mxu0 %v4124_v22 }
 0x622   :  { %2872 = vmatpush1.bf16.msra.mxu1 %v4129_v23 }
 0x6d7   :  { %v2478_v62 = vpop.f32.mrb[24].mxu0 }
 0x6d8   :  { %v2519_v35 = vpop.f32.mrb[24].mxu1  ;;  %v2526_v4 = vadd.f32 %v3229_v1, %v2478_v62  ;;  %v2480_v36 = vpop.f32.mrb[25].mxu0 }
 0x6d9   :  { %v2521_v2 = vpop.f32.mrb[25].mxu1  ;;  %v2527_v37 = vadd.f32 %v3230_v0, %v2480_v36  ;;  %v2482_v3 = vpop.f32.mrb[26].mxu0  ;;  %v2528_v11 = vadd.f32 %v3231_v6, %v2519_v35  ;;  %v3272_v0 = vld [vmem:[%s4461_s0 + $0xf8] sm:$0xff] }
 0x6da   :  { %v2523_v5 = vpop.f32.mrb[26].mxu1  ;;  %v2530_v7 = vmul.f32 0.5, %v2526_v4  ;;  %v2483_v8 = vpop.f32.mrb[27].mxu0  ;;  %v2529_v13 = vadd.f32 %v3232_v12, %v2521_v2 }
 0x6db   :  { %v2524_v9 = vpop.f32.mrb[27].mxu1  ;;  %v2534_v10 = vmul.f32 0.5, %v2527_v37 }
 0x6dc   :  { %3468 = vtanh.f32 %v2530_v7  ;;  %v2539_v14 = vmul.f32 0.5, %v2529_v13 }
 0x6dd   :  { %3470 = vtanh.f32 %v2534_v10 }
 0x6de   :  { %3472 = vtanh.f32 %v2528_v11 }
 0x6df   :  { %3474 = vtanh.f32 %v2539_v14 }
 0x6e6   :  { %v3469_v15 = vpop.eup %3468 }
 0x6e7   :  { %v3471_v16 = vpop.eup %3470  ;;  %v2532_v17 = vadd.f32 1.0, %v3469_v15 }
 0x6e8   :  { %v2536_v18 = vadd.f32 1.0, %v3471_v16  ;;  %v3473_v20 = vpop.eup %3472 }
 0x6e9   :  { %v2533_v19 = vmul.f32 0.5, %v2532_v17  ;;  %v3475_v51 = vpop.eup %3474 }
 0x6ea   :  { %v2537_v21 = vmul.f32 0.5, %v2536_v18  ;;  %v2541_v52 = vadd.f32 1.0, %v3475_v51 }
 0x6eb   :  { %v2545_v22 = vmul.f32 %v3473_v20, %v2533_v19 }
 0x6ec   :  { %v2544_v23 = vmul.f32 %v2537_v21, %v4310_v29  ;;  %v2542_v53 = vmul.f32 0.5, %v2541_v52 }
 0x6ee   :  { %v2546_v50 = vadd.f32 %v2545_v22, %v2544_v23 }
 0x6f0   :  { %3476 = vtanh.f32 %v2546_v50 }
 0x6fa   :  { %v3477_v54 = vpop.eup %3476 }
 0x6fb   :  { %v2548_v55 = vmul.f32 %v3477_v54, %v2542_v53 }
 0x6fd   :  { %v2552_v56 = vcombine.high %v2548_v55, %v2548_v55  ;;  %v2559_v57 = vrot.slane %v2548_v55, %v3751_v40  ;;  %v2623_v58 = vpack.c.bf16 %v2548_v55, %v2548_v55 }
 0x6ff   :  { %v2566_v24 = vrot.slane %v2552_v56, %v3751_v40  ;;  %v2567_v59 = vcombine.high %v2559_v57, %v2559_v57  ;;  %v2575_v25 = vrot.slane %v2559_v57, %v3751_v40  ;;  %3265 = vst.sshfl [vmem:[%s4462_s2 + $0x6] sm:$0x1 pattern:$0x73625140] %v2559_v57  ;;  %2849 = vmatmul.mubr.bf16.vlgmr.msra.gmra.mrb[28].mxu0 %v2623_v58 }
 0x700   :  { %2890 = vmatmul.mubr.bf16.vlgmr.msra.gmra.mrb[28].mxu1 %v2623_v58 }
 0x701   :  { %v2568_v26 = vcombine.high %v2566_v24, %v2566_v24  ;;  %v2582_v27 = vrot.slane %v2566_v24, %v3751_v40  ;;  %v2589_v28 = vrot.slane %v2567_v59, %v3751_v40  ;;  %v2597_v29 = vcombine.high %v2575_v25, %v2575_v25  ;;  %3266 = vst.sshfl [vmem:[%s4462_s2 + $0xe] sm:$0x1 pattern:$0x73625140] %v2567_v59 }
 0x702   :  { %3267 = vst.sshfl [vmem:[%s4462_s2 + $0x26] sm:$0x1 pattern:$0x73625140] %v2566_v24 }
 0x703   :  { %v2596_v30 = vrot.slane %v2568_v26, %v3751_v40  ;;  %v2598_v31 = vcombine.high %v2582_v27, %v2582_v27  ;;  %v2599_v32 = vcombine.high %v2589_v28, %v2589_v28  ;;  %2611 = vst [vmem:[%s4462_s2 + $0x16] sm:$0x1] %v2597_v29  ;;  %3268 = vst.sshfl [vmem:[%s4462_s2 + $0x2e] sm:$0x1 pattern:$0x73625140] %v2568_v26 }
 0x705   :  { %v2600_v38 = vcombine.high %v2596_v30, %v2596_v30  ;;  %2612 = vst [vmem:[%s4462_s2 + $0x1e] sm:$0x1] %v2599_v32  ;;  %2615 = vst [vmem:[%s4462_s2 + $0x36] sm:$0x1] %v2598_v31 }
 0x707   :  { %2616 = vst [vmem:[%s4462_s2 + $0x3e] sm:$0x1] %v2600_v38 }
 0x7d2   :  { %v2850_v42 = vpop.f32.mrb[28].mxu0 }
 0x7d3   :  { %v2891_v43 = vpop.f32.mrb[28].mxu1  ;;  %v2898_v44 = vadd.f32 %v3269_v41, %v2850_v42  ;;  %v2852_v45 = vpop.f32.mrb[29].mxu0 }
 0x7d4   :  { %v2893_v60 = vpop.f32.mrb[29].mxu1  ;;  %v2899_v46 = vadd.f32 %v3270_v39, %v2852_v45  ;;  %v2854_v61 = vpop.f32.mrb[30].mxu0  ;;  %v2900_v1 = vadd.f32 %v3271_v48, %v2891_v43 }
 0x7d5   :  { %v2895_v47 = vpop.f32.mrb[30].mxu1  ;;  %v2902_v63 = vmul.f32 0.5, %v2898_v44  ;;  %v2855_v33 = vpop.f32.mrb[31].mxu0  ;;  %v2901_v62 = vadd.f32 %v3272_v0, %v2893_v60 }
 0x7d6   :  { %v2896_v49 = vpop.f32.mrb[31].mxu1  ;;  %v2906_v34 = vmul.f32 0.5, %v2899_v46 }
 0x7d7   :  { %3478 = vtanh.f32 %v2902_v63  ;;  %v2911_v35 = vmul.f32 0.5, %v2901_v62 }
 0x7d8   :  { %3480 = vtanh.f32 %v2906_v34 }
 0x7d9   :  { %3482 = vtanh.f32 %v2900_v1 }
 0x7da   :  { %3484 = vtanh.f32 %v2911_v35 }
 0x7e1   :  { %v3479_v4 = vpop.eup %3478 }
 0x7e2   :  { %v3481_v36 = vpop.eup %3480  ;;  %v2904_v2 = vadd.f32 1.0, %v3479_v4 }
 0x7e3   :  { %v2908_v6 = vadd.f32 1.0, %v3481_v36  ;;  %v3483_v3 = vpop.eup %3482 }
 0x7e4   :  { %v2905_v37 = vmul.f32 0.5, %v2904_v2  ;;  %v3485_v10 = vpop.eup %3484 }
 0x7e5   :  { %v2909_v5 = vmul.f32 0.5, %v2908_v6  ;;  %v2913_v11 = vadd.f32 1.0, %v3485_v10 }
 0x7e6   :  { %v2917_v7 = vmul.f32 %v3483_v3, %v2905_v37 }
 0x7e7   :  { %v2916_v8 = vmul.f32 %v2909_v5, %v2546_v50  ;;  %v2914_v12 = vmul.f32 0.5, %v2913_v11 }
 0x7e9   :  { %v2918_v9 = vadd.f32 %v2917_v7, %v2916_v8 }
 0x7eb   :  { %3486 = vtanh.f32 %v2918_v9 }
 0x7f5   :  { %v3487_v13 = vpop.eup %3486 }
 0x7f6   :  { %v2920_v14 = vmul.f32 %v3487_v13, %v2914_v12 }
 0x7f8   :  { %v2924_v15 = vcombine.high %v2920_v14, %v2920_v14  ;;  %v2931_v16 = vrot.slane %v2920_v14, %v3751_v40 }
 0x7fa   :  { %v2938_v17 = vrot.slane %v2924_v15, %v3751_v40  ;;  %v2939_v18 = vcombine.high %v2931_v16, %v2931_v16  ;;  %v2947_v19 = vrot.slane %v2931_v16, %v3751_v40  ;;  %3305 = vst.sshfl [vmem:[%s4462_s2 + $0x7] sm:$0x1 pattern:$0x73625140] %v2931_v16 }
 0x7fc   :  { %v2940_v20 = vcombine.high %v2938_v17, %v2938_v17  ;;  %v2954_v21 = vrot.slane %v2938_v17, %v3751_v40  ;;  %v2961_v22 = vrot.slane %v2939_v18, %v3751_v40  ;;  %v2969_v23 = vcombine.high %v2947_v19, %v2947_v19  ;;  %3306 = vst.sshfl [vmem:[%s4462_s2 + $0xf] sm:$0x1 pattern:$0x73625140] %v2939_v18 }
 0x7fd   :  { %3307 = vst.sshfl [vmem:[%s4462_s2 + $0x27] sm:$0x1 pattern:$0x73625140] %v2938_v17 }
 0x7fe   :  { %v2968_v50 = vrot.slane %v2940_v20, %v3751_v40  ;;  %v2970_v51 = vcombine.high %v2954_v21, %v2954_v21  ;;  %v2971_v52 = vcombine.high %v2961_v22, %v2961_v22  ;;  %2983 = vst [vmem:[%s4462_s2 + $0x17] sm:$0x1] %v2969_v23  ;;  %3308 = vst.sshfl [vmem:[%s4462_s2 + $0x2f] sm:$0x1 pattern:$0x73625140] %v2940_v20 }
 0x800   :  { %v2972_v53 = vcombine.high %v2968_v50, %v2968_v50  ;;  %2984 = vst [vmem:[%s4462_s2 + $0x1f] sm:$0x1] %v2971_v52  ;;  %2987 = vst [vmem:[%s4462_s2 + $0x37] sm:$0x1] %v2970_v51 }
 0x802   :  { %2988 = vst [vmem:[%s4462_s2 + $0x3f] sm:$0x1] %v2972_v53 }

</bundles_post_ra>
